<compile_context>
chip_gen: v7x
topology: tpu7x:2x2x1
jax: 0.10.0
libtpu: 0.0.40
codegen_flags: <defaults>
</compile_context>

<pallas_src>
import functools

import jax
import jax.numpy as jnp
from jax.experimental import pallas as pl
from jax.experimental.pallas import tpu as pltpu


# ----------------------------- Pallas kernels ------------------------------

def _compiler_params():
    return pltpu.CompilerParams(
        dimension_semantics=("parallel",),          # shard batch across TCs (v7x)
        vmem_limit_bytes=32 * 1024 * 1024,
    )


def _stem_kernel(p_ref, w_ref, b_ref, o_ref, *, H, W):
    # p: (1, H*W, Kp) bf16   w: (Kp, C) bf16   b: (1, C) f32   o: (1, H, W, C) f32
    acc = jnp.dot(p_ref[0], w_ref[...], preferred_element_type=jnp.float32)
    res = jnp.maximum(acc + b_ref[...], 0.0)
    o_ref[0] = res.reshape(H, W, w_ref.shape[-1])


def _conv3x3_kernel(x_ref, w_ref, b_ref, o_ref, *, H, W, relu):
    # x: (1, H+2, W+2, Cin) f32 (zero padded)   w: (9*Cin, Cout) bf16
    # b: (1, Cout) f32                          o: (1, H, W, Cout) f32
    cin = x_ref.shape[-1]
    cout = w_ref.shape[-1]
    acc = jnp.zeros((H * W, cout), jnp.float32)
    for t in range(9):                              # in-kernel im2col: 9 shifted dots
        di, dj = divmod(t, 3)
        win = x_ref[0, di:di + H, dj:dj + W, :].reshape(H * W, cin)
        acc = acc + jnp.dot(win.astype(jnp.bfloat16),
                            w_ref[t * cin:(t + 1) * cin, :],
                            preferred_element_type=jnp.float32)
    res = acc + b_ref[...]
    if relu:
        res = jnp.maximum(res, 0.0)
    o_ref[0] = res.reshape(H, W, cout)


def _conv3x3_residual_gap_kernel(x_ref, skip_ref, w_ref, b_ref, o_ref, *, H, W):
    # Fused: conv3x3 + bias + residual add + ReLU + AdaptiveAvgPool2d((1,1)).
    # x: (1, H+2, W+2, C) f32   skip: (1, H, W, C) f32   o: (1, 1, C) f32
    cin = x_ref.shape[-1]
    cout = w_ref.shape[-1]
    acc = jnp.zeros((H * W, cout), jnp.float32)
    for t in range(9):
        di, dj = divmod(t, 3)
        win = x_ref[0, di:di + H, dj:dj + W, :].reshape(H * W, cin)
        acc = acc + jnp.dot(win.astype(jnp.bfloat16),
                            w_ref[t * cin:(t + 1) * cin, :],
                            preferred_element_type=jnp.float32)
    resid = skip_ref[0].reshape(H * W, cout)
    res = jnp.maximum(acc + b_ref[...] + resid, 0.0)
    o_ref[0] = jnp.mean(res, axis=0, keepdims=True)     # (1, C) pooled


# ------------------------------ pallas_call wrappers ------------------------

def stem_conv_bn_relu(patches, w, b, *, H, W):
    """patches: (B, H*W, Kp) bf16, w: (Kp, C) bf16, b: (1, C) f32 -> (B,H,W,C) f32."""
    B, M, Kp = patches.shape
    C = w.shape[-1]
    return pl.pallas_call(
        functools.partial(_stem_kernel, H=H, W=W),
        out_shape=jax.ShapeDtypeStruct((B, H, W, C), jnp.float32),
        grid_spec=pltpu.PrefetchScalarGridSpec(
            num_scalar_prefetch=0,
            grid=(B,),
            in_specs=[
                pl.BlockSpec((1, M, Kp), lambda bi: (bi, 0, 0)),
                pl.BlockSpec((Kp, C), lambda bi: (0, 0)),
                pl.BlockSpec((1, C), lambda bi: (0, 0)),
            ],
            out_specs=pl.BlockSpec((1, H, W, C), lambda bi: (bi, 0, 0, 0)),
        ),
        compiler_params=_compiler_params(),
        cost_estimate=pl.CostEstimate(
            flops=2 * B * M * Kp * C,
            transcendentals=0,
            bytes_accessed=(patches.size * 2 + w.size * 2 + b.size * 4
                            + B * H * W * C * 4)),
    )(patches, w, b)


def conv3x3_bn_act(x_pad, w, b, *, relu):
    """x_pad: (B, H+2, W+2, Cin) f32, w: (9*Cin, Cout) bf16 -> (B,H,W,Cout) f32."""
    B, Hp, Wp, Cin = x_pad.shape
    H, W = Hp - 2, Wp - 2
    Cout = w.shape[-1]
    return pl.pallas_call(
        functools.partial(_conv3x3_kernel, H=H, W=W, relu=relu),
        out_shape=jax.ShapeDtypeStruct((B, H, W, Cout), jnp.float32),
        grid_spec=pltpu.PrefetchScalarGridSpec(
            num_scalar_prefetch=0,
            grid=(B,),
            in_specs=[
                pl.BlockSpec((1, Hp, Wp, Cin), lambda bi: (bi, 0, 0, 0)),
                pl.BlockSpec((9 * Cin, Cout), lambda bi: (0, 0)),
                pl.BlockSpec((1, Cout), lambda bi: (0, 0)),
            ],
            out_specs=pl.BlockSpec((1, H, W, Cout), lambda bi: (bi, 0, 0, 0)),
        ),
        compiler_params=_compiler_params(),
        cost_estimate=pl.CostEstimate(
            flops=2 * B * H * W * 9 * Cin * Cout,
            transcendentals=0,
            bytes_accessed=(x_pad.size * 4 + w.size * 2 + b.size * 4
                            + B * H * W * Cout * 4)),
    )(x_pad, w, b)


def conv3x3_bn_residual_gap(x_pad, skip, w, b):
    """Fused conv + bias + residual + ReLU + global-avg-pool -> (B, 1, Cout) f32."""
    B, Hp, Wp, Cin = x_pad.shape
    H, W = Hp - 2, Wp - 2
    Cout = w.shape[-1]
    return pl.pallas_call(
        functools.partial(_conv3x3_residual_gap_kernel, H=H, W=W),
        out_shape=jax.ShapeDtypeStruct((B, 1, Cout), jnp.float32),
        grid_spec=pltpu.PrefetchScalarGridSpec(
            num_scalar_prefetch=0,
            grid=(B,),
            in_specs=[
                pl.BlockSpec((1, Hp, Wp, Cin), lambda bi: (bi, 0, 0, 0)),
                pl.BlockSpec((1, H, W, Cout), lambda bi: (bi, 0, 0, 0)),
                pl.BlockSpec((9 * Cin, Cout), lambda bi: (0, 0)),
                pl.BlockSpec((1, Cout), lambda bi: (0, 0)),
            ],
            out_specs=pl.BlockSpec((1, 1, Cout), lambda bi: (bi, 0, 0)),
        ),
        compiler_params=_compiler_params(),
        cost_estimate=pl.CostEstimate(
            flops=2 * B * H * W * 9 * Cin * Cout,
            transcendentals=0,
            bytes_accessed=(x_pad.size * 4 + skip.size * 4 + w.size * 2
                            + b.size * 4 + B * Cout * 4)),
    )(x_pad, skip, w, b)


# ------------------------------- JAX glue ----------------------------------

def extract_patches(x_nhwc, k=3, pad=1):
    """im2col for the tiny 3-channel stem only (9*Cin = 27 cols)."""
    B, H, W, C = x_nhwc.shape
    xp = jnp.pad(x_nhwc, ((0, 0), (pad, pad), (pad, pad), (0, 0)))
    cols = []
    for di in range(k):
        for dj in range(k):
            cols.append(xp[:, di:di + H, dj:dj + W, :])
    return jnp.concatenate(cols, axis=-1)           # (B, H, W, k*k*C)


def fold_bn(w_khkwcico, gamma, beta, mean, var, eps=1e-5):
    """Fold eval-mode BatchNorm into the preceding conv (w: kh,kw,ci,co)."""
    scale = gamma / jnp.sqrt(var + eps)
    w_f = w_khkwcico * scale[None, None, None, :]
    b_f = beta - mean * scale
    return w_f, b_f


def make_conv_bn(key, cin, cout, k=3, k_pad_to=None):
    kw_key, g_key, b_key, m_key, v_key = jax.random.split(key, 5)
    fan_in = k * k * cin
    w = jax.random.normal(kw_key, (k, k, cin, cout), jnp.float32) * (
        (2.0 / fan_in) ** 0.5)
    gamma = 1.0 + 0.01 * jax.random.normal(g_key, (cout,), jnp.float32)
    beta = 0.01 * jax.random.normal(b_key, (cout,), jnp.float32)
    mean = 0.01 * jax.random.normal(m_key, (cout,), jnp.float32)
    var = jnp.abs(1.0 + 0.01 * jax.random.normal(v_key, (cout,), jnp.float32))
    w_f, b_f = fold_bn(w, gamma, beta, mean, var)
    K = k * k * cin
    w2d = w_f.reshape(K, cout)
    if k_pad_to is not None and k_pad_to > K:
        w2d = jnp.pad(w2d, ((0, k_pad_to - K), (0, 0)))   # zero rows for K padding
    return w2d.astype(jnp.bfloat16), b_f.reshape(1, cout).astype(jnp.float32)


def init_params(key, cin=3, width=128):
    k0, k1, k2 = jax.random.split(key, 3)
    k_stem_pad = ((9 * cin + 31) // 32) * 32
    return {
        "stem": make_conv_bn(k0, cin, width, k_pad_to=k_stem_pad),
        "block_conv1": make_conv_bn(k1, width, width),
        "block_conv2": make_conv_bn(k2, width, width),
    }


def net_forward(x_nchw, params):
    """Equivalent of Net.forward: backbone features + global average pool.

    x_nchw: (B, Cin, H, W) f32  ->  (B, Cout, 1, 1) f32
    """
    x = jnp.transpose(x_nchw, (0, 2, 3, 1))          # NHWC
    B, H, W, Cin = x.shape

    # Stem: conv3x3 + folded BN + ReLU.
    # TODO(synk): the stem im2col stays in XLA (9*Cin = 27 columns, a few KB);
    # the wide 128-channel convs below do their im2col inside the kernel.
    w0, b0 = params["stem"]
    Kp = w0.shape[0]
    patches = extract_patches(x).reshape(B, H * W, 9 * Cin)
    patches = jnp.pad(patches, ((0, 0), (0, 0), (0, Kp - 9 * Cin)))
    y = stem_conv_bn_relu(patches.astype(jnp.bfloat16), w0, b0, H=H, W=W)

    # BasicBlock: conv-BN-ReLU, conv-BN, identity skip, ReLU, then GAP.
    w1, b1 = params["block_conv1"]
    y_pad = jnp.pad(y, ((0, 0), (1, 1), (1, 1), (0, 0)))
    z = conv3x3_bn_act(y_pad, w1, b1, relu=True)

    w2, b2 = params["block_conv2"]
    z_pad = jnp.pad(z, ((0, 0), (1, 1), (1, 1), (0, 0)))
    pooled = conv3x3_bn_residual_gap(z_pad, y, w2, b2)   # (B, 1, C)

    C = pooled.shape[-1]
    return pooled.reshape(B, C, 1, 1)                    # AdaptiveAvgPool2d((1,1))

    # TODO(synk): the dropped `model.children()[-1]` (classifier head) is
    # intentionally not implemented — Net strips it by construction.


if __name__ == "__main__":
    key = jax.random.PRNGKey(0)
    pkey, xkey = jax.random.split(key)

    B, CIN, H, W, WIDTH = 2, 3, 16, 16, 128
    params = init_params(pkey, cin=CIN, width=WIDTH)
    x = jax.random.normal(xkey, (B, CIN, H, W), jnp.float32)

    fwd = jax.jit(net_forward)
    feats = fwd(x, params)
    jax.block_until_ready(feats)
    assert feats.shape == (B, WIDTH, 1, 1), feats.shape
    assert bool(jnp.all(jnp.isfinite(feats)))
    print("KERNEL_OK")
</pallas_src>

<mosaic_0001>
module attributes {stable_mosaic.version = 11 : i64} {
  func.func @_conv3x3_kernel(%arg0: i32, %arg1: memref<1x18x18x128xf32, #tpu.memory_space<vmem>>, %arg2: memref<1152x128xbf16, #tpu.memory_space<vmem>>, %arg3: memref<1x128xf32, #tpu.memory_space<vmem>>, %arg4: memref<1x16x16x128xf32, #tpu.memory_space<vmem>>) attributes {dimension_semantics = [#tpu.dimension_semantics<parallel>], iteration_bounds = array<i64: 2>, scalar_prefetch = 0 : i64, scratch_operands = 0 : i64, tpu.core_type = #tpu.core_type<tc>, window_params = [{transform_indices = @transform_0, window_bounds = array<i64: 1, 18, 18, 128>}, {pipeline_mode = #tpu.pipeline_mode<synchronous>, transform_indices = @transform_1, window_bounds = array<i64: 1152, 128>}, {pipeline_mode = #tpu.pipeline_mode<synchronous>, transform_indices = @transform_2, window_bounds = array<i64: 1, 128>}, {transform_indices = @transform_3, window_bounds = array<i64: 1, 16, 16, 128>}]} {
    %cst = arith.constant 0.000000e+00 : f32
    %0 = vector.broadcast %cst : f32 to vector<256x128xf32>
    %c0 = arith.constant 0 : index
    %c0_0 = arith.constant 0 : index
    %c0_1 = arith.constant 0 : index
    %c0_2 = arith.constant 0 : index
    %1 = vector.load %arg1[%c0, %c0_0, %c0_1, %c0_2] : memref<1x18x18x128xf32, #tpu.memory_space<vmem>>, vector<1x16x16x128xf32>
    %2 = vector.shape_cast %1 : vector<1x16x16x128xf32> to vector<16x16x128xf32>
    %3 = vector.shape_cast %2 : vector<16x16x128xf32> to vector<256x128xf32>
    %4 = arith.truncf %3 : vector<256x128xf32> to vector<256x128xbf16>
    %c0_3 = arith.constant 0 : index
    %c0_4 = arith.constant 0 : index
    %5 = vector.load %arg2[%c0_3, %c0_4] : memref<1152x128xbf16, #tpu.memory_space<vmem>>, vector<128x128xbf16>
    %cst_5 = arith.constant dense<0.000000e+00> : vector<256x128xf32>
    %6 = tpu.matmul %4, %5, %cst_5 {dimension_numbers = #tpu.dot_dimension_numbers<[1], [0], [0], [1], [0, 0, 1, 1], [], []>} : vector<256x128xbf16>, vector<128x128xbf16>, vector<256x128xf32> -> vector<256x128xf32>
    %7 = arith.addf %0, %6 : vector<256x128xf32>
    %c0_6 = arith.constant 0 : index
    %c0_7 = arith.constant 0 : index
    %c1 = arith.constant 1 : index
    %c0_8 = arith.constant 0 : index
    %8 = vector.load %arg1[%c0_6, %c0_7, %c1, %c0_8] : memref<1x18x18x128xf32, #tpu.memory_space<vmem>>, vector<1x16x16x128xf32>
    %9 = vector.shape_cast %8 : vector<1x16x16x128xf32> to vector<16x16x128xf32>
    %10 = vector.shape_cast %9 : vector<16x16x128xf32> to vector<256x128xf32>
    %11 = arith.truncf %10 : vector<256x128xf32> to vector<256x128xbf16>
    %c128 = arith.constant 128 : index
    %c0_9 = arith.constant 0 : index
    %12 = vector.load %arg2[%c128, %c0_9] : memref<1152x128xbf16, #tpu.memory_space<vmem>>, vector<128x128xbf16>
    %cst_10 = arith.constant dense<0.000000e+00> : vector<256x128xf32>
    %13 = tpu.matmul %11, %12, %cst_10 {dimension_numbers = #tpu.dot_dimension_numbers<[1], [0], [0], [1], [0, 0, 1, 1], [], []>} : vector<256x128xbf16>, vector<128x128xbf16>, vector<256x128xf32> -> vector<256x128xf32>
    %14 = arith.addf %7, %13 : vector<256x128xf32>
    %c0_11 = arith.constant 0 : index
    %c0_12 = arith.constant 0 : index
    %c2 = arith.constant 2 : index
    %c0_13 = arith.constant 0 : index
    %15 = vector.load %arg1[%c0_11, %c0_12, %c2, %c0_13] : memref<1x18x18x128xf32, #tpu.memory_space<vmem>>, vector<1x16x16x128xf32>
    %16 = vector.shape_cast %15 : vector<1x16x16x128xf32> to vector<16x16x128xf32>
    %17 = vector.shape_cast %16 : vector<16x16x128xf32> to vector<256x128xf32>
    %18 = arith.truncf %17 : vector<256x128xf32> to vector<256x128xbf16>
    %c256 = arith.constant 256 : index
    %c0_14 = arith.constant 0 : index
    %19 = vector.load %arg2[%c256, %c0_14] : memref<1152x128xbf16, #tpu.memory_space<vmem>>, vector<128x128xbf16>
    %cst_15 = arith.constant dense<0.000000e+00> : vector<256x128xf32>
    %20 = tpu.matmul %18, %19, %cst_15 {dimension_numbers = #tpu.dot_dimension_numbers<[1], [0], [0], [1], [0, 0, 1, 1], [], []>} : vector<256x128xbf16>, vector<128x128xbf16>, vector<256x128xf32> -> vector<256x128xf32>
    %21 = arith.addf %14, %20 : vector<256x128xf32>
    %c0_16 = arith.constant 0 : index
    %c1_17 = arith.constant 1 : index
    %c0_18 = arith.constant 0 : index
    %c0_19 = arith.constant 0 : index
    %22 = vector.load %arg1[%c0_16, %c1_17, %c0_18, %c0_19] : memref<1x18x18x128xf32, #tpu.memory_space<vmem>>, vector<1x16x16x128xf32>
    %23 = vector.shape_cast %22 : vector<1x16x16x128xf32> to vector<16x16x128xf32>
    %24 = vector.shape_cast %23 : vector<16x16x128xf32> to vector<256x128xf32>
    %25 = arith.truncf %24 : vector<256x128xf32> to vector<256x128xbf16>
    %c384 = arith.constant 384 : index
    %c0_20 = arith.constant 0 : index
    %26 = vector.load %arg2[%c384, %c0_20] : memref<1152x128xbf16, #tpu.memory_space<vmem>>, vector<128x128xbf16>
    %cst_21 = arith.constant dense<0.000000e+00> : vector<256x128xf32>
    %27 = tpu.matmul %25, %26, %cst_21 {dimension_numbers = #tpu.dot_dimension_numbers<[1], [0], [0], [1], [0, 0, 1, 1], [], []>} : vector<256x128xbf16>, vector<128x128xbf16>, vector<256x128xf32> -> vector<256x128xf32>
    %28 = arith.addf %21, %27 : vector<256x128xf32>
    %c0_22 = arith.constant 0 : index
    %c1_23 = arith.constant 1 : index
    %c1_24 = arith.constant 1 : index
    %c0_25 = arith.constant 0 : index
    %29 = vector.load %arg1[%c0_22, %c1_23, %c1_24, %c0_25] : memref<1x18x18x128xf32, #tpu.memory_space<vmem>>, vector<1x16x16x128xf32>
    %30 = vector.shape_cast %29 : vector<1x16x16x128xf32> to vector<16x16x128xf32>
    %31 = vector.shape_cast %30 : vector<16x16x128xf32> to vector<256x128xf32>
    %32 = arith.truncf %31 : vector<256x128xf32> to vector<256x128xbf16>
    %c512 = arith.constant 512 : index
    %c0_26 = arith.constant 0 : index
    %33 = vector.load %arg2[%c512, %c0_26] : memref<1152x128xbf16, #tpu.memory_space<vmem>>, vector<128x128xbf16>
    %cst_27 = arith.constant dense<0.000000e+00> : vector<256x128xf32>
    %34 = tpu.matmul %32, %33, %cst_27 {dimension_numbers = #tpu.dot_dimension_numbers<[1], [0], [0], [1], [0, 0, 1, 1], [], []>} : vector<256x128xbf16>, vector<128x128xbf16>, vector<256x128xf32> -> vector<256x128xf32>
    %35 = arith.addf %28, %34 : vector<256x128xf32>
    %c0_28 = arith.constant 0 : index
    %c1_29 = arith.constant 1 : index
    %c2_30 = arith.constant 2 : index
    %c0_31 = arith.constant 0 : index
    %36 = vector.load %arg1[%c0_28, %c1_29, %c2_30, %c0_31] : memref<1x18x18x128xf32, #tpu.memory_space<vmem>>, vector<1x16x16x128xf32>
    %37 = vector.shape_cast %36 : vector<1x16x16x128xf32> to vector<16x16x128xf32>
    %38 = vector.shape_cast %37 : vector<16x16x128xf32> to vector<256x128xf32>
    %39 = arith.truncf %38 : vector<256x128xf32> to vector<256x128xbf16>
    %c640 = arith.constant 640 : index
    %c0_32 = arith.constant 0 : index
    %40 = vector.load %arg2[%c640, %c0_32] : memref<1152x128xbf16, #tpu.memory_space<vmem>>, vector<128x128xbf16>
    %cst_33 = arith.constant dense<0.000000e+00> : vector<256x128xf32>
    %41 = tpu.matmul %39, %40, %cst_33 {dimension_numbers = #tpu.dot_dimension_numbers<[1], [0], [0], [1], [0, 0, 1, 1], [], []>} : vector<256x128xbf16>, vector<128x128xbf16>, vector<256x128xf32> -> vector<256x128xf32>
    %42 = arith.addf %35, %41 : vector<256x128xf32>
    %c0_34 = arith.constant 0 : index
    %c2_35 = arith.constant 2 : index
    %c0_36 = arith.constant 0 : index
    %c0_37 = arith.constant 0 : index
    %43 = vector.load %arg1[%c0_34, %c2_35, %c0_36, %c0_37] : memref<1x18x18x128xf32, #tpu.memory_space<vmem>>, vector<1x16x16x128xf32>
    %44 = vector.shape_cast %43 : vector<1x16x16x128xf32> to vector<16x16x128xf32>
    %45 = vector.shape_cast %44 : vector<16x16x128xf32> to vector<256x128xf32>
    %46 = arith.truncf %45 : vector<256x128xf32> to vector<256x128xbf16>
    %c768 = arith.constant 768 : index
    %c0_38 = arith.constant 0 : index
    %47 = vector.load %arg2[%c768, %c0_38] : memref<1152x128xbf16, #tpu.memory_space<vmem>>, vector<128x128xbf16>
    %cst_39 = arith.constant dense<0.000000e+00> : vector<256x128xf32>
    %48 = tpu.matmul %46, %47, %cst_39 {dimension_numbers = #tpu.dot_dimension_numbers<[1], [0], [0], [1], [0, 0, 1, 1], [], []>} : vector<256x128xbf16>, vector<128x128xbf16>, vector<256x128xf32> -> vector<256x128xf32>
    %49 = arith.addf %42, %48 : vector<256x128xf32>
    %c0_40 = arith.constant 0 : index
    %c2_41 = arith.constant 2 : index
    %c1_42 = arith.constant 1 : index
    %c0_43 = arith.constant 0 : index
    %50 = vector.load %arg1[%c0_40, %c2_41, %c1_42, %c0_43] : memref<1x18x18x128xf32, #tpu.memory_space<vmem>>, vector<1x16x16x128xf32>
    %51 = vector.shape_cast %50 : vector<1x16x16x128xf32> to vector<16x16x128xf32>
    %52 = vector.shape_cast %51 : vector<16x16x128xf32> to vector<256x128xf32>
    %53 = arith.truncf %52 : vector<256x128xf32> to vector<256x128xbf16>
    %c896 = arith.constant 896 : index
    %c0_44 = arith.constant 0 : index
    %54 = vector.load %arg2[%c896, %c0_44] : memref<1152x128xbf16, #tpu.memory_space<vmem>>, vector<128x128xbf16>
    %cst_45 = arith.constant dense<0.000000e+00> : vector<256x128xf32>
    %55 = tpu.matmul %53, %54, %cst_45 {dimension_numbers = #tpu.dot_dimension_numbers<[1], [0], [0], [1], [0, 0, 1, 1], [], []>} : vector<256x128xbf16>, vector<128x128xbf16>, vector<256x128xf32> -> vector<256x128xf32>
    %56 = arith.addf %49, %55 : vector<256x128xf32>
    %c0_46 = arith.constant 0 : index
    %c2_47 = arith.constant 2 : index
    %c2_48 = arith.constant 2 : index
    %c0_49 = arith.constant 0 : index
    %57 = vector.load %arg1[%c0_46, %c2_47, %c2_48, %c0_49] : memref<1x18x18x128xf32, #tpu.memory_space<vmem>>, vector<1x16x16x128xf32>
    %58 = vector.shape_cast %57 : vector<1x16x16x128xf32> to vector<16x16x128xf32>
    %59 = vector.shape_cast %58 : vector<16x16x128xf32> to vector<256x128xf32>
    %60 = arith.truncf %59 : vector<256x128xf32> to vector<256x128xbf16>
    %c1024 = arith.constant 1024 : index
    %c0_50 = arith.constant 0 : index
    %61 = vector.load %arg2[%c1024, %c0_50] : memref<1152x128xbf16, #tpu.memory_space<vmem>>, vector<128x128xbf16>
    %cst_51 = arith.constant dense<0.000000e+00> : vector<256x128xf32>
    %62 = tpu.matmul %60, %61, %cst_51 {dimension_numbers = #tpu.dot_dimension_numbers<[1], [0], [0], [1], [0, 0, 1, 1], [], []>} : vector<256x128xbf16>, vector<128x128xbf16>, vector<256x128xf32> -> vector<256x128xf32>
    %63 = arith.addf %56, %62 : vector<256x128xf32>
    %c0_52 = arith.constant 0 : index
    %c0_53 = arith.constant 0 : index
    %64 = vector.load %arg3[%c0_52, %c0_53] : memref<1x128xf32, #tpu.memory_space<vmem>>, vector<1x128xf32>
    %65 = vector.broadcast %64 : vector<1x128xf32> to vector<256x128xf32>
    %66 = arith.addf %63, %65 : vector<256x128xf32>
    %cst_54 = arith.constant 0.000000e+00 : f32
    %67 = vector.broadcast %cst_54 : f32 to vector<256x128xf32>
    %68 = arith.maximumf %66, %67 : vector<256x128xf32>
    %69 = vector.shape_cast %68 : vector<256x128xf32> to vector<16x16x128xf32>
    %c0_55 = arith.constant 0 : index
    %c0_56 = arith.constant 0 : index
    %c0_57 = arith.constant 0 : index
    %c0_58 = arith.constant 0 : index
    %70 = vector.load %arg4[%c0_55, %c0_56, %c0_57, %c0_58] : memref<1x16x16x128xf32, #tpu.memory_space<vmem>>, vector<1x16x16x128xf32>
    %71 = vector.shape_cast %70 : vector<1x16x16x128xf32> to vector<16x16x128xf32>
    %72 = vector.shape_cast %69 : vector<16x16x128xf32> to vector<1x16x16x128xf32>
    tpu.vector_store %arg4[%c0_55, %c0_56, %c0_57, %c0_58], %72 {strides = array<i32>} : memref<1x16x16x128xf32, #tpu.memory_space<vmem>>, vector<1x16x16x128xf32>,
    return
  }
  func.func @transform_0(%arg0: i32) -> (i32, i32, i32, i32) {
    %c0_i32 = arith.constant 0 : i32
    %c0_i32_0 = arith.constant 0 : i32
    %c0_i32_1 = arith.constant 0 : i32
    %c0_i32_2 = arith.constant 0 : i32
    return %arg0, %c0_i32, %c0_i32_0, %c0_i32_1 : i32, i32, i32, i32
  }
  func.func @transform_1(%arg0: i32) -> (i32, i32) {
    %c0_i32 = arith.constant 0 : i32
    %c0_i32_0 = arith.constant 0 : i32
    %c0_i32_1 = arith.constant 0 : i32
    return %c0_i32, %c0_i32_0 : i32, i32
  }
  func.func @transform_2(%arg0: i32) -> (i32, i32) {
    %c0_i32 = arith.constant 0 : i32
    %c0_i32_0 = arith.constant 0 : i32
    %c0_i32_1 = arith.constant 0 : i32
    return %c0_i32, %c0_i32_0 : i32, i32
  }
  func.func @transform_3(%arg0: i32) -> (i32, i32, i32, i32) {
    %c0_i32 = arith.constant 0 : i32
    %c0_i32_0 = arith.constant 0 : i32
    %c0_i32_1 = arith.constant 0 : i32
    %c0_i32_2 = arith.constant 0 : i32
    return %arg0, %c0_i32, %c0_i32_0, %c0_i32_1 : i32, i32, i32, i32
  }
}

module attributes {stable_mosaic.version = 11 : i64} {
  func.func @_stem_kernel(%arg0: i32, %arg1: memref<1x256x32xbf16, #tpu.memory_space<vmem>>, %arg2: memref<32x128xbf16, #tpu.memory_space<vmem>>, %arg3: memref<1x128xf32, #tpu.memory_space<vmem>>, %arg4: memref<1x16x16x128xf32, #tpu.memory_space<vmem>>) attributes {dimension_semantics = [#tpu.dimension_semantics<parallel>], iteration_bounds = array<i64: 2>, scalar_prefetch = 0 : i64, scratch_operands = 0 : i64, tpu.core_type = #tpu.core_type<tc>, window_params = [{transform_indices = @transform_0, window_bounds = array<i64: 1, 256, 32>}, {pipeline_mode = #tpu.pipeline_mode<synchronous>, transform_indices = @transform_1, window_bounds = array<i64: 32, 128>}, {pipeline_mode = #tpu.pipeline_mode<synchronous>, transform_indices = @transform_2, window_bounds = array<i64: 1, 128>}, {transform_indices = @transform_3, window_bounds = array<i64: 1, 16, 16, 128>}]} {
    %c0 = arith.constant 0 : index
    %c0_0 = arith.constant 0 : index
    %c0_1 = arith.constant 0 : index
    %0 = vector.load %arg1[%c0, %c0_0, %c0_1] : memref<1x256x32xbf16, #tpu.memory_space<vmem>>, vector<1x256x32xbf16>
    %1 = vector.shape_cast %0 : vector<1x256x32xbf16> to vector<256x32xbf16>
    %c0_2 = arith.constant 0 : index
    %c0_3 = arith.constant 0 : index
    %2 = vector.load %arg2[%c0_2, %c0_3] : memref<32x128xbf16, #tpu.memory_space<vmem>>, vector<32x128xbf16>
    %cst = arith.constant dense<0.000000e+00> : vector<256x128xf32>
    %3 = tpu.matmul %1, %2, %cst {dimension_numbers = #tpu.dot_dimension_numbers<[1], [0], [0], [1], [0, 0, 1, 1], [], []>} : vector<256x32xbf16>, vector<32x128xbf16>, vector<256x128xf32> -> vector<256x128xf32>
    %c0_4 = arith.constant 0 : index
    %c0_5 = arith.constant 0 : index
    %4 = vector.load %arg3[%c0_4, %c0_5] : memref<1x128xf32, #tpu.memory_space<vmem>>, vector<1x128xf32>
    %5 = vector.broadcast %4 : vector<1x128xf32> to vector<256x128xf32>
    %6 = arith.addf %3, %5 : vector<256x128xf32>
    %cst_6 = arith.constant 0.000000e+00 : f32
    %7 = vector.broadcast %cst_6 : f32 to vector<256x128xf32>
    %8 = arith.maximumf %6, %7 : vector<256x128xf32>
    %9 = vector.shape_cast %8 : vector<256x128xf32> to vector<16x16x128xf32>
    %c0_7 = arith.constant 0 : index
    %c0_8 = arith.constant 0 : index
    %c0_9 = arith.constant 0 : index
    %c0_10 = arith.constant 0 : index
    %10 = vector.load %arg4[%c0_7, %c0_8, %c0_9, %c0_10] : memref<1x16x16x128xf32, #tpu.memory_space<vmem>>, vector<1x16x16x128xf32>
    %11 = vector.shape_cast %10 : vector<1x16x16x128xf32> to vector<16x16x128xf32>
    %12 = vector.shape_cast %9 : vector<16x16x128xf32> to vector<1x16x16x128xf32>
    tpu.vector_store %arg4[%c0_7, %c0_8, %c0_9, %c0_10], %12 {strides = array<i32>} : memref<1x16x16x128xf32, #tpu.memory_space<vmem>>, vector<1x16x16x128xf32>,
    return
  }
  func.func @transform_0(%arg0: i32) -> (i32, i32, i32) {
    %c0_i32 = arith.constant 0 : i32
    %c0_i32_0 = arith.constant 0 : i32
    %c0_i32_1 = arith.constant 0 : i32
    return %arg0, %c0_i32, %c0_i32_0 : i32, i32, i32
  }
  func.func @transform_1(%arg0: i32) -> (i32, i32) {
    %c0_i32 = arith.constant 0 : i32
    %c0_i32_0 = arith.constant 0 : i32
    %c0_i32_1 = arith.constant 0 : i32
    return %c0_i32, %c0_i32_0 : i32, i32
  }
  func.func @transform_2(%arg0: i32) -> (i32, i32) {
    %c0_i32 = arith.constant 0 : i32
    %c0_i32_0 = arith.constant 0 : i32
    %c0_i32_1 = arith.constant 0 : i32
    return %c0_i32, %c0_i32_0 : i32, i32
  }
  func.func @transform_3(%arg0: i32) -> (i32, i32, i32, i32) {
    %c0_i32 = arith.constant 0 : i32
    %c0_i32_0 = arith.constant 0 : i32
    %c0_i32_1 = arith.constant 0 : i32
    %c0_i32_2 = arith.constant 0 : i32
    return %arg0, %c0_i32, %c0_i32_0, %c0_i32_1 : i32, i32, i32, i32
  }
}

module attributes {stable_mosaic.version = 11 : i64} {
  func.func @_conv3x3_residual_gap_kernel(%arg0: i32, %arg1: memref<1x18x18x128xf32, #tpu.memory_space<vmem>>, %arg2: memref<1x16x16x128xf32, #tpu.memory_space<vmem>>, %arg3: memref<1152x128xbf16, #tpu.memory_space<vmem>>, %arg4: memref<1x128xf32, #tpu.memory_space<vmem>>, %arg5: memref<1x1x128xf32, #tpu.memory_space<vmem>>) attributes {dimension_semantics = [#tpu.dimension_semantics<parallel>], iteration_bounds = array<i64: 2>, scalar_prefetch = 0 : i64, scratch_operands = 0 : i64, tpu.core_type = #tpu.core_type<tc>, window_params = [{transform_indices = @transform_0, window_bounds = array<i64: 1, 18, 18, 128>}, {transform_indices = @transform_1, window_bounds = array<i64: 1, 16, 16, 128>}, {pipeline_mode = #tpu.pipeline_mode<synchronous>, transform_indices = @transform_2, window_bounds = array<i64: 1152, 128>}, {pipeline_mode = #tpu.pipeline_mode<synchronous>, transform_indices = @transform_3, window_bounds = array<i64: 1, 128>}, {transform_indices = @transform_4, window_bounds = array<i64: 1, 1, 128>}]} {
    %cst = arith.constant 0.000000e+00 : f32
    %0 = vector.broadcast %cst : f32 to vector<256x128xf32>
    %c0 = arith.constant 0 : index
    %c0_0 = arith.constant 0 : index
    %c0_1 = arith.constant 0 : index
    %c0_2 = arith.constant 0 : index
    %1 = vector.load %arg1[%c0, %c0_0, %c0_1, %c0_2] : memref<1x18x18x128xf32, #tpu.memory_space<vmem>>, vector<1x16x16x128xf32>
    %2 = vector.shape_cast %1 : vector<1x16x16x128xf32> to vector<16x16x128xf32>
    %3 = vector.shape_cast %2 : vector<16x16x128xf32> to vector<256x128xf32>
    %4 = arith.truncf %3 : vector<256x128xf32> to vector<256x128xbf16>
    %c0_3 = arith.constant 0 : index
    %c0_4 = arith.constant 0 : index
    %5 = vector.load %arg3[%c0_3, %c0_4] : memref<1152x128xbf16, #tpu.memory_space<vmem>>, vector<128x128xbf16>
    %cst_5 = arith.constant dense<0.000000e+00> : vector<256x128xf32>
    %6 = tpu.matmul %4, %5, %cst_5 {dimension_numbers = #tpu.dot_dimension_numbers<[1], [0], [0], [1], [0, 0, 1, 1], [], []>} : vector<256x128xbf16>, vector<128x128xbf16>, vector<256x128xf32> -> vector<256x128xf32>
    %7 = arith.addf %0, %6 : vector<256x128xf32>
    %c0_6 = arith.constant 0 : index
    %c0_7 = arith.constant 0 : index
    %c1 = arith.constant 1 : index
    %c0_8 = arith.constant 0 : index
    %8 = vector.load %arg1[%c0_6, %c0_7, %c1, %c0_8] : memref<1x18x18x128xf32, #tpu.memory_space<vmem>>, vector<1x16x16x128xf32>
    %9 = vector.shape_cast %8 : vector<1x16x16x128xf32> to vector<16x16x128xf32>
    %10 = vector.shape_cast %9 : vector<16x16x128xf32> to vector<256x128xf32>
    %11 = arith.truncf %10 : vector<256x128xf32> to vector<256x128xbf16>
    %c128 = arith.constant 128 : index
    %c0_9 = arith.constant 0 : index
    %12 = vector.load %arg3[%c128, %c0_9] : memref<1152x128xbf16, #tpu.memory_space<vmem>>, vector<128x128xbf16>
    %cst_10 = arith.constant dense<0.000000e+00> : vector<256x128xf32>
    %13 = tpu.matmul %11, %12, %cst_10 {dimension_numbers = #tpu.dot_dimension_numbers<[1], [0], [0], [1], [0, 0, 1, 1], [], []>} : vector<256x128xbf16>, vector<128x128xbf16>, vector<256x128xf32> -> vector<256x128xf32>
    %14 = arith.addf %7, %13 : vector<256x128xf32>
    %c0_11 = arith.constant 0 : index
    %c0_12 = arith.constant 0 : index
    %c2 = arith.constant 2 : index
    %c0_13 = arith.constant 0 : index
    %15 = vector.load %arg1[%c0_11, %c0_12, %c2, %c0_13] : memref<1x18x18x128xf32, #tpu.memory_space<vmem>>, vector<1x16x16x128xf32>
    %16 = vector.shape_cast %15 : vector<1x16x16x128xf32> to vector<16x16x128xf32>
    %17 = vector.shape_cast %16 : vector<16x16x128xf32> to vector<256x128xf32>
    %18 = arith.truncf %17 : vector<256x128xf32> to vector<256x128xbf16>
    %c256 = arith.constant 256 : index
    %c0_14 = arith.constant 0 : index
    %19 = vector.load %arg3[%c256, %c0_14] : memref<1152x128xbf16, #tpu.memory_space<vmem>>, vector<128x128xbf16>
    %cst_15 = arith.constant dense<0.000000e+00> : vector<256x128xf32>
    %20 = tpu.matmul %18, %19, %cst_15 {dimension_numbers = #tpu.dot_dimension_numbers<[1], [0], [0], [1], [0, 0, 1, 1], [], []>} : vector<256x128xbf16>, vector<128x128xbf16>, vector<256x128xf32> -> vector<256x128xf32>
    %21 = arith.addf %14, %20 : vector<256x128xf32>
    %c0_16 = arith.constant 0 : index
    %c1_17 = arith.constant 1 : index
    %c0_18 = arith.constant 0 : index
    %c0_19 = arith.constant 0 : index
    %22 = vector.load %arg1[%c0_16, %c1_17, %c0_18, %c0_19] : memref<1x18x18x128xf32, #tpu.memory_space<vmem>>, vector<1x16x16x128xf32>
    %23 = vector.shape_cast %22 : vector<1x16x16x128xf32> to vector<16x16x128xf32>
    %24 = vector.shape_cast %23 : vector<16x16x128xf32> to vector<256x128xf32>
    %25 = arith.truncf %24 : vector<256x128xf32> to vector<256x128xbf16>
    %c384 = arith.constant 384 : index
    %c0_20 = arith.constant 0 : index
    %26 = vector.load %arg3[%c384, %c0_20] : memref<1152x128xbf16, #tpu.memory_space<vmem>>, vector<128x128xbf16>
    %cst_21 = arith.constant dense<0.000000e+00> : vector<256x128xf32>
    %27 = tpu.matmul %25, %26, %cst_21 {dimension_numbers = #tpu.dot_dimension_numbers<[1], [0], [0], [1], [0, 0, 1, 1], [], []>} : vector<256x128xbf16>, vector<128x128xbf16>, vector<256x128xf32> -> vector<256x128xf32>
    %28 = arith.addf %21, %27 : vector<256x128xf32>
    %c0_22 = arith.constant 0 : index
    %c1_23 = arith.constant 1 : index
    %c1_24 = arith.constant 1 : index
    %c0_25 = arith.constant 0 : index
    %29 = vector.load %arg1[%c0_22, %c1_23, %c1_24, %c0_25] : memref<1x18x18x128xf32, #tpu.memory_space<vmem>>, vector<1x16x16x128xf32>
    %30 = vector.shape_cast %29 : vector<1x16x16x128xf32> to vector<16x16x128xf32>
    %31 = vector.shape_cast %30 : vector<16x16x128xf32> to vector<256x128xf32>
    %32 = arith.truncf %31 : vector<256x128xf32> to vector<256x128xbf16>
    %c512 = arith.constant 512 : index
    %c0_26 = arith.constant 0 : index
    %33 = vector.load %arg3[%c512, %c0_26] : memref<1152x128xbf16, #tpu.memory_space<vmem>>, vector<128x128xbf16>
    %cst_27 = arith.constant dense<0.000000e+00> : vector<256x128xf32>
    %34 = tpu.matmul %32, %33, %cst_27 {dimension_numbers = #tpu.dot_dimension_numbers<[1], [0], [0], [1], [0, 0, 1, 1], [], []>} : vector<256x128xbf16>, vector<128x128xbf16>, vector<256x128xf32> -> vector<256x128xf32>
    %35 = arith.addf %28, %34 : vector<256x128xf32>
    %c0_28 = arith.constant 0 : index
    %c1_29 = arith.constant 1 : index
    %c2_30 = arith.constant 2 : index
    %c0_31 = arith.constant 0 : index
    %36 = vector.load %arg1[%c0_28, %c1_29, %c2_30, %c0_31] : memref<1x18x18x128xf32, #tpu.memory_space<vmem>>, vector<1x16x16x128xf32>
    %37 = vector.shape_cast %36 : vector<1x16x16x128xf32> to vector<16x16x128xf32>
    %38 = vector.shape_cast %37 : vector<16x16x128xf32> to vector<256x128xf32>
    %39 = arith.truncf %38 : vector<256x128xf32> to vector<256x128xbf16>
    %c640 = arith.constant 640 : index
    %c0_32 = arith.constant 0 : index
    %40 = vector.load %arg3[%c640, %c0_32] : memref<1152x128xbf16, #tpu.memory_space<vmem>>, vector<128x128xbf16>
    %cst_33 = arith.constant dense<0.000000e+00> : vector<256x128xf32>
    %41 = tpu.matmul %39, %40, %cst_33 {dimension_numbers = #tpu.dot_dimension_numbers<[1], [0], [0], [1], [0, 0, 1, 1], [], []>} : vector<256x128xbf16>, vector<128x128xbf16>, vector<256x128xf32> -> vector<256x128xf32>
    %42 = arith.addf %35, %41 : vector<256x128xf32>
    %c0_34 = arith.constant 0 : index
    %c2_35 = arith.constant 2 : index
    %c0_36 = arith.constant 0 : index
    %c0_37 = arith.constant 0 : index
    %43 = vector.load %arg1[%c0_34, %c2_35, %c0_36, %c0_37] : memref<1x18x18x128xf32, #tpu.memory_space<vmem>>, vector<1x16x16x128xf32>
    %44 = vector.shape_cast %43 : vector<1x16x16x128xf32> to vector<16x16x128xf32>
    %45 = vector.shape_cast %44 : vector<16x16x128xf32> to vector<256x128xf32>
    %46 = arith.truncf %45 : vector<256x128xf32> to vector<256x128xbf16>
    %c768 = arith.constant 768 : index
    %c0_38 = arith.constant 0 : index
    %47 = vector.load %arg3[%c768, %c0_38] : memref<1152x128xbf16, #tpu.memory_space<vmem>>, vector<128x128xbf16>
    %cst_39 = arith.constant dense<0.000000e+00> : vector<256x128xf32>
    %48 = tpu.matmul %46, %47, %cst_39 {dimension_numbers = #tpu.dot_dimension_numbers<[1], [0], [0], [1], [0, 0, 1, 1], [], []>} : vector<256x128xbf16>, vector<128x128xbf16>, vector<256x128xf32> -> vector<256x128xf32>
    %49 = arith.addf %42, %48 : vector<256x128xf32>
    %c0_40 = arith.constant 0 : index
    %c2_41 = arith.constant 2 : index
    %c1_42 = arith.constant 1 : index
    %c0_43 = arith.constant 0 : index
    %50 = vector.load %arg1[%c0_40, %c2_41, %c1_42, %c0_43] : memref<1x18x18x128xf32, #tpu.memory_space<vmem>>, vector<1x16x16x128xf32>
    %51 = vector.shape_cast %50 : vector<1x16x16x128xf32> to vector<16x16x128xf32>
    %52 = vector.shape_cast %51 : vector<16x16x128xf32> to vector<256x128xf32>
    %53 = arith.truncf %52 : vector<256x128xf32> to vector<256x128xbf16>
    %c896 = arith.constant 896 : index
    %c0_44 = arith.constant 0 : index
    %54 = vector.load %arg3[%c896, %c0_44] : memref<1152x128xbf16, #tpu.memory_space<vmem>>, vector<128x128xbf16>
    %cst_45 = arith.constant dense<0.000000e+00> : vector<256x128xf32>
    %55 = tpu.matmul %53, %54, %cst_45 {dimension_numbers = #tpu.dot_dimension_numbers<[1], [0], [0], [1], [0, 0, 1, 1], [], []>} : vector<256x128xbf16>, vector<128x128xbf16>, vector<256x128xf32> -> vector<256x128xf32>
    %56 = arith.addf %49, %55 : vector<256x128xf32>
    %c0_46 = arith.constant 0 : index
    %c2_47 = arith.constant 2 : index
    %c2_48 = arith.constant 2 : index
    %c0_49 = arith.constant 0 : index
    %57 = vector.load %arg1[%c0_46, %c2_47, %c2_48, %c0_49] : memref<1x18x18x128xf32, #tpu.memory_space<vmem>>, vector<1x16x16x128xf32>
    %58 = vector.shape_cast %57 : vector<1x16x16x128xf32> to vector<16x16x128xf32>
    %59 = vector.shape_cast %58 : vector<16x16x128xf32> to vector<256x128xf32>
    %60 = arith.truncf %59 : vector<256x128xf32> to vector<256x128xbf16>
    %c1024 = arith.constant 1024 : index
    %c0_50 = arith.constant 0 : index
    %61 = vector.load %arg3[%c1024, %c0_50] : memref<1152x128xbf16, #tpu.memory_space<vmem>>, vector<128x128xbf16>
    %cst_51 = arith.constant dense<0.000000e+00> : vector<256x128xf32>
    %62 = tpu.matmul %60, %61, %cst_51 {dimension_numbers = #tpu.dot_dimension_numbers<[1], [0], [0], [1], [0, 0, 1, 1], [], []>} : vector<256x128xbf16>, vector<128x128xbf16>, vector<256x128xf32> -> vector<256x128xf32>
    %63 = arith.addf %56, %62 : vector<256x128xf32>
    %c0_52 = arith.constant 0 : index
    %c0_53 = arith.constant 0 : index
    %c0_54 = arith.constant 0 : index
    %c0_55 = arith.constant 0 : index
    %64 = vector.load %arg2[%c0_52, %c0_53, %c0_54, %c0_55] : memref<1x16x16x128xf32, #tpu.memory_space<vmem>>, vector<1x16x16x128xf32>
    %65 = vector.shape_cast %64 : vector<1x16x16x128xf32> to vector<16x16x128xf32>
    %66 = vector.shape_cast %65 : vector<16x16x128xf32> to vector<256x128xf32>
    %c0_56 = arith.constant 0 : index
    %c0_57 = arith.constant 0 : index
    %67 = vector.load %arg4[%c0_56, %c0_57] : memref<1x128xf32, #tpu.memory_space<vmem>>, vector<1x128xf32>
    %68 = vector.broadcast %67 : vector<1x128xf32> to vector<256x128xf32>
    %69 = arith.addf %63, %68 : vector<256x128xf32>
    %70 = arith.addf %69, %66 : vector<256x128xf32>
    %cst_58 = arith.constant 0.000000e+00 : f32
    %71 = vector.broadcast %cst_58 : f32 to vector<256x128xf32>
    %72 = arith.maximumf %70, %71 : vector<256x128xf32>
    %cst_59 = arith.constant dense<0.000000e+00> : vector<128xf32>
    %73 = vector.multi_reduction <add>, %72, %cst_59 [0] : vector<256x128xf32> to vector<128xf32>
    %74 = vector.shape_cast %73 : vector<128xf32> to vector<1x128xf32>
    %cst_60 = arith.constant 2.560000e+02 : f32
    %75 = vector.broadcast %cst_60 : f32 to vector<1x128xf32>
    %76 = arith.divf %74, %75 : vector<1x128xf32>
    %c0_61 = arith.constant 0 : index
    %c0_62 = arith.constant 0 : index
    %c0_63 = arith.constant 0 : index
    %77 = vector.load %arg5[%c0_61, %c0_62, %c0_63] : memref<1x1x128xf32, #tpu.memory_space<vmem>>, vector<1x1x128xf32>
    %78 = vector.shape_cast %77 : vector<1x1x128xf32> to vector<1x128xf32>
    %79 = vector.shape_cast %76 : vector<1x128xf32> to vector<1x1x128xf32>
    tpu.vector_store %arg5[%c0_61, %c0_62, %c0_63], %79 {strides = array<i32>} : memref<1x1x128xf32, #tpu.memory_space<vmem>>, vector<1x1x128xf32>,
    return
  }
  func.func @transform_0(%arg0: i32) -> (i32, i32, i32, i32) {
    %c0_i32 = arith.constant 0 : i32
    %c0_i32_0 = arith.constant 0 : i32
    %c0_i32_1 = arith.constant 0 : i32
    %c0_i32_2 = arith.constant 0 : i32
    return %arg0, %c0_i32, %c0_i32_0, %c0_i32_1 : i32, i32, i32, i32
  }
  func.func @transform_1(%arg0: i32) -> (i32, i32, i32, i32) {
    %c0_i32 = arith.constant 0 : i32
    %c0_i32_0 = arith.constant 0 : i32
    %c0_i32_1 = arith.constant 0 : i32
    %c0_i32_2 = arith.constant 0 : i32
    return %arg0, %c0_i32, %c0_i32_0, %c0_i32_1 : i32, i32, i32, i32
  }
  func.func @transform_2(%arg0: i32) -> (i32, i32) {
    %c0_i32 = arith.constant 0 : i32
    %c0_i32_0 = arith.constant 0 : i32
    %c0_i32_1 = arith.constant 0 : i32
    return %c0_i32, %c0_i32_0 : i32, i32
  }
  func.func @transform_3(%arg0: i32) -> (i32, i32) {
    %c0_i32 = arith.constant 0 : i32
    %c0_i32_0 = arith.constant 0 : i32
    %c0_i32_1 = arith.constant 0 : i32
    return %c0_i32, %c0_i32_0 : i32, i32
  }
  func.func @transform_4(%arg0: i32) -> (i32, i32, i32) {
    %c0_i32 = arith.constant 0 : i32
    %c0_i32_0 = arith.constant 0 : i32
    %c0_i32_1 = arith.constant 0 : i32
    return %arg0, %c0_i32, %c0_i32_0 : i32, i32, i32
  }
}

</mosaic_0001>

<bundles_post_ra>
// kernel: net_forward.3
= control target key start
LH: loop header
LB: loop body
LE: loop exit
PB: predicated region body
PF: predicated region fallthrough
CT: control target
= control target key end

     0   :  { %s796_s12 = smov 0   ;;  %s928_s0 = inlined_call_operand.vmem [shape: bf16[2,256,32], index: 0, kind: input, shape index: {}]   ;;  %s929_s1 = inlined_call_operand.vmem [shape: bf16[32,128], index: 1, kind: input, shape index: {}]   ;;  %s930_s2 = inlined_call_operand.vmem [shape: f32[1,128], index: 2, kind: input, shape index: {}]   ;;  %s931_s3 = inlined_call_operand.vmem [shape: f32[2,16,16,128], index: 3, kind: output, shape index: {}]  }
   0x1 LB: > { %s636_s13 = sadd.s32 4294967295, %s774_s12   ;;  %p640_p0 = scmp.ge.s32.totalorder %s774_s12, 1  ;;  %s774_s12 = sphi %s796_s12, %s13_s12  }
   0x2   : > { %p137_p1 = scmp.lt.s32.totalorder %s774_s12, 3 }
   0x4   : > { %p138_p2 = pnand %p640_p0, %p137_p1 }
   0x5   : > { %v750_v0 = vld [vmem:[%s929_s1] sm:$0xff] (!%p138_p2)   ;;  %p161_p3 = scmp.lt.s32.totalorder (!%p138_p2), %s636_s13, 1  ;;  %v751_v1 = vld [vmem:[%s929_s1 + $0x8] sm:$0xff] (!%p138_p2)   ;;  %vm307_vm0 = vcmask (!%p138_p2), 261120  }
   0x6   : > { %141 = sbr.rel (%p138_p2) target bundleno = 263 (0x107), region = 32  ;;  %702 = vmatprep.subr.bf16.mxu0 (!%p138_p2), %v750_v0  ;;  %738 = vmatprep.subr.bf16.mxu1 (!%p138_p2), %v750_v0  ;;  %v853_v18 = vld [vmem:[%s930_s2] ss:$0 sm:$0xff] (!%p138_p2) }
   0x7   : > { %703 = vmatpush3.bf16.msra.mxu0 (!%p138_p2), %v750_v0  ;;  %740 = vmatpush3.bf16.msra.mxu1 (!%p138_p2), %v750_v0 }
   0x8   : > { %704 = vmatprep.subr.bf16.mxu0 (!%p138_p2), %v751_v1  ;;  %739 = vmatprep.subr.bf16.mxu1 (!%p138_p2), %v751_v1 }
   0xb   : > { %705 = vmatpush3.bf16.msra.mxu0 (!%p138_p2), %v751_v1  ;;  %741 = vmatpush3.bf16.msra.mxu1 (!%p138_p2), %v751_v1 }
   0xd   : > { %s933_s13 = smov (!%p161_p3, %s636_s13), 1 }
   0xe   : > { %s682_s18 = sshll.u32 %s933_s13, 7  ;;  %s683_s24 = sshll.u32 %s933_s13, 8 }
   0xf   : > { %s816_s21 = scalar_lea.vmem %s928_s0, %s682_s18  ;;  %s860_s27 = scalar_lea.vmem %s931_s3, %s683_s24 }
  0x10   : > { %v752_v2 = vld [vmem:[%s816_s21] sm:$0xff]   ;;  %v754_v4 = vld [vmem:[%s816_s21 + $0x8] sm:$0xff]   ;;  %v756_v6 = vld [vmem:[%s816_s21 + $0x10] sm:$0xff]  }
  0x11   : > { %v753_v3 = vld [vmem:[%s816_s21 + $0x40] sm:$0xff]   ;;  %706 = vmatprep.mubr.msk.bf16.mxu0 %vm307_vm0, %v752_v2  ;;  %v755_v5 = vld [vmem:[%s816_s21 + $0x48] sm:$0xff]   ;;  %v757_v7 = vld [vmem:[%s816_s21 + $0x50] sm:$0xff]  }
  0x12   : > { %722 = vmatprep.mubr.msk.bf16.mxu1 %vm307_vm0, %v753_v3  ;;  %707 = vmatmul.mubr.msk.bf16.vlgmr.msra.gmra.mrb[0].mxu0 %vm307_vm0, %v754_v4  ;;  %v758_v8 = vld [vmem:[%s816_s21 + $0x18] sm:$0xff]   ;;  %v760_v10 = vld [vmem:[%s816_s21 + $0x20] sm:$0xff]   ;;  %v762_v12 = vld [vmem:[%s816_s21 + $0x28] sm:$0xff]  }
  0x13   : > { %723 = vmatmul.mubr.msk.bf16.vlgmr.msra.gmra.mrb[0].mxu1 %vm307_vm0, %v755_v5  ;;  %710 = vmatprep.mubr.msk.bf16.mxu0 %vm307_vm0, %v756_v6  ;;  %v759_v9 = vld [vmem:[%s816_s21 + $0x58] sm:$0xff]   ;;  %v761_v11 = vld [vmem:[%s816_s21 + $0x60] sm:$0xff]   ;;  %v763_v13 = vld [vmem:[%s816_s21 + $0x68] sm:$0xff]  }
  0x14   : > { %726 = vmatprep.mubr.msk.bf16.mxu1 %vm307_vm0, %v757_v7  ;;  %v764_v14 = vld [vmem:[%s816_s21 + $0x30] sm:$0xff]   ;;  %v766_v16 = vld [vmem:[%s816_s21 + $0x38] sm:$0xff]  }
  0x15   : > { %v765_v15 = vld [vmem:[%s816_s21 + $0x70] sm:$0xff]   ;;  %v767_v17 = vld [vmem:[%s816_s21 + $0x78] sm:$0xff]  }
  0x1a   : > { %711 = vmatmul.mubr.msk.bf16.gmra.mrb[4].mxu0 %vm307_vm0, %v758_v8 }
  0x1b   : > { %727 = vmatmul.mubr.msk.bf16.gmra.mrb[4].mxu1 %vm307_vm0, %v759_v9  ;;  %714 = vmatprep.mubr.msk.bf16.mxu0 %vm307_vm0, %v760_v10 }
  0x1c   : > { %730 = vmatprep.mubr.msk.bf16.mxu1 %vm307_vm0, %v761_v11 }
  0x22   : > { %715 = vmatmul.mubr.msk.bf16.gmra.mrb[8].mxu0 %vm307_vm0, %v762_v12 }
  0x23   : > { %731 = vmatmul.mubr.msk.bf16.gmra.mrb[8].mxu1 %vm307_vm0, %v763_v13  ;;  %718 = vmatprep.mubr.msk.bf16.mxu0 %vm307_vm0, %v764_v14 }
  0x24   : > { %734 = vmatprep.mubr.msk.bf16.mxu1 %vm307_vm0, %v765_v15 }
  0x2a   : > { %719 = vmatmul.mubr.msk.bf16.gmra.mrb[12].mxu0 %vm307_vm0, %v766_v16 }
  0x2b   : > { %735 = vmatmul.mubr.msk.bf16.gmra.mrb[12].mxu1 %vm307_vm0, %v767_v17 }
  0xe5   : > { %v708_v19 = vpop.f32.mrb[0].mxu0 }
  0xe6   : > { %v399_v20 = vadd.f32 %v708_v19, %v853_v18  ;;  %v724_v21 = vpop.f32.mrb[0].mxu1  ;;  %v390_v22 = vpop.f32.mrb[1].mxu0 }
  0xe7   : > { %v463_v23 = vadd.f32 %v724_v21, %v853_v18  ;;  %v391_v24 = vadd.f32 %v853_v18, %v390_v22  ;;  %v454_v25 = vpop.f32.mrb[1].mxu1  ;;  %v709_v26 = vpop.f32.mrb[2].mxu0 }
  0xe8   : > { %v519_v27 = vmax.f32 %v399_v20, 0.0  ;;  %v455_v28 = vadd.f32 %v853_v18, %v454_v25  ;;  %v402_v29 = vadd.f32 %v709_v26, %v853_v18  ;;  %v725_v30 = vpop.f32.mrb[2].mxu1  ;;  %v393_v31 = vpop.f32.mrb[3].mxu0 }
  0xe9   : > { %v535_v32 = vmax.f32 %v463_v23, 0.0  ;;  %v517_v33 = vmax.f32 %v391_v24, 0.0  ;;  %v466_v34 = vadd.f32 %v725_v30, %v853_v18  ;;  %v394_v35 = vadd.f32 %v853_v18, %v393_v31  ;;  %v457_v36 = vpop.f32.mrb[3].mxu1 }
  0xea   : > { %551 = vst [vmem:[%s860_s27 + $0x10] sm:$0xff] %v519_v27  ;;  %v533_v37 = vmax.f32 %v455_v28, 0.0  ;;  %v520_v38 = vmax.f32 %v402_v29, 0.0  ;;  %v458_v39 = vadd.f32 %v853_v18, %v457_v36 }
  0xeb   : > { %567 = vst [vmem:[%s860_s27 + $0x90] sm:$0xff] %v535_v32  ;;  %549 = vst [vmem:[%s860_s27] sm:$0xff] %v517_v33  ;;  %v536_v40 = vmax.f32 %v466_v34, 0.0  ;;  %v518_v41 = vmax.f32 %v394_v35, 0.0 }
  0xec   : > { %565 = vst [vmem:[%s860_s27 + $0x80] sm:$0xff] %v533_v37  ;;  %552 = vst [vmem:[%s860_s27 + $0x18] sm:$0xff] %v520_v38  ;;  %v534_v42 = vmax.f32 %v458_v39, 0.0 }
  0xed   : > { %568 = vst [vmem:[%s860_s27 + $0x98] sm:$0xff] %v536_v40  ;;  %550 = vst [vmem:[%s860_s27 + $0x8] sm:$0xff] %v518_v41  ;;  %v712_v43 = vpop.f32.mrb[4].mxu0 }
  0xee   : > { %566 = vst [vmem:[%s860_s27 + $0x88] sm:$0xff] %v534_v42  ;;  %v415_v44 = vadd.f32 %v712_v43, %v853_v18  ;;  %v728_v45 = vpop.f32.mrb[4].mxu1  ;;  %v406_v46 = vpop.f32.mrb[5].mxu0 }
  0xef   : > { %v479_v47 = vadd.f32 %v728_v45, %v853_v18  ;;  %v407_v48 = vadd.f32 %v853_v18, %v406_v46  ;;  %v470_v49 = vpop.f32.mrb[5].mxu1  ;;  %v713_v50 = vpop.f32.mrb[6].mxu0 }
  0xf0   : > { %v523_v51 = vmax.f32 %v415_v44, 0.0  ;;  %v471_v52 = vadd.f32 %v853_v18, %v470_v49  ;;  %v418_v53 = vadd.f32 %v713_v50, %v853_v18  ;;  %v729_v54 = vpop.f32.mrb[6].mxu1  ;;  %v409_v55 = vpop.f32.mrb[7].mxu0 }
  0xf1   : > { %v539_v56 = vmax.f32 %v479_v47, 0.0  ;;  %v521_v57 = vmax.f32 %v407_v48, 0.0  ;;  %v482_v58 = vadd.f32 %v729_v54, %v853_v18  ;;  %v410_v59 = vadd.f32 %v853_v18, %v409_v55  ;;  %v473_v60 = vpop.f32.mrb[7].mxu1 }
  0xf2   : > { %555 = vst [vmem:[%s860_s27 + $0x30] sm:$0xff] %v523_v51  ;;  %v537_v61 = vmax.f32 %v471_v52, 0.0  ;;  %v524_v62 = vmax.f32 %v418_v53, 0.0  ;;  %v474_v63 = vadd.f32 %v853_v18, %v473_v60 }
  0xf3   : > { %571 = vst [vmem:[%s860_s27 + $0xb0] sm:$0xff] %v539_v56  ;;  %553 = vst [vmem:[%s860_s27 + $0x20] sm:$0xff] %v521_v57  ;;  %v540_v0 = vmax.f32 %v482_v58, 0.0  ;;  %v522_v1 = vmax.f32 %v410_v59, 0.0 }
  0xf4   : > { %569 = vst [vmem:[%s860_s27 + $0xa0] sm:$0xff] %v537_v61  ;;  %556 = vst [vmem:[%s860_s27 + $0x38] sm:$0xff] %v524_v62  ;;  %v538_v2 = vmax.f32 %v474_v63, 0.0 }
  0xf5   : > { %572 = vst [vmem:[%s860_s27 + $0xb8] sm:$0xff] %v540_v0  ;;  %554 = vst [vmem:[%s860_s27 + $0x28] sm:$0xff] %v522_v1  ;;  %v716_v3 = vpop.f32.mrb[8].mxu0 }
  0xf6   : > { %570 = vst [vmem:[%s860_s27 + $0xa8] sm:$0xff] %v538_v2  ;;  %v431_v4 = vadd.f32 %v716_v3, %v853_v18  ;;  %v732_v5 = vpop.f32.mrb[8].mxu1  ;;  %v422_v6 = vpop.f32.mrb[9].mxu0 }
  0xf7   : > { %v495_v7 = vadd.f32 %v732_v5, %v853_v18  ;;  %v423_v8 = vadd.f32 %v853_v18, %v422_v6  ;;  %v486_v9 = vpop.f32.mrb[9].mxu1  ;;  %v717_v10 = vpop.f32.mrb[10].mxu0 }
  0xf8   : > { %v527_v11 = vmax.f32 %v431_v4, 0.0  ;;  %v487_v12 = vadd.f32 %v853_v18, %v486_v9  ;;  %v434_v13 = vadd.f32 %v717_v10, %v853_v18  ;;  %v733_v14 = vpop.f32.mrb[10].mxu1  ;;  %v425_v15 = vpop.f32.mrb[11].mxu0 }
  0xf9   : > { %v543_v16 = vmax.f32 %v495_v7, 0.0  ;;  %v525_v17 = vmax.f32 %v423_v8, 0.0  ;;  %v498_v19 = vadd.f32 %v733_v14, %v853_v18  ;;  %v426_v20 = vadd.f32 %v853_v18, %v425_v15  ;;  %v489_v21 = vpop.f32.mrb[11].mxu1 }
  0xfa   : > { %559 = vst [vmem:[%s860_s27 + $0x50] sm:$0xff] %v527_v11  ;;  %v541_v22 = vmax.f32 %v487_v12, 0.0  ;;  %v528_v23 = vmax.f32 %v434_v13, 0.0  ;;  %v490_v24 = vadd.f32 %v853_v18, %v489_v21 }
  0xfb   : > { %575 = vst [vmem:[%s860_s27 + $0xd0] sm:$0xff] %v543_v16  ;;  %557 = vst [vmem:[%s860_s27 + $0x40] sm:$0xff] %v525_v17  ;;  %v544_v25 = vmax.f32 %v498_v19, 0.0  ;;  %v526_v26 = vmax.f32 %v426_v20, 0.0 }
  0xfc   : > { %573 = vst [vmem:[%s860_s27 + $0xc0] sm:$0xff] %v541_v22  ;;  %560 = vst [vmem:[%s860_s27 + $0x58] sm:$0xff] %v528_v23  ;;  %v542_v27 = vmax.f32 %v490_v24, 0.0 }
  0xfd   : > { %576 = vst [vmem:[%s860_s27 + $0xd8] sm:$0xff] %v544_v25  ;;  %558 = vst [vmem:[%s860_s27 + $0x48] sm:$0xff] %v526_v26  ;;  %v720_v28 = vpop.f32.mrb[12].mxu0 }
  0xfe   : > { %574 = vst [vmem:[%s860_s27 + $0xc8] sm:$0xff] %v542_v27  ;;  %v447_v29 = vadd.f32 %v720_v28, %v853_v18  ;;  %v736_v30 = vpop.f32.mrb[12].mxu1  ;;  %v438_v31 = vpop.f32.mrb[13].mxu0 }
  0xff   : > { %v511_v32 = vadd.f32 %v736_v30, %v853_v18  ;;  %v439_v33 = vadd.f32 %v853_v18, %v438_v31  ;;  %v502_v34 = vpop.f32.mrb[13].mxu1  ;;  %v721_v35 = vpop.f32.mrb[14].mxu0 }
 0x100   : > { %v531_v36 = vmax.f32 %v447_v29, 0.0  ;;  %v503_v37 = vadd.f32 %v853_v18, %v502_v34  ;;  %v450_v38 = vadd.f32 %v721_v35, %v853_v18  ;;  %v737_v39 = vpop.f32.mrb[14].mxu1  ;;  %v441_v40 = vpop.f32.mrb[15].mxu0 }
 0x101   : > { %v547_v41 = vmax.f32 %v511_v32, 0.0  ;;  %v529_v42 = vmax.f32 %v439_v33, 0.0  ;;  %v514_v43 = vadd.f32 %v737_v39, %v853_v18  ;;  %v442_v44 = vadd.f32 %v853_v18, %v441_v40  ;;  %v505_v45 = vpop.f32.mrb[15].mxu1 }
 0x102   : > { %563 = vst [vmem:[%s860_s27 + $0x70] sm:$0xff] %v531_v36  ;;  %v545_v46 = vmax.f32 %v503_v37, 0.0  ;;  %v532_v47 = vmax.f32 %v450_v38, 0.0  ;;  %v506_v48 = vadd.f32 %v853_v18, %v505_v45 }
 0x103   : > { %579 = vst [vmem:[%s860_s27 + $0xf0] sm:$0xff] %v547_v41  ;;  %561 = vst [vmem:[%s860_s27 + $0x60] sm:$0xff] %v529_v42  ;;  %v548_v49 = vmax.f32 %v514_v43, 0.0  ;;  %v530_v50 = vmax.f32 %v442_v44, 0.0 }
 0x104   : > { %577 = vst [vmem:[%s860_s27 + $0xe0] sm:$0xff] %v545_v46  ;;  %564 = vst [vmem:[%s860_s27 + $0x78] sm:$0xff] %v532_v47  ;;  %v546_v51 = vmax.f32 %v506_v48, 0.0 }
 0x105   : > { %580 = vst [vmem:[%s860_s27 + $0xf8] sm:$0xff] %v548_v49  ;;  %562 = vst [vmem:[%s860_s27 + $0x68] sm:$0xff] %v530_v50 }
 0x106   : > { %578 = vst [vmem:[%s860_s27 + $0xe8] sm:$0xff] %v546_v51 }
 0x107 PF: > { %s13_s12 = sadd.s32 1, %s774_s12  }
 0x108   : > { %p10_p4 = scmp.ge.s32.totalorder %s13_s12, 4  }
 0x10a   :  { %12 = sbr.rel (!%p10_p4) target bundleno = 1 (0x1), region = 62 }

// kernel: net_forward.4
= control target key start
LH: loop header
LB: loop body
LE: loop exit
PB: predicated region body
PF: predicated region fallthrough
CT: control target
= control target key end

     0   :  { %s4326_s12 = smov 0   ;;  %s5023_s0 = inlined_call_operand.vmem [shape: f32[2,18,18,128], index: 0, kind: input, shape index: {}]   ;;  %s5024_s1 = inlined_call_operand.vmem [shape: bf16[1152,128], index: 1, kind: input, shape index: {}]   ;;  %s5025_s2 = inlined_call_operand.vmem [shape: f32[1,128], index: 2, kind: input, shape index: {}]   ;;  %s5026_s3 = inlined_call_operand.vmem [shape: f32[2,16,16,128], index: 3, kind: output, shape index: {}]  }
   0x1 LB: > { %s3013_s13 = sadd.s32 4294967295, %s4304_s12   ;;  %p3017_p0 = scmp.ge.s32.totalorder %s4304_s12, 1  ;;  %s4304_s12 = sphi %s4326_s12, %s13_s12  }
   0x2   : > { %p137_p1 = scmp.lt.s32.totalorder %s4304_s12, 3 }
   0x4   : > { %p138_p2 = pnand %p3017_p0, %p137_p1 }
   0x5   : > { %v4218_v0 = vld [vmem:[%s5024_s1 + $0x40] sm:$0xff] (!%p138_p2)   ;;  %p161_p3 = scmp.lt.s32.totalorder (!%p138_p2), %s3013_s13, 1  ;;  %v4220_v2 = vld [vmem:[%s5024_s1 + $0x48] sm:$0xff] (!%p138_p2)   ;;  %v4222_v4 = vld [vmem:[%s5024_s1 + $0x50] sm:$0xff] (!%p138_p2)  }
   0x6   : > { %141 = sbr.rel (%p138_p2) target bundleno = 541 (0x21d), region = 32  ;;  %v4219_v1 = vld [vmem:[%s5024_s1 + $0x100] sm:$0xff] (!%p138_p2)   ;;  %3505 = vmatprep.subr.bf16.mxu1 (!%p138_p2), %v4218_v0  ;;  %v4221_v3 = vld [vmem:[%s5024_s1 + $0x108] sm:$0xff] (!%p138_p2)   ;;  %v4223_v5 = vld [vmem:[%s5024_s1 + $0x110] sm:$0xff] (!%p138_p2)  }
   0x7   : > { %3697 = vmatprep.subr.bf16.mxu0 (!%p138_p2), %v4219_v1  ;;  %3506 = vmatpush3.bf16.msra.mxu1 (!%p138_p2), %v4218_v0  ;;  %v4224_v6 = vld [vmem:[%s5024_s1 + $0x58] sm:$0xff] (!%p138_p2)   ;;  %v4226_v8 = vld [vmem:[%s5024_s1 + $0x60] sm:$0xff] (!%p138_p2)   ;;  %v4228_v10 = vld [vmem:[%s5024_s1 + $0x68] sm:$0xff] (!%p138_p2)  }
   0x8   : > { %3698 = vmatpush3.bf16.msra.mxu0 (!%p138_p2), %v4219_v1  ;;  %3507 = vmatprep.subr.bf16.mxu1 (!%p138_p2), %v4220_v2  ;;  %v4225_v7 = vld [vmem:[%s5024_s1 + $0x118] sm:$0xff] (!%p138_p2)   ;;  %v4227_v9 = vld [vmem:[%s5024_s1 + $0x120] sm:$0xff] (!%p138_p2)   ;;  %v4229_v11 = vld [vmem:[%s5024_s1 + $0x128] sm:$0xff] (!%p138_p2)  }
   0x9   : > { %3699 = vmatprep.subr.bf16.mxu0 (!%p138_p2), %v4221_v3  ;;  %v4230_v18 = vld [vmem:[%s5024_s1 + $0x70] sm:$0xff] (!%p138_p2)   ;;  %v4232_v20 = vld [vmem:[%s5024_s1 + $0x78] sm:$0xff] (!%p138_p2)   ;;  %v4234_v22 = vld [vmem:[%s5024_s1] sm:$0xff] (!%p138_p2)  }
   0xa   : > { %v4231_v19 = vld [vmem:[%s5024_s1 + $0x130] sm:$0xff] (!%p138_p2)   ;;  %v4233_v21 = vld [vmem:[%s5024_s1 + $0x138] sm:$0xff] (!%p138_p2)   ;;  %v4235_v25 = vld [vmem:[%s5024_s1 + $0x140] sm:$0xff] (!%p138_p2)  }
   0xb   : > { %3508 = vmatpush3.bf16.msra.mxu1 (!%p138_p2), %v4220_v2  ;;  %v4236_v29 = vld [vmem:[%s5024_s1 + $0x148] sm:$0xff] (!%p138_p2)   ;;  %v4238_v34 = vld [vmem:[%s5024_s1 + $0x150] sm:$0xff] (!%p138_p2)   ;;  %v4239_v40 = vld [vmem:[%s5024_s1 + $0x158] sm:$0xff] (!%p138_p2)  }
   0xc   : > { %3700 = vmatpush3.bf16.msra.mxu0 (!%p138_p2), %v4221_v3  ;;  %3509 = vmatprep.subr.bf16.mxu1 (!%p138_p2), %v4222_v4  ;;  %v4237_v31 = vld [vmem:[%s5024_s1 + $0x8] sm:$0xff] (!%p138_p2)   ;;  %v4240_v36 = vld [vmem:[%s5024_s1 + $0x10] sm:$0xff] (!%p138_p2)   ;;  %v4243_v41 = vld [vmem:[%s5024_s1 + $0x18] sm:$0xff] (!%p138_p2)  }
   0xd   : > { %s5028_s13 = smov (!%p161_p3, %s3013_s13), 1  ;;  %3701 = vmatprep.subr.bf16.mxu0 %v4223_v5  ;;  %v4241_v44 = vld [vmem:[%s5024_s1 + $0x160] sm:$0xff]   ;;  %v4242_v50 = vld [vmem:[%s5024_s1 + $0x168] sm:$0xff]   ;;  %v4244_v54 = vld [vmem:[%s5024_s1 + $0x170] sm:$0xff]  }
   0xe   : > { %s4209_s30 = smul.u32 432, %s5028_s13  ;;  %v4246_v47 = vld [vmem:[%s5024_s1 + $0x20] sm:$0xff]   ;;  %v4248_v51 = vld [vmem:[%s5024_s1 + $0x28] sm:$0xff]   ;;  %v4250_v57 = vld [vmem:[%s5024_s1 + $0x30] sm:$0xff]   ;;  %s3288_s7 = sshll.u32 %s5028_s13, 8 }
   0xf   : > { %3510 = vmatpush3.bf16.msra.mxu1 %v4222_v4  ;;  %v4245_v60 = vld [vmem:[%s5024_s1 + $0x178] sm:$0xff]   ;;  %v4247_v4 = vld [vmem:[%s5024_s1 + $0x180] sm:$0xff]   ;;  %s4951_s11 = scalar_lea.vmem %s5026_s3, %s3288_s7 }
  0x10   : > { %3702 = vmatpush3.bf16.msra.mxu0 %v4223_v5  ;;  %3511 = vmatprep.subr.bf16.mxu1 %v4224_v6  ;;  %s4370_s10 = scalar_lea.vmem %s5023_s0, %s4209_s30  ;;  %v4252_v0 = vld [vmem:[%s5024_s1 + $0x38] sm:$0xff]  }
  0x11   : > { %3703 = vmatprep.subr.bf16.mxu0 %v4225_v7  ;;  %v236_v12 = vld [vmem:[%s4370_s10 + $0x1] sm:$0xff]  ;;  %v237_v13 = vld [vmem:[%s4370_s10 + $0x9] sm:$0xff]  ;;  %v3085_v14 = vld [vmem:[%s4370_s10 + $0x19] sm:$0xff] }
  0x12   : > { %v268_v15 = vpack.c.bf16 %v237_v13, %v236_v12  ;;  %v3086_v16 = vld [vmem:[%s4370_s10 + $0x21] sm:$0xff]  ;;  %v3087_v23 = vld [vmem:[%s4370_s10 + $0x31] sm:$0xff]  ;;  %v3088_v24 = vld [vmem:[%s4370_s10 + $0x39] sm:$0xff] }
  0x13   : > { %3512 = vmatpush3.bf16.msra.mxu1 %v4224_v6  ;;  %v1361_v17 = vpack.c.bf16 %v3086_v16, %v3085_v14  ;;  %v3089_v26 = vld [vmem:[%s4370_s10 + $0x49] sm:$0xff]  ;;  %v3090_v27 = vld [vmem:[%s4370_s10 + $0x51] sm:$0xff]  ;;  %v1362_v28 = vpack.c.bf16 %v3088_v24, %v3087_v23  ;;  %v3091_v32 = vld [vmem:[%s4370_s10 + $0x61] sm:$0xff] }
  0x14   : > { %3704 = vmatpush3.bf16.msra.mxu0 %v4225_v7  ;;  %3513 = vmatprep.subr.bf16.mxu1 %v4226_v8  ;;  %v1363_v30 = vpack.c.bf16 %v3090_v27, %v3089_v26  ;;  %v3092_v33 = vld [vmem:[%s4370_s10 + $0x69] sm:$0xff]  ;;  %v3093_v35 = vld [vmem:[%s4370_s10 + $0x79] sm:$0xff]  ;;  %v3094_v37 = vld [vmem:[%s4370_s10 + $0x81] sm:$0xff] }
  0x15   : > { %3705 = vmatprep.subr.bf16.mxu0 %v4227_v9  ;;  %3521 = vmatprep.mubr.bf16.mxu1 %v268_v15  ;;  %v1364_v38 = vpack.c.bf16 %v3092_v33, %v3091_v32  ;;  %v1365_v39 = vpack.c.bf16 %v3094_v37, %v3093_v35  ;;  %v3095_v42 = vld [vmem:[%s4370_s10 + $0x91] sm:$0xff]  ;;  %v3096_v43 = vld [vmem:[%s4370_s10 + $0x99] sm:$0xff]  ;;  %v3097_v45 = vld [vmem:[%s4370_s10 + $0xa9] sm:$0xff] }
  0x16   : > { %3713 = vmatprep.mubr.bf16.mxu0 %v1361_v17  ;;  %v3098_v46 = vld [vmem:[%s4370_s10 + $0xb1] sm:$0xff]  ;;  %v1366_v48 = vpack.c.bf16 %v3096_v43, %v3095_v42  ;;  %v3099_v52 = vld [vmem:[%s4370_s10 + $0xc1] sm:$0xff]  ;;  %v3100_v53 = vld [vmem:[%s4370_s10 + $0xc9] sm:$0xff] }
  0x17   : > { %3514 = vmatpush3.bf16.msra.mxu1 %v4226_v8  ;;  %v4436_v49 = vpack.c.bf16 %v3098_v46, %v3097_v45  ;;  %v3125_v55 = vld [vmem:[%s4370_s10 + $0x1a] sm:$0xff]  ;;  %v3126_v56 = vld [vmem:[%s4370_s10 + $0x22] sm:$0xff]  ;;  %v1368_v58 = vpack.c.bf16 %v3100_v53, %v3099_v52  ;;  %v3127_v63 = vld [vmem:[%s4370_s10 + $0x32] sm:$0xff] }
  0x18   : > { %3706 = vmatpush3.bf16.msra.mxu0 %v4227_v9  ;;  %3515 = vmatprep.subr.bf16.mxu1 %v4228_v10  ;;  %v4455_v59 = vpack.c.bf16 %v3126_v56, %v3125_v55  ;;  %v254_v61 = vld [vmem:[%s4370_s10 + $0xd9] sm:$0xff]  ;;  %v255_v62 = vld [vmem:[%s4370_s10 + $0xe1] sm:$0xff]  ;;  %v256_v2 = vld [vmem:[%s4370_s10 + $0xf1] sm:$0xff] }
  0x19   : > { %3707 = vmatprep.subr.bf16.mxu0 %v4229_v11  ;;  %v3128_v1 = vld [vmem:[%s4370_s10 + $0x3a] sm:$0xff]  ;;  %v3129_v5 = vld [vmem:[%s4370_s10 + $0x4a] sm:$0xff]  ;;  %v3130_v6 = vld [vmem:[%s4370_s10 + $0x52] sm:$0xff]  ;;  %v4476_v7 = vpack.c.bf16 %v255_v62, %v254_v61 }
  0x1a   : > { %v257_v3 = vld [vmem:[%s4370_s10 + $0xf9] sm:$0xff]  ;;  %v4483_v9 = vpack.c.bf16 %v3128_v1, %v3127_v63  ;;  %v4249_v12 = vld [vmem:[%s5024_s1 + $0x188] sm:$0xff]   ;;  %v259_v14 = vld [vmem:[%s4370_s10 + $0x111] sm:$0xff] }
  0x1b   : > { %3516 = vmatpush3.bf16.msra.mxu1 %v4228_v10  ;;  %v4481_v8 = vld [vmem:[%s5024_s1 + $0x80] sm:$0xff]   ;;  %v4485_v10 = vpack.c.bf16 %v257_v3, %v256_v2  ;;  %v258_v13 = vld [vmem:[%s4370_s10 + $0x109] sm:$0xff]  ;;  %v4253_v27 = vld [vmem:[%s5024_s1 + $0x198] sm:$0xff]  }
  0x1c   : > { %3708 = vmatpush3.bf16.msra.mxu0 %v4229_v11  ;;  %3517 = vmatprep.subr.bf16.mxu1 %v4230_v18  ;;  %v4487_v11 = vpack.c.bf16 %v3130_v6, %v3129_v5  ;;  %v3131_v15 = vld [vmem:[%s4370_s10 + $0x62] sm:$0xff]  ;;  %v3132_v16 = vld [vmem:[%s4370_s10 + $0x6a] sm:$0xff]  ;;  %v262_v26 = vld [vmem:[%s4370_s10 + $0x139] sm:$0xff] }
  0x1d   : > { %3709 = vmatprep.subr.bf16.mxu0 %v4231_v19  ;;  %v4510_v23 = vpack.c.bf16 %v3132_v16, %v3131_v15  ;;  %v265_v32 = vld [vmem:[%s4370_s10 + $0x159] sm:$0xff]  ;;  %v3137_v33 = vld [vmem:[%s4370_s10 + $0xaa] sm:$0xff]  ;;  %v3139_v43 = vld [vmem:[%s4370_s10 + $0xc2] sm:$0xff] }
  0x1e   : > { %v4255_v35 = vld [vmem:[%s5024_s1 + $0x1a0] sm:$0xff]   ;;  %v4257_v42 = vld [vmem:[%s5024_s1 + $0x1a8] sm:$0xff]   ;;  %v174_v55 = vld [vmem:[%s4370_s10 + $0x18] sm:$0xff] }
  0x1f   : > { %3518 = vmatpush3.bf16.msra.mxu1 %v4230_v18  ;;  %v261_v18 = vld [vmem:[%s4370_s10 + $0x129] sm:$0xff]  ;;  %v172_v45 = vld [vmem:[%s4370_s10] sm:$0xff]  ;;  %v177_v62 = vld [vmem:[%s4370_s10 + $0x38] sm:$0xff] }
  0x20   : > { %3710 = vmatpush3.bf16.msra.mxu0 %v4231_v19  ;;  %3519 = vmatprep.subr.bf16.mxu1 %v4232_v20  ;;  %v3133_v19 = vld [vmem:[%s4370_s10 + $0x7a] sm:$0xff]  ;;  %v173_v46 = vld [vmem:[%s4370_s10 + $0x8] sm:$0xff]  ;;  %v176_v61 = vld [vmem:[%s4370_s10 + $0x30] sm:$0xff] }
  0x21   : > { %3711 = vmatprep.subr.bf16.mxu0 %v4233_v21  ;;  %v204_v53 = vpack.c.bf16 %v173_v46, %v172_v45  ;;  %v175_v56 = vld [vmem:[%s4370_s10 + $0x20] sm:$0xff]  ;;  %v3145_v63 = vld [vmem:[%s4370_s10 + $0x10a] sm:$0xff] }
  0x22   : > { %v4583_v1 = vld [vmem:[%s5024_s1 + $0x1c0] sm:$0xff]   ;;  %v4585_v2 = vpack.c.bf16 %v175_v56, %v174_v55  ;;  %v178_v6 = vld [vmem:[%s4370_s10 + $0x48] sm:$0xff] }
  0x23   : > { %3520 = vmatpush3.bf16.msra.mxu1 %v4232_v20  ;;  %v3134_v20 = vld [vmem:[%s4370_s10 + $0x82] sm:$0xff]  ;;  %v3148_v15 = vld [vmem:[%s4370_s10 + $0x12a] sm:$0xff] }
  0x24   : > { %3712 = vmatpush3.bf16.msra.mxu0 %v4233_v21  ;;  %3553 = vmatprep.subr.bf16.mxu1 %v4234_v22  ;;  %v4251_v21 = vld [vmem:[%s5024_s1 + $0x190] sm:$0xff]   ;;  %v180_v16 = vld [vmem:[%s4370_s10 + $0x60] sm:$0xff]  ;;  %v4264_v46 = vld [vmem:[%s5024_s1 + $0xa8] sm:$0xff]  }
  0x25   : > { %3745 = vmatprep.subr.bf16.mxu0 %v4235_v25  ;;  %v188_v55 = vld [vmem:[%s4370_s10 + $0xc0] sm:$0xff]  ;;  %v189_v56 = vld [vmem:[%s4370_s10 + $0xc8] sm:$0xff] }
  0x26   : > { %3522 = vmatmul.mubr.bf16.vlgmr.msra.gmra.mrb[0].mxu1 %v1361_v17  ;;  %v260_v17 = vld [vmem:[%s4370_s10 + $0x121] sm:$0xff] }
  0x27   : > { %3714 = vmatmul.mubr.bf16.vlgmr.msra.gmra.mrb[0].mxu0 %v1362_v28  ;;  %3554 = vmatpush3.bf16.msra.mxu1 %v4234_v22  ;;  %v4508_v22 = vpack.c.bf16 %v259_v14, %v258_v13  ;;  %v4512_v24 = vpack.c.bf16 %v261_v18, %v260_v17  ;;  %v4256_v13 = vld [vmem:[%s5024_s1 + $0x88] sm:$0xff]   ;;  %v3149_v18 = vld [vmem:[%s4370_s10 + $0x13a] sm:$0xff] }
  0x28   : > { %3746 = vmatpush3.bf16.msra.mxu0 %v4235_v25  ;;  %3525 = vmatprep.mubr.bf16.mxu1 %v1362_v28  ;;  %v4514_v25 = vpack.c.bf16 %v3134_v20, %v3133_v19  ;;  %v263_v28 = vld [vmem:[%s4370_s10 + $0x141] sm:$0xff]  ;;  %v4258_v19 = vld [vmem:[%s5024_s1 + $0x90] sm:$0xff]  }
  0x29   : > { %3747 = vmatprep.subr.bf16.mxu0 %v4236_v29  ;;  %3717 = vmatprep.mubr.bf16.mxu0 %v1363_v30  ;;  %v3147_v14 = vld [vmem:[%s4370_s10 + $0x122] sm:$0xff] }
  0x2a   : > { %3555 = vmatprep.subr.bf16.mxu1 %v4237_v31  ;;  %v181_v17 = vld [vmem:[%s4370_s10 + $0x68] sm:$0xff] }
  0x2b   : > { %3556 = vmatpush3.bf16.msra.mxu1 %v4237_v31  ;;  %v264_v31 = vld [vmem:[%s4370_s10 + $0x151] sm:$0xff]  ;;  %v3150_v20 = vld [vmem:[%s4370_s10 + $0x142] sm:$0xff] }
  0x2c   : > { %3748 = vmatpush3.bf16.msra.mxu0 %v4236_v29  ;;  %3557 = vmatprep.subr.bf16.mxu1 %v4240_v36  ;;  %v3135_v29 = vld [vmem:[%s4370_s10 + $0x92] sm:$0xff] }
  0x2d   : > { %3749 = vmatprep.subr.bf16.mxu0 %v4238_v34 }
  0x2e   : > { %3526 = vmatmul.mubr.bf16.gmra.mrb[4].mxu1 %v1363_v30  ;;  %v3136_v30 = vld [vmem:[%s4370_s10 + $0x9a] sm:$0xff] }
  0x2f   : > { %3718 = vmatmul.mubr.bf16.gmra.mrb[4].mxu0 %v1364_v38  ;;  %3529 = vmatprep.mubr.bf16.mxu1 %v1364_v38  ;;  %v4536_v37 = vpack.c.bf16 %v3136_v30, %v3135_v29  ;;  %v4538_v38 = vpack.c.bf16 %v265_v32, %v264_v31  ;;  %v183_v29 = vld [vmem:[%s4370_s10 + $0x80] sm:$0xff]  ;;  %v4260_v30 = vld [vmem:[%s5024_s1 + $0x98] sm:$0xff]  }
  0x30   : > { %3750 = vmatpush3.bf16.msra.mxu0 %v4238_v34  ;;  %3721 = vmatprep.mubr.bf16.mxu0 %v1365_v39  ;;  %v3138_v34 = vld [vmem:[%s4370_s10 + $0xb2] sm:$0xff]  ;;  %v3152_v32 = vld [vmem:[%s4370_s10 + $0x15a] sm:$0xff] }
  0x31   : > { %3751 = vmatprep.subr.bf16.mxu0 %v4239_v40  ;;  %3558 = vmatpush3.bf16.msra.mxu1 %v4240_v36  ;;  %v4534_v36 = vpack.c.bf16 %v263_v28, %v262_v26  ;;  %v4617_v26 = vpack.c.bf16 %v181_v17, %v180_v16  ;;  %v182_v28 = vld [vmem:[%s4370_s10 + $0x78] sm:$0xff]  ;;  %v4265_v16 = vld [vmem:[%s5024_s1 + $0x1c8] sm:$0xff]  }
  0x32   : > { %3559 = vmatprep.subr.bf16.mxu1 %v4243_v41  ;;  %v3151_v31 = vld [vmem:[%s4370_s10 + $0x152] sm:$0xff]  ;;  %v194_v17 = vld [vmem:[%s4370_s10 + $0x108] sm:$0xff] }
  0x34   : > { %3752 = vmatpush3.bf16.msra.mxu0 %v4239_v40  ;;  %v266_v40 = vld [vmem:[%s4370_s10 + $0x169] sm:$0xff] }
  0x35   : > { %3753 = vmatprep.subr.bf16.mxu0 %v4241_v44  ;;  %3560 = vmatpush3.bf16.msra.mxu1 %v4243_v41  ;;  %v267_v41 = vld [vmem:[%s4370_s10 + $0x171] sm:$0xff] }
  0x36   : > { %3530 = vmatmul.mubr.bf16.gmra.mrb[8].mxu1 %v1365_v39  ;;  %3561 = vmatprep.subr.bf16.mxu1 %v4246_v47  ;;  %v4540_v39 = vpack.c.bf16 %v3138_v34, %v3137_v33  ;;  %v184_v33 = vld [vmem:[%s4370_s10 + $0x90] sm:$0xff]  ;;  %v185_v34 = vld [vmem:[%s4370_s10 + $0x98] sm:$0xff] }
  0x37   : > { %3722 = vmatmul.mubr.bf16.gmra.mrb[8].mxu0 %v1366_v48  ;;  %3533 = vmatprep.mubr.bf16.mxu1 %v1366_v48  ;;  %v3142_v48 = vld [vmem:[%s4370_s10 + $0xe2] sm:$0xff] }
  0x38   : > { %3754 = vmatpush3.bf16.msra.mxu0 %v4241_v44  ;;  %3725 = vmatprep.mubr.bf16.mxu0 %v4436_v49  ;;  %v3140_v44 = vld [vmem:[%s4370_s10 + $0xca] sm:$0xff] }
  0x39   : > { %3755 = vmatprep.subr.bf16.mxu0 %v4242_v50  ;;  %3562 = vmatpush3.bf16.msra.mxu1 %v4246_v47  ;;  %v3141_v47 = vld [vmem:[%s4370_s10 + $0xda] sm:$0xff]  ;;  %v4562_v52 = vpack.c.bf16 %v3140_v44, %v3139_v43  ;;  %v4641_v43 = vpack.c.bf16 %v3152_v32, %v3151_v31  ;;  %v4643_v44 = vpack.c.bf16 %v185_v34, %v184_v33  ;;  %v200_v33 = vld [vmem:[%s4370_s10 + $0x150] sm:$0xff] }
  0x3a   : > { %3563 = vmatprep.subr.bf16.mxu1 %v4248_v51  ;;  %v198_v31 = vld [vmem:[%s4370_s10 + $0x138] sm:$0xff]  ;;  %v199_v32 = vld [vmem:[%s4370_s10 + $0x140] sm:$0xff] }
  0x3b   : > { %v201_v34 = vld [vmem:[%s4370_s10 + $0x158] sm:$0xff] }
  0x3c   : > { %3756 = vmatpush3.bf16.msra.mxu0 %v4242_v50  ;;  %v4259_v50 = vld [vmem:[%s5024_s1 + $0x1b0] sm:$0xff]  }
  0x3d   : > { %3757 = vmatprep.subr.bf16.mxu0 %v4244_v54  ;;  %3564 = vmatpush3.bf16.msra.mxu1 %v4248_v51  ;;  %v4560_v51 = vpack.c.bf16 %v267_v41, %v266_v40  ;;  %v3154_v40 = vld [vmem:[%s4370_s10 + $0x172] sm:$0xff]  ;;  %v4262_v41 = vld [vmem:[%s5024_s1 + $0xa0] sm:$0xff]  }
  0x3e   : > { %3534 = vmatmul.mubr.bf16.gmra.mrb[12].mxu1 %v4436_v49  ;;  %3565 = vmatprep.subr.bf16.mxu1 %v4250_v57 }
  0x3f   : > { %3726 = vmatmul.mubr.bf16.gmra.mrb[12].mxu0 %v1368_v58  ;;  %3537 = vmatprep.mubr.bf16.mxu1 %v1368_v58  ;;  %v3143_v58 = vld [vmem:[%s4370_s10 + $0xf2] sm:$0xff] }
  0x40   : > { %3758 = vmatpush3.bf16.msra.mxu0 %v4244_v54  ;;  %3761 = vmatprep.mubr.bf16.mxu0 %v4455_v59  ;;  %v4564_v54 = vpack.c.bf16 %v3142_v48, %v3141_v47  ;;  %v186_v47 = vld [vmem:[%s4370_s10 + $0xa8] sm:$0xff]  ;;  %v187_v48 = vld [vmem:[%s4370_s10 + $0xb0] sm:$0xff] }
  0x41   : > { %3759 = vmatprep.subr.bf16.mxu0 %v4245_v60  ;;  %3566 = vmatpush3.bf16.msra.mxu1 %v4250_v57  ;;  %v4261_v57 = vld [vmem:[%s5024_s1 + $0x1b8] sm:$0xff]  }
  0x42   : > { %3567 = vmatprep.subr.bf16.mxu1 %v4252_v0 }
  0x44   : > { %3760 = vmatpush3.bf16.msra.mxu0 %v4245_v60  ;;  %v3144_v60 = vld [vmem:[%s4370_s10 + $0xfa] sm:$0xff] }
  0x45   : > { %3793 = vmatprep.subr.bf16.mxu0 %v4247_v4  ;;  %3568 = vmatpush3.bf16.msra.mxu1 %v4252_v0  ;;  %v3146_v0 = vld [vmem:[%s4370_s10 + $0x112] sm:$0xff]  ;;  %v4587_v3 = vpack.c.bf16 %v3144_v60, %v3143_v58  ;;  %v4663_v58 = vpack.c.bf16 %v187_v48, %v186_v47  ;;  %v202_v47 = vld [vmem:[%s4370_s10 + $0x168] sm:$0xff] }
  0x46   : > { %3538 = vmatmul.mubr.bf16.gmra.mrb[16].mxu1 %v4476_v7  ;;  %3601 = vmatprep.subr.bf16.mxu1 %v4481_v8  ;;  %v4591_v5 = vpack.c.bf16 %v3146_v0, %v3145_v63  ;;  %v190_v63 = vld [vmem:[%s4370_s10 + $0xd8] sm:$0xff]  ;;  %v191_v0 = vld [vmem:[%s4370_s10 + $0xe0] sm:$0xff]  ;;  %v203_v48 = vld [vmem:[%s4370_s10 + $0x170] sm:$0xff] }
  0x47   : > { %3762 = vmatmul.mubr.bf16.vlgmr.msra.gmra.mrb[0].mxu0 %v4483_v9  ;;  %3541 = vmatprep.mubr.bf16.mxu1 %v4485_v10 }
  0x48   : > { %3794 = vmatpush3.bf16.msra.mxu0 %v4247_v4  ;;  %3765 = vmatprep.mubr.bf16.mxu0 %v4487_v11  ;;  %v4589_v4 = vpack.c.bf16 %v177_v62, %v176_v61  ;;  %v4665_v61 = vpack.c.bf16 %v189_v56, %v188_v55  ;;  %v4268_v62 = vld [vmem:[%s5024_s1 + $0xb8] sm:$0xff]   ;;  %v4275_v55 = vld [vmem:[%s5024_s1 + $0x1f0] sm:$0xff]   ;;  %v4738_v56 = vpack.c.bf16 %v203_v48, %v202_v47 }
  0x49   : > { %3795 = vmatprep.subr.bf16.mxu0 %v4249_v12  ;;  %v3213_v47 = vld [vmem:[%s4370_s10 + $0x91] sm:$0xff]  ;;  %v3214_v48 = vld [vmem:[%s4370_s10 + $0x99] sm:$0xff] }
  0x4c   : > { %3796 = vmatpush3.bf16.msra.mxu0 %v4249_v12  ;;  %v179_v12 = vld [vmem:[%s4370_s10 + $0x50] sm:$0xff] }
  0x4d   : > { %3797 = vmatprep.subr.bf16.mxu0 %v4251_v21 }
  0x4e   : > { %3542 = vmatmul.mubr.bf16.gmra.mrb[20].mxu1 %v4508_v22 }
  0x4f   : > { %3766 = vmatmul.mubr.bf16.gmra.mrb[4].mxu0 %v4510_v23  ;;  %3545 = vmatprep.mubr.bf16.mxu1 %v4512_v24 }
  0x50   : > { %3769 = vmatprep.mubr.bf16.mxu0 %v4514_v25  ;;  %3798 = vmatpush3.bf16.msra.mxu0 %v4251_v21  ;;  %v4613_v21 = vpack.c.bf16 %v179_v12, %v178_v6  ;;  %v192_v6 = vld [vmem:[%s4370_s10 + $0xf0] sm:$0xff]  ;;  %v193_v12 = vld [vmem:[%s4370_s10 + $0xf8] sm:$0xff] }
  0x51   : > { %3799 = vmatprep.subr.bf16.mxu0 %v4253_v27 }
  0x54   : > { %3800 = vmatpush3.bf16.msra.mxu0 %v4253_v27  ;;  %v4619_v27 = vpack.c.bf16 %v3150_v20, %v3149_v18  ;;  %v195_v18 = vld [vmem:[%s4370_s10 + $0x110] sm:$0xff]  ;;  %v197_v20 = vld [vmem:[%s4370_s10 + $0x128] sm:$0xff] }
  0x55   : > { %3801 = vmatprep.subr.bf16.mxu0 %v4255_v35 }
  0x56   : > { %3546 = vmatmul.mubr.bf16.gmra.mrb[24].mxu1 %v4534_v36 }
  0x57   : > { %3770 = vmatmul.mubr.bf16.gmra.mrb[8].mxu0 %v4536_v37  ;;  %3549 = vmatprep.mubr.bf16.mxu1 %v4538_v38 }
  0x58   : > { %3773 = vmatprep.mubr.bf16.mxu0 %v4540_v39  ;;  %3802 = vmatpush3.bf16.msra.mxu0 %v4255_v35  ;;  %v3153_v35 = vld [vmem:[%s4370_s10 + $0x16a] sm:$0xff] }
  0x59   : > { %3803 = vmatprep.subr.bf16.mxu0 %v4257_v42  ;;  %v4645_v45 = vpack.c.bf16 %v3154_v40, %v3153_v35  ;;  %v4271_v35 = vld [vmem:[%s5024_s1 + $0x1e0] sm:$0xff]   ;;  %v4720_v40 = vpack.c.bf16 %v199_v32, %v198_v31  ;;  %v3210_v32 = vld [vmem:[%s4370_s10 + $0x69] sm:$0xff] }
  0x5a   : > { %v3209_v31 = vld [vmem:[%s4370_s10 + $0x61] sm:$0xff] }
  0x5c   : > { %3804 = vmatpush3.bf16.msra.mxu0 %v4257_v42  ;;  %v4639_v42 = vpack.c.bf16 %v183_v29, %v182_v28  ;;  %v4267_v28 = vld [vmem:[%s5024_s1 + $0x1d0] sm:$0xff]   ;;  %v4702_v29 = vpack.c.bf16 %v195_v18, %v194_v17  ;;  %v3206_v18 = vld [vmem:[%s4370_s10 + $0x39] sm:$0xff] }
  0x5d   : > { %3805 = vmatprep.subr.bf16.mxu0 %v4259_v50  ;;  %v3205_v17 = vld [vmem:[%s4370_s10 + $0x31] sm:$0xff] }
  0x5e   : > { %3550 = vmatmul.mubr.bf16.gmra.mrb[28].mxu1 %v4560_v51 }
  0x5f   : > { %3774 = vmatmul.mubr.bf16.gmra.mrb[12].mxu0 %v4562_v52  ;;  %3569 = vmatprep.mubr.bf16.mxu1 %v204_v53  ;;  %v3156_v53 = vld [vmem:[%s4370_s10 + $0x18a] sm:$0xff] }
  0x60   : > { %3777 = vmatprep.mubr.bf16.mxu0 %v4564_v54  ;;  %3806 = vmatpush3.bf16.msra.mxu0 %v4259_v50  ;;  %v3155_v50 = vld [vmem:[%s4370_s10 + $0x182] sm:$0xff] }
  0x61   : > { %3807 = vmatprep.subr.bf16.mxu0 %v4261_v57  ;;  %v1681_v60 = vpack.c.bf16 %v3156_v53, %v3155_v50  ;;  %v718_v50 = vld [vmem:[%s4370_s10 + $0x2] sm:$0xff]  ;;  %v719_v53 = vld [vmem:[%s4370_s10 + $0xa] sm:$0xff] }
  0x64   : > { %3808 = vmatpush3.bf16.msra.mxu0 %v4261_v57  ;;  %v4266_v57 = vld [vmem:[%s5024_s1 + $0xb0] sm:$0xff]  }
  0x65   : > { %3841 = vmatprep.subr.bf16.mxu0 %v4583_v1 }
  0x66   : > { %3570 = vmatmul.mubr.bf16.vlgmr.msra.gmra.mrb[0].mxu1 %v4585_v2 }
  0x67   : > { %3778 = vmatmul.mubr.bf16.gmra.mrb[16].mxu0 %v4587_v3  ;;  %3602 = vmatpush3.bf16.msra.mxu1 %v4481_v8  ;;  %v4615_v8 = vpack.c.bf16 %v3148_v15, %v3147_v14  ;;  %v4682_v14 = vpack.c.bf16 %v191_v0, %v190_v63  ;;  %v4684_v15 = vpack.c.bf16 %v193_v12, %v192_v6  ;;  %v4272_v63 = vld [vmem:[%s5024_s1 + $0xc8] sm:$0xff]   ;;  %v4274_v0 = vld [vmem:[%s5024_s1 + $0xd0] sm:$0xff]   ;;  %v4278_v12 = vld [vmem:[%s5024_s1 + $0xe0] sm:$0xff]  }
  0x68   : > { %3573 = vmatprep.mubr.bf16.mxu1 %v4589_v4  ;;  %3781 = vmatprep.mubr.bf16.mxu0 %v4591_v5  ;;  %v3194_v6 = vld [vmem:[%s4370_s10 + $0x188] sm:$0xff] }
  0x69   : > { %3603 = vmatprep.subr.bf16.mxu1 %v4256_v13 }
  0x6b   : > { %3604 = vmatpush3.bf16.msra.mxu1 %v4256_v13  ;;  %v4680_v13 = vld [vmem:[%s5024_s1 + $0xc0] sm:$0xff]  }
  0x6c   : > { %3605 = vmatprep.subr.bf16.mxu1 %v4258_v19 }
  0x6e   : > { %3574 = vmatmul.mubr.bf16.gmra.mrb[4].mxu1 %v4613_v21 }
  0x6f   : > { %3782 = vmatmul.mubr.bf16.gmra.mrb[20].mxu0 %v4615_v8  ;;  %3577 = vmatprep.mubr.bf16.mxu1 %v4617_v26 }
  0x70   : > { %3785 = vmatprep.mubr.bf16.mxu0 %v4619_v27  ;;  %3606 = vmatpush3.bf16.msra.mxu1 %v4258_v19  ;;  %v196_v19 = vld [vmem:[%s4370_s10 + $0x120] sm:$0xff] }
  0x71   : > { %3607 = vmatprep.subr.bf16.mxu1 %v4260_v30 }
  0x74   : > { %3608 = vmatpush3.bf16.msra.mxu1 %v4260_v30  ;;  %v4704_v30 = vpack.c.bf16 %v197_v20, %v196_v19  ;;  %v2277_v20 = vpack.c.bf16 %v3206_v18, %v3205_v17  ;;  %v3257_v17 = vld [vmem:[%s4370_s10 + $0xc2] sm:$0xff]  ;;  %v3258_v18 = vld [vmem:[%s4370_s10 + $0xca] sm:$0xff] }
  0x75   : > { %3609 = vmatprep.subr.bf16.mxu1 %v4262_v41 }
  0x76   : > { %3578 = vmatmul.mubr.bf16.gmra.mrb[8].mxu1 %v4639_v42 }
  0x77   : > { %3786 = vmatmul.mubr.bf16.gmra.mrb[24].mxu0 %v4641_v43  ;;  %3581 = vmatprep.mubr.bf16.mxu1 %v4643_v44 }
  0x78   : > { %3789 = vmatprep.mubr.bf16.mxu0 %v4645_v45  ;;  %3610 = vmatpush3.bf16.msra.mxu1 %v4262_v41  ;;  %v4722_v41 = vpack.c.bf16 %v201_v34, %v200_v33  ;;  %v2279_v34 = vpack.c.bf16 %v3210_v32, %v3209_v31 }
  0x79   : > { %3611 = vmatprep.subr.bf16.mxu1 %v4264_v46 }
  0x7c   : > { %3612 = vmatpush3.bf16.msra.mxu1 %v4264_v46  ;;  %v4273_v46 = vld [vmem:[%s5024_s1 + $0x1e8] sm:$0xff]  }
  0x7d   : > { %3613 = vmatprep.subr.bf16.mxu1 %v4266_v57 }
  0x7e   : > { %3582 = vmatmul.mubr.bf16.gmra.mrb[12].mxu1 %v4663_v58 }
  0x7f   : > { %3790 = vmatmul.mubr.bf16.gmra.mrb[28].mxu0 %v1681_v60  ;;  %3585 = vmatprep.mubr.bf16.mxu1 %v4665_v61  ;;  %v4277_v60 = vld [vmem:[%s5024_s1 + $0x1f8] sm:$0xff]  }
  0x80   : > { %3809 = vmatprep.mubr.bf16.mxu0 %v4589_v4  ;;  %3614 = vmatpush3.bf16.msra.mxu1 %v4266_v57  ;;  %v750_v57 = vpack.c.bf16 %v719_v53, %v718_v50  ;;  %v4283_v50 = vld [vmem:[%s5024_s1 + $0x210] sm:$0xff]  }
  0x81   : > { %3615 = vmatprep.subr.bf16.mxu1 %v4268_v62 }
  0x84   : > { %3616 = vmatpush3.bf16.msra.mxu1 %v4268_v62  ;;  %v4279_v62 = vld [vmem:[%s5024_s1 + $0x200] sm:$0xff]  }
  0x85   : > { %3649 = vmatprep.subr.bf16.mxu1 %v4680_v13 }
  0x86   : > { %3586 = vmatmul.mubr.bf16.gmra.mrb[16].mxu1 %v4682_v14 }
  0x87   : > { %3810 = vmatmul.mubr.bf16.vlgmr.msra.gmra.mrb[0].mxu0 %v4613_v21  ;;  %3589 = vmatprep.mubr.bf16.mxu1 %v4684_v15 }
  0x88   : > { %3842 = vmatpush3.bf16.msra.mxu0 %v4583_v1  ;;  %3813 = vmatprep.mubr.bf16.mxu0 %v4617_v26  ;;  %v4269_v1 = vld [vmem:[%s5024_s1 + $0x1d8] sm:$0xff]  }
  0x89   : > { %3843 = vmatprep.subr.bf16.mxu0 %v4265_v16 }
  0x8c   : > { %3844 = vmatpush3.bf16.msra.mxu0 %v4265_v16  ;;  %v3196_v16 = vld [vmem:[%s4370_s10 + $0x1a0] sm:$0xff] }
  0x8d   : > { %3845 = vmatprep.subr.bf16.mxu0 %v4267_v28 }
  0x8e   : > { %3590 = vmatmul.mubr.bf16.gmra.mrb[20].mxu1 %v4702_v29 }
  0x8f   : > { %3814 = vmatmul.mubr.bf16.gmra.mrb[4].mxu0 %v4639_v42  ;;  %3593 = vmatprep.mubr.bf16.mxu1 %v4704_v30 }
  0x90   : > { %3817 = vmatprep.mubr.bf16.mxu0 %v4643_v44  ;;  %3846 = vmatpush3.bf16.msra.mxu0 %v4267_v28  ;;  %v3207_v28 = vld [vmem:[%s4370_s10 + $0x49] sm:$0xff] }
  0x91   : > { %3847 = vmatprep.subr.bf16.mxu0 %v4269_v1 }
  0x94   : > { %3848 = vmatpush3.bf16.msra.mxu0 %v4269_v1  ;;  %v3208_v1 = vld [vmem:[%s4370_s10 + $0x51] sm:$0xff] }
  0x95   : > { %3849 = vmatprep.subr.bf16.mxu0 %v4271_v35  ;;  %v2278_v33 = vpack.c.bf16 %v3208_v1, %v3207_v28  ;;  %v3261_v28 = vld [vmem:[%s4370_s10 + $0xf2] sm:$0xff]  ;;  %v3262_v1 = vld [vmem:[%s4370_s10 + $0xfa] sm:$0xff] }
  0x96   : > { %3594 = vmatmul.mubr.bf16.gmra.mrb[24].mxu1 %v4720_v40  ;;  %v2590_v32 = vpack.c.bf16 %v3262_v1, %v3261_v28 }
  0x97   : > { %3818 = vmatmul.mubr.bf16.gmra.mrb[8].mxu0 %v4663_v58  ;;  %3597 = vmatprep.mubr.bf16.mxu1 %v4722_v41 }
  0x98   : > { %3821 = vmatprep.mubr.bf16.mxu0 %v4665_v61  ;;  %3850 = vmatpush3.bf16.msra.mxu0 %v4271_v35  ;;  %v3211_v35 = vld [vmem:[%s4370_s10 + $0x79] sm:$0xff] }
  0x99   : > { %3851 = vmatprep.subr.bf16.mxu0 %v4273_v46 }
  0x9c   : > { %3852 = vmatpush3.bf16.msra.mxu0 %v4273_v46  ;;  %v3212_v46 = vld [vmem:[%s4370_s10 + $0x81] sm:$0xff] }
  0x9d   : > { %3853 = vmatprep.subr.bf16.mxu0 %v4275_v55  ;;  %v2280_v53 = vpack.c.bf16 %v3212_v46, %v3211_v35  ;;  %v3106_v35 = vld [vmem:[%s4370_s10 + $0x111] sm:$0xff]  ;;  %v3265_v46 = vld [vmem:[%s4370_s10 + $0x122] sm:$0xff] }
  0x9e   : > { %3598 = vmatmul.mubr.bf16.gmra.mrb[28].mxu1 %v4738_v56 }
  0x9f   : > { %3822 = vmatmul.mubr.bf16.gmra.mrb[12].mxu0 %v4682_v14  ;;  %3617 = vmatprep.mubr.bf16.mxu1 %v750_v57  ;;  %v3218_v57 = vld [vmem:[%s4370_s10 + $0xc9] sm:$0xff] }
  0xa0   : > { %3825 = vmatprep.mubr.bf16.mxu0 %v4684_v15  ;;  %3854 = vmatpush3.bf16.msra.mxu0 %v4275_v55  ;;  %v2281_v55 = vpack.c.bf16 %v3214_v48, %v3213_v47  ;;  %v3266_v47 = vld [vmem:[%s4370_s10 + $0x12a] sm:$0xff] }
  0xa1   : > { %3855 = vmatprep.subr.bf16.mxu0 %v4277_v60 }
  0xa4   : > { %3856 = vmatpush3.bf16.msra.mxu0 %v4277_v60  ;;  %v4286_v60 = vld [vmem:[%s5024_s1 + $0x220] sm:$0xff]  }
  0xa5   : > { %3889 = vmatprep.subr.bf16.mxu0 %v4279_v62 }
  0xa6   : > { %3618 = vmatmul.mubr.bf16.vlgmr.msra.gmra.mrb[0].mxu1 %v4455_v59  ;;  %v4276_v59 = vld [vmem:[%s5024_s1 + $0xd8] sm:$0xff]  }
  0xa7   : > { %3826 = vmatmul.mubr.bf16.gmra.mrb[16].mxu0 %v4702_v29  ;;  %3650 = vmatpush3.bf16.msra.mxu1 %v4680_v13 }
  0xa8   : > { %3621 = vmatprep.mubr.bf16.mxu1 %v4483_v9  ;;  %3829 = vmatprep.mubr.bf16.mxu0 %v4704_v30  ;;  %v3193_v9 = vld [vmem:[%s4370_s10 + $0x180] sm:$0xff] }
  0xa9   : > { %3651 = vmatprep.subr.bf16.mxu1 %v4272_v63  ;;  %v4772_v13 = vpack.c.bf16 %v3194_v6, %v3193_v9  ;;  %v3252_v6 = vld [vmem:[%s4370_s10 + $0x82] sm:$0xff] }
  0xab   : > { %3652 = vmatpush3.bf16.msra.mxu1 %v4272_v63  ;;  %v4287_v63 = vld [vmem:[%s5024_s1 + $0x228] sm:$0xff]  }
  0xac   : > { %3653 = vmatprep.subr.bf16.mxu1 %v4274_v0 }
  0xae   : > { %3622 = vmatmul.mubr.bf16.gmra.mrb[4].mxu1 %v4487_v11  ;;  %v4280_v11 = vld [vmem:[%s5024_s1 + $0xe8] sm:$0xff]  }
  0xaf   : > { %3830 = vmatmul.mubr.bf16.gmra.mrb[20].mxu0 %v4720_v40  ;;  %3625 = vmatprep.mubr.bf16.mxu1 %v4510_v23  ;;  %v3195_v23 = vld [vmem:[%s4370_s10 + $0x198] sm:$0xff] }
  0xb0   : > { %3833 = vmatprep.mubr.bf16.mxu0 %v4722_v41  ;;  %3654 = vmatpush3.bf16.msra.mxu1 %v4274_v0  ;;  %v1987_v19 = vpack.c.bf16 %v3196_v16, %v3195_v23  ;;  %v3250_v0 = vld [vmem:[%s4370_s10 + $0x6a] sm:$0xff] }
  0xb1   : > { %3655 = vmatprep.subr.bf16.mxu1 %v4276_v59 }
  0xb4   : > { %3656 = vmatpush3.bf16.msra.mxu1 %v4276_v59  ;;  %v4297_v59 = vld [vmem:[%s5024_s1 + $0x138] sm:$0xff]  }
  0xb5   : > { %3657 = vmatprep.subr.bf16.mxu1 %v4278_v12 }
  0xb6   : > { %3626 = vmatmul.mubr.bf16.gmra.mrb[8].mxu1 %v4514_v25  ;;  %v4282_v25 = vld [vmem:[%s5024_s1 + $0xf0] sm:$0xff]  }
  0xb7   : > { %3834 = vmatmul.mubr.bf16.gmra.mrb[24].mxu0 %v4738_v56  ;;  %3629 = vmatprep.mubr.bf16.mxu1 %v4536_v37  ;;  %v4284_v37 = vld [vmem:[%s5024_s1 + $0xf8] sm:$0xff]  }
  0xb8   : > { %3837 = vmatprep.mubr.bf16.mxu0 %v4772_v13  ;;  %3658 = vmatpush3.bf16.msra.mxu1 %v4278_v12  ;;  %v3253_v12 = vld [vmem:[%s4370_s10 + $0x92] sm:$0xff] }
  0xb9   : > { %3659 = vmatprep.subr.bf16.mxu1 %v4280_v11 }
  0xbc   : > { %3660 = vmatpush3.bf16.msra.mxu1 %v4280_v11  ;;  %v3254_v11 = vld [vmem:[%s4370_s10 + $0x9a] sm:$0xff] }
  0xbd   : > { %3661 = vmatprep.subr.bf16.mxu1 %v4282_v25  ;;  %v2586_v16 = vpack.c.bf16 %v3254_v11, %v3253_v12 }
  0xbe   : > { %3630 = vmatmul.mubr.bf16.gmra.mrb[12].mxu1 %v4540_v39  ;;  %v4281_v39 = vld [vmem:[%s5024_s1 + $0x208] sm:$0xff]  }
  0xbf   : > { %3838 = vmatmul.mubr.bf16.gmra.mrb[28].mxu0 %v1987_v19  ;;  %3633 = vmatprep.mubr.bf16.mxu1 %v4562_v52  ;;  %v4290_v52 = vld [vmem:[%s5024_s1 + $0x100] sm:$0xff]   ;;  %v2588_v19 = vpack.c.bf16 %v3258_v18, %v3257_v17 }
  0xc0   : > { %3857 = vmatprep.mubr.bf16.mxu0 %v2277_v20  ;;  %3662 = vmatpush3.bf16.msra.mxu1 %v4282_v25  ;;  %v3101_v20 = vld [vmem:[%s4370_s10 + $0xd9] sm:$0xff] }
  0xc1   : > { %3663 = vmatprep.subr.bf16.mxu1 %v4284_v37 }
  0xc4   : > { %3664 = vmatpush3.bf16.msra.mxu1 %v4284_v37  ;;  %v3102_v37 = vld [vmem:[%s4370_s10 + $0xe1] sm:$0xff] }
  0xc5   : > { %3937 = vmatprep.subr.bf16.mxu1 %v4290_v52 }
  0xc6   : > { %3634 = vmatmul.mubr.bf16.gmra.mrb[16].mxu1 %v4564_v54  ;;  %v4285_v54 = vld [vmem:[%s5024_s1 + $0x218] sm:$0xff]  }
  0xc7   : > { %3858 = vmatmul.mubr.bf16.vlgmr.msra.gmra.mrb[0].mxu0 %v2278_v33  ;;  %3637 = vmatprep.mubr.bf16.mxu1 %v4587_v3  ;;  %v3217_v3 = vld [vmem:[%s4370_s10 + $0xc1] sm:$0xff]  ;;  %v3104_v33 = vld [vmem:[%s4370_s10 + $0xf9] sm:$0xff] }
  0xc8   : > { %3890 = vmatpush3.bf16.msra.mxu0 %v4279_v62  ;;  %3861 = vmatprep.mubr.bf16.mxu0 %v2279_v34  ;;  %v2283_v62 = vpack.c.bf16 %v3218_v57, %v3217_v3  ;;  %v3263_v34 = vld [vmem:[%s4370_s10 + $0x10a] sm:$0xff]  ;;  %v3267_v3 = vld [vmem:[%s4370_s10 + $0x13a] sm:$0xff]  ;;  %v3268_v57 = vld [vmem:[%s4370_s10 + $0x142] sm:$0xff] }
  0xc9   : > { %3891 = vmatprep.subr.bf16.mxu0 %v4281_v39 }
  0xcc   : > { %3892 = vmatpush3.bf16.msra.mxu0 %v4281_v39  ;;  %v3264_v39 = vld [vmem:[%s4370_s10 + $0x112] sm:$0xff] }
  0xcd   : > { %3893 = vmatprep.subr.bf16.mxu0 %v4283_v50  ;;  %v2591_v48 = vpack.c.bf16 %v3264_v39, %v3263_v34 }
  0xce   : > { %3638 = vmatmul.mubr.bf16.gmra.mrb[20].mxu1 %v4591_v5  ;;  %v4288_v5 = vld [vmem:[%s5024_s1 + $0x230] sm:$0xff]  }
  0xcf   : > { %3862 = vmatmul.mubr.bf16.gmra.mrb[4].mxu0 %v2280_v53  ;;  %3641 = vmatprep.mubr.bf16.mxu1 %v4615_v8  ;;  %v4289_v8 = vld [vmem:[%s5024_s1 + $0x238] sm:$0xff]   ;;  %v2592_v53 = vpack.c.bf16 %v3266_v47, %v3265_v46 }
  0xd0   : > { %3865 = vmatprep.mubr.bf16.mxu0 %v2281_v55  ;;  %3894 = vmatpush3.bf16.msra.mxu0 %v4283_v50  ;;  %v3107_v55 = vld [vmem:[%s4370_s10 + $0x121] sm:$0xff] }
  0xd1   : > { %3895 = vmatprep.subr.bf16.mxu0 %v4285_v54 }
  0xd4   : > { %3896 = vmatpush3.bf16.msra.mxu0 %v4285_v54  ;;  %v3108_v54 = vld [vmem:[%s4370_s10 + $0x129] sm:$0xff] }
  0xd5   : > { %3897 = vmatprep.subr.bf16.mxu0 %v4286_v60 }
  0xd6   : > { %3642 = vmatmul.mubr.bf16.gmra.mrb[24].mxu1 %v4619_v27  ;;  %v4295_v27 = vld [vmem:[%s5024_s1 + $0x128] sm:$0xff]  }
  0xd7   : > { %3866 = vmatmul.mubr.bf16.gmra.mrb[8].mxu0 %v4436_v49  ;;  %3645 = vmatprep.mubr.bf16.mxu1 %v4641_v43  ;;  %v4291_v49 = vld [vmem:[%s5024_s1 + $0x108] sm:$0xff]   ;;  %v4296_v43 = vld [vmem:[%s5024_s1 + $0x130] sm:$0xff]  }
  0xd8   : > { %3869 = vmatprep.mubr.bf16.mxu0 %v2283_v62  ;;  %3898 = vmatpush3.bf16.msra.mxu0 %v4286_v60  ;;  %v3109_v60 = vld [vmem:[%s4370_s10 + $0x139] sm:$0xff]  ;;  %v3110_v62 = vld [vmem:[%s4370_s10 + $0x141] sm:$0xff] }
  0xd9   : > { %3899 = vmatprep.subr.bf16.mxu0 %v4287_v63 }
  0xdc   : > { %3900 = vmatpush3.bf16.msra.mxu0 %v4287_v63  ;;  %v3269_v63 = vld [vmem:[%s4370_s10 + $0x152] sm:$0xff] }
  0xdd   : > { %3901 = vmatprep.subr.bf16.mxu0 %v4288_v5 }
  0xde   : > { %3646 = vmatmul.mubr.bf16.gmra.mrb[28].mxu1 %v4645_v45  ;;  %v3248_v45 = vld [vmem:[%s4370_s10 + $0x52] sm:$0xff] }
  0xdf   : > { %3870 = vmatmul.mubr.bf16.gmra.mrb[12].mxu0 %v4476_v7  ;;  %3665 = vmatprep.mubr.bf16.mxu1 %v4585_v2  ;;  %v4292_v7 = vld [vmem:[%s5024_s1 + $0x110] sm:$0xff]  }
  0xe0   : > { %3873 = vmatprep.mubr.bf16.mxu0 %v4485_v10  ;;  %3902 = vmatpush3.bf16.msra.mxu0 %v4288_v5  ;;  %v3233_v10 = vld [vmem:[%s4370_s10 + $0x181] sm:$0xff] }
  0xe1   : > { %3903 = vmatprep.subr.bf16.mxu0 %v4289_v8  ;;  %v3270_v5 = vld [vmem:[%s4370_s10 + $0x15a] sm:$0xff] }
  0xe4   : > { %3904 = vmatpush3.bf16.msra.mxu0 %v4289_v8  ;;  %v1372_v8 = vpack.c.bf16 %v3108_v54, %v3107_v55 }
  0xe6   : > { %3666 = vmatmul.mubr.bf16.vlgmr.msra.gmra.mrb[0].mxu1 %v4589_v4  ;;  %v3236_v4 = vld [vmem:[%s4370_s10 + $0x1a1] sm:$0xff] }
  0xe7   : > { %3874 = vmatmul.mubr.bf16.gmra.mrb[16].mxu0 %v4508_v22  ;;  %3945 = vmatpush3.bf16.msra.mxu1 %v4290_v52  ;;  %v3234_v22 = vld [vmem:[%s4370_s10 + $0x189] sm:$0xff] }
  0xe8   : > { %3669 = vmatprep.mubr.bf16.mxu1 %v4613_v21  ;;  %3877 = vmatprep.mubr.bf16.mxu0 %v4512_v24  ;;  %v4293_v24 = vld [vmem:[%s5024_s1 + $0x118] sm:$0xff]   ;;  %v4857_v2 = vpack.c.bf16 %v3234_v22, %v3233_v10  ;;  %v3105_v52 = vld [vmem:[%s4370_s10 + $0x109] sm:$0xff]  ;;  %v2594_v10 = vpack.c.bf16 %v3270_v5, %v3269_v63 }
  0xe9   : > { %3938 = vmatprep.subr.bf16.mxu1 %v4291_v49  ;;  %v3245_v21 = vld [vmem:[%s4370_s10 + $0x32] sm:$0xff]  ;;  %v1371_v50 = vpack.c.bf16 %v3106_v35, %v3105_v52 }
  0xea   : > { %v3111_v22 = vld [vmem:[%s4370_s10 + $0x151] sm:$0xff] }
  0xeb   : > { %3946 = vmatpush3.bf16.msra.mxu1 %v4291_v49  ;;  %v2593_v49 = vpack.c.bf16 %v3268_v57, %v3267_v3 }
  0xec   : > { %3939 = vmatprep.subr.bf16.mxu1 %v4292_v7 }
  0xee   : > { %3670 = vmatmul.mubr.bf16.gmra.mrb[4].mxu1 %v4617_v26  ;;  %v3246_v26 = vld [vmem:[%s4370_s10 + $0x3a] sm:$0xff] }
  0xef   : > { %3878 = vmatmul.mubr.bf16.gmra.mrb[20].mxu0 %v4534_v36  ;;  %3673 = vmatprep.mubr.bf16.mxu1 %v4639_v42  ;;  %v4294_v36 = vld [vmem:[%s5024_s1 + $0x120] sm:$0xff]  }
  0xf0   : > { %3881 = vmatprep.mubr.bf16.mxu0 %v4538_v38  ;;  %3947 = vmatpush3.bf16.msra.mxu1 %v4292_v7  ;;  %v3235_v38 = vld [vmem:[%s4370_s10 + $0x199] sm:$0xff]  ;;  %v1373_v7 = vpack.c.bf16 %v3110_v62, %v3109_v60 }
  0xf1   : > { %3940 = vmatprep.subr.bf16.mxu1 %v4293_v24  ;;  %v2292_v42 = vpack.c.bf16 %v3236_v4, %v3235_v38  ;;  %v3272_v38 = vld [vmem:[%s4370_s10 + $0x172] sm:$0xff]  ;;  %v3113_v4 = vld [vmem:[%s4370_s10 + $0x169] sm:$0xff] }
  0xf4   : > { %3948 = vmatpush3.bf16.msra.mxu1 %v4293_v24  ;;  %v3112_v24 = vld [vmem:[%s4370_s10 + $0x159] sm:$0xff] }
  0xf5   : > { %3941 = vmatprep.subr.bf16.mxu1 %v4294_v36 }
  0xf6   : > { %3674 = vmatmul.mubr.bf16.gmra.mrb[8].mxu1 %v4643_v44  ;;  %v3247_v44 = vld [vmem:[%s4370_s10 + $0x4a] sm:$0xff] }
  0xf7   : > { %3882 = vmatmul.mubr.bf16.gmra.mrb[24].mxu0 %v4560_v51  ;;  %3677 = vmatprep.mubr.bf16.mxu1 %v4663_v58  ;;  %v2582_v51 = vpack.c.bf16 %v3246_v26, %v3245_v21  ;;  %v3249_v58 = vld [vmem:[%s4370_s10 + $0x62] sm:$0xff]  ;;  %v2583_v9 = vpack.c.bf16 %v3248_v45, %v3247_v44  ;;  %v3114_v21 = vld [vmem:[%s4370_s10 + $0x171] sm:$0xff]  ;;  %v3275_v45 = vld [vmem:[%s4370_s10 + $0x19a] sm:$0xff] }
  0xf8   : > { %3885 = vmatprep.mubr.bf16.mxu0 %v4857_v2  ;;  %3949 = vmatpush3.bf16.msra.mxu1 %v4294_v36  ;;  %v3271_v36 = vld [vmem:[%s4370_s10 + $0x16a] sm:$0xff]  ;;  %v3273_v26 = vld [vmem:[%s4370_s10 + $0x182] sm:$0xff] }
  0xf9   : > { %3942 = vmatprep.subr.bf16.mxu1 %v4295_v27 }
  0xfc   : > { %3950 = vmatpush3.bf16.msra.mxu1 %v4295_v27  ;;  %v3274_v27 = vld [vmem:[%s4370_s10 + $0x18a] sm:$0xff] }
  0xfd   : > { %3943 = vmatprep.subr.bf16.mxu1 %v4296_v43  ;;  %v2596_v44 = vpack.c.bf16 %v3274_v27, %v3273_v26 }
  0xfe   : > { %3678 = vmatmul.mubr.bf16.gmra.mrb[12].mxu1 %v4665_v61  ;;  %v2584_v61 = vpack.c.bf16 %v3250_v0, %v3249_v58  ;;  %v3276_v58 = vld [vmem:[%s4370_s10 + $0x1a2] sm:$0xff] }
  0xff   : > { %3886 = vmatmul.mubr.bf16.gmra.mrb[28].mxu0 %v2292_v42  ;;  %3681 = vmatprep.mubr.bf16.mxu1 %v4682_v14  ;;  %v3251_v14 = vld [vmem:[%s4370_s10 + $0x7a] sm:$0xff]  ;;  %v1374_v42 = vpack.c.bf16 %v3112_v24, %v3111_v22  ;;  %v2597_v0 = vpack.c.bf16 %v3276_v58, %v3275_v45 }
 0x100   : > { %3905 = vmatprep.mubr.bf16.mxu0 %v2582_v51  ;;  %3951 = vmatpush3.bf16.msra.mxu1 %v4296_v43  ;;  %v2585_v23 = vpack.c.bf16 %v3252_v6, %v3251_v14  ;;  %v2595_v51 = vpack.c.bf16 %v3272_v38, %v3271_v36  ;;  %v1375_v43 = vpack.c.bf16 %v3114_v21, %v3113_v4 }
 0x101   : > { %3944 = vmatprep.subr.bf16.mxu1 %v4297_v59 }
 0x104   : > { %3952 = vmatpush3.bf16.msra.mxu1 %v4297_v59 }
 0x106   : > { %3682 = vmatmul.mubr.bf16.gmra.mrb[16].mxu1 %v4684_v15  ;;  %v3255_v15 = vld [vmem:[%s4370_s10 + $0xaa] sm:$0xff] }
 0x107   : > { %3906 = vmatmul.mubr.bf16.vlgmr.msra.gmra.mrb[0].mxu0 %v2583_v9  ;;  %3685 = vmatprep.mubr.bf16.mxu1 %v4702_v29  ;;  %v3256_v29 = vld [vmem:[%s4370_s10 + $0xb2] sm:$0xff] }
 0x108   : > { %3909 = vmatprep.mubr.bf16.mxu0 %v2584_v61  ;;  %v2587_v25 = vpack.c.bf16 %v3256_v29, %v3255_v15 }
 0x10e   : > { %3686 = vmatmul.mubr.bf16.gmra.mrb[20].mxu1 %v4704_v30  ;;  %v3259_v30 = vld [vmem:[%s4370_s10 + $0xda] sm:$0xff] }
 0x10f   : > { %3910 = vmatmul.mubr.bf16.gmra.mrb[4].mxu0 %v2585_v23  ;;  %3689 = vmatprep.mubr.bf16.mxu1 %v4720_v40  ;;  %v3260_v40 = vld [vmem:[%s4370_s10 + $0xe2] sm:$0xff] }
 0x110   : > { %3913 = vmatprep.mubr.bf16.mxu0 %v2586_v16  ;;  %v2589_v31 = vpack.c.bf16 %v3260_v40, %v3259_v30  ;;  %v4944_v40 = vld [vmem:[%s5025_s2] ss:$0 sm:$0xff] }
 0x116   : > { %3690 = vmatmul.mubr.bf16.gmra.mrb[24].mxu1 %v4722_v41  ;;  %v1369_v41 = vpack.c.bf16 %v3102_v37, %v3101_v20 }
 0x117   : > { %3914 = vmatmul.mubr.bf16.gmra.mrb[8].mxu0 %v2587_v25  ;;  %3693 = vmatprep.mubr.bf16.mxu1 %v4738_v56  ;;  %v3103_v56 = vld [vmem:[%s4370_s10 + $0xf1] sm:$0xff] }
 0x118   : > { %3917 = vmatprep.mubr.bf16.mxu0 %v2588_v19 }
 0x11e   : > { %3694 = vmatmul.mubr.bf16.gmra.mrb[28].mxu1 %v4772_v13  ;;  %v1370_v13 = vpack.c.bf16 %v3104_v33, %v3103_v56 }
 0x11f   : > { %3918 = vmatmul.mubr.bf16.gmra.mrb[12].mxu0 %v2589_v31  ;;  %3729 = vmatprep.mubr.bf16.mxu1 %v1369_v41 }
 0x120   : > { %3921 = vmatprep.mubr.bf16.mxu0 %v2590_v32 }
 0x126   : > { %3730 = vmatmul.mubr.bf16.vlgmr.msra.gmra.mrb[16].mxu1 %v1370_v13 }
 0x127   : > { %3922 = vmatmul.mubr.bf16.gmra.mrb[16].mxu0 %v2591_v48  ;;  %3733 = vmatprep.mubr.bf16.mxu1 %v1371_v50 }
 0x128   : > { %3925 = vmatprep.mubr.bf16.mxu0 %v2592_v53 }
 0x12e   : > { %3734 = vmatmul.mubr.bf16.gmra.mrb[20].mxu1 %v1372_v8 }
 0x12f   : > { %3926 = vmatmul.mubr.bf16.gmra.mrb[20].mxu0 %v2593_v49  ;;  %3737 = vmatprep.mubr.bf16.mxu1 %v1373_v7 }
 0x130   : > { %3929 = vmatprep.mubr.bf16.mxu0 %v2594_v10 }
 0x136   : > { %3738 = vmatmul.mubr.bf16.gmra.mrb[24].mxu1 %v1374_v42 }
 0x137   : > { %3930 = vmatmul.mubr.bf16.gmra.mrb[24].mxu0 %v2595_v51  ;;  %3741 = vmatprep.mubr.bf16.mxu1 %v1375_v43 }
 0x138   : > { %3933 = vmatprep.mubr.bf16.mxu0 %v2596_v44 }
 0x13e   : > { %3742 = vmatmul.mubr.bf16.gmra.mrb[28].mxu1 %v4857_v2 }
 0x13f   : > { %3934 = vmatmul.mubr.bf16.gmra.mrb[28].mxu0 %v2597_v0 }
 0x1b9   : > { %v3667_v59 = vpop.f32.mrb[0].mxu1 }
 0x1ba   : > { %v1170_v9 = vpop.f32.mrb[1].mxu1 }
 0x1bb   : > { %v3668_v61 = vpop.f32.mrb[2].mxu1 }
 0x1bc   : > { %v1173_v14 = vpop.f32.mrb[3].mxu1 }
 0x1c1   : > { %v3671_v6 = vpop.f32.mrb[4].mxu1 }
 0x1c2   : > { %v1186_v12 = vpop.f32.mrb[5].mxu1 }
 0x1c3   : > { %v3672_v11 = vpop.f32.mrb[6].mxu1 }
 0x1c4   : > { %v1189_v23 = vpop.f32.mrb[7].mxu1 }
 0x1c9   : > { %v3675_v16 = vpop.f32.mrb[8].mxu1 }
 0x1ca   : > { %v1202_v15 = vpop.f32.mrb[9].mxu1 }
 0x1cb   : > { %v3676_v29 = vpop.f32.mrb[10].mxu1 }
 0x1cc   : > { %v1205_v17 = vpop.f32.mrb[11].mxu1 }
 0x1d1   : > { %v4933_v18 = vpop.f32.mrb[12].mxu1 }
 0x1d2   : > { %v4935_v25 = vpop.f32.mrb[13].mxu1 }
 0x1d3   : > { %v4937_v19 = vpop.f32.mrb[14].mxu1 }
 0x1d4   : > { %v4939_v2 = vpop.f32.mrb[15].mxu1 }
 0x1da   : > { %v3907_v30 = vpop.f32.mrb[0].mxu0 }
 0x1db   : > { %v3953_v20 = vadd.f32 %v3907_v30, %v3667_v59  ;;  %v2696_v37 = vpop.f32.mrb[1].mxu0 }
 0x1dc   : > { %v3954_v28 = vadd.f32 %v2696_v37, %v1170_v9  ;;  %v3908_v1 = vpop.f32.mrb[2].mxu0 }
 0x1dd   : > { %v2864_v31 = vadd.f32 %v3953_v20, %v4944_v40  ;;  %v3955_v41 = vadd.f32 %v3908_v1, %v3668_v61  ;;  %v2699_v32 = vpop.f32.mrb[3].mxu0 }
 0x1de   : > { %v2862_v56 = vadd.f32 %v3954_v28, %v4944_v40  ;;  %v3956_v33 = vadd.f32 %v2699_v32, %v1173_v14 }
 0x1df   : > { %v2896_v34 = vmax.f32 %v2864_v31, 0.0  ;;  %v2865_v39 = vadd.f32 %v3955_v41, %v4944_v40 }
 0x1e0   : > { %v2894_v52 = vmax.f32 %v2862_v56, 0.0  ;;  %v2863_v35 = vadd.f32 %v3956_v33, %v4944_v40 }
 0x1e1   : > { %2928 = vst [vmem:[%s4951_s11 + $0x10] sm:$0xff] %v2896_v34  ;;  %v2897_v46 = vmax.f32 %v2865_v39, 0.0 }
 0x1e2   : > { %2926 = vst [vmem:[%s4951_s11] sm:$0xff] %v2894_v52  ;;  %v2895_v47 = vmax.f32 %v2863_v35, 0.0  ;;  %v3911_v13 = vpop.f32.mrb[4].mxu0 }
 0x1e3   : > { %2929 = vst [vmem:[%s4951_s11 + $0x18] sm:$0xff] %v2897_v46  ;;  %v3957_v48 = vadd.f32 %v3911_v13, %v3671_v6  ;;  %v2712_v50 = vpop.f32.mrb[5].mxu0 }
 0x1e4   : > { %2927 = vst [vmem:[%s4951_s11 + $0x8] sm:$0xff] %v2895_v47  ;;  %v3958_v53 = vadd.f32 %v2712_v50, %v1186_v12  ;;  %v3912_v55 = vpop.f32.mrb[6].mxu0 }
 0x1e5   : > { %v2868_v54 = vadd.f32 %v3957_v48, %v4944_v40  ;;  %v3959_v3 = vadd.f32 %v3912_v55, %v3672_v11  ;;  %v2715_v57 = vpop.f32.mrb[7].mxu0 }
 0x1e6   : > { %v2866_v60 = vadd.f32 %v3958_v53, %v4944_v40  ;;  %v3960_v62 = vadd.f32 %v2715_v57, %v1189_v23 }
 0x1e7   : > { %v2900_v63 = vmax.f32 %v2868_v54, 0.0  ;;  %v2869_v5 = vadd.f32 %v3959_v3, %v4944_v40 }
 0x1e8   : > { %v2898_v8 = vmax.f32 %v2866_v60, 0.0  ;;  %v2867_v49 = vadd.f32 %v3960_v62, %v4944_v40 }
 0x1e9   : > { %2932 = vst [vmem:[%s4951_s11 + $0x30] sm:$0xff] %v2900_v63  ;;  %v2901_v7 = vmax.f32 %v2869_v5, 0.0 }
 0x1ea   : > { %2930 = vst [vmem:[%s4951_s11 + $0x20] sm:$0xff] %v2898_v8  ;;  %v2899_v10 = vmax.f32 %v2867_v49, 0.0  ;;  %v3915_v22 = vpop.f32.mrb[8].mxu0 }
 0x1eb   : > { %2933 = vst [vmem:[%s4951_s11 + $0x38] sm:$0xff] %v2901_v7  ;;  %v3961_v24 = vadd.f32 %v3915_v22, %v3675_v16  ;;  %v2728_v36 = vpop.f32.mrb[9].mxu0 }
 0x1ec   : > { %2931 = vst [vmem:[%s4951_s11 + $0x28] sm:$0xff] %v2899_v10  ;;  %v3962_v38 = vadd.f32 %v2728_v36, %v1202_v15  ;;  %v3916_v4 = vpop.f32.mrb[10].mxu0 }
 0x1ed   : > { %v2872_v21 = vadd.f32 %v3961_v24, %v4944_v40  ;;  %v3963_v26 = vadd.f32 %v3916_v4, %v3676_v29  ;;  %v2731_v27 = vpop.f32.mrb[11].mxu0 }
 0x1ee   : > { %v2870_v42 = vadd.f32 %v3962_v38, %v4944_v40  ;;  %v3964_v51 = vadd.f32 %v2731_v27, %v1205_v17 }
 0x1ef   : > { %v2904_v43 = vmax.f32 %v2872_v21, 0.0  ;;  %v2873_v44 = vadd.f32 %v3963_v26, %v4944_v40 }
 0x1f0   : > { %v2902_v45 = vmax.f32 %v2870_v42, 0.0  ;;  %v2871_v58 = vadd.f32 %v3964_v51, %v4944_v40 }
 0x1f1   : > { %2936 = vst [vmem:[%s4951_s11 + $0x50] sm:$0xff] %v2904_v43  ;;  %v2905_v0 = vmax.f32 %v2873_v44, 0.0 }
 0x1f2   : > { %2934 = vst [vmem:[%s4951_s11 + $0x40] sm:$0xff] %v2902_v45  ;;  %v2903_v59 = vmax.f32 %v2871_v58, 0.0  ;;  %v3919_v9 = vpop.f32.mrb[12].mxu0 }
 0x1f3   : > { %2937 = vst [vmem:[%s4951_s11 + $0x58] sm:$0xff] %v2905_v0  ;;  %v3965_v61 = vadd.f32 %v3919_v9, %v4933_v18  ;;  %v2744_v14 = vpop.f32.mrb[13].mxu0 }
 0x1f4   : > { %2935 = vst [vmem:[%s4951_s11 + $0x48] sm:$0xff] %v2903_v59  ;;  %v3966_v6 = vadd.f32 %v2744_v14, %v4935_v25  ;;  %v3920_v12 = vpop.f32.mrb[14].mxu0 }
 0x1f5   : > { %v2876_v11 = vadd.f32 %v3965_v61, %v4944_v40  ;;  %v3967_v23 = vadd.f32 %v3920_v12, %v4937_v19  ;;  %v2747_v16 = vpop.f32.mrb[15].mxu0 }
 0x1f6   : > { %v2874_v15 = vadd.f32 %v3966_v6, %v4944_v40  ;;  %v3968_v29 = vadd.f32 %v2747_v16, %v4939_v2 }
 0x1f7   : > { %v2908_v17 = vmax.f32 %v2876_v11, 0.0  ;;  %v2877_v18 = vadd.f32 %v3967_v23, %v4944_v40 }
 0x1f8   : > { %v2906_v30 = vmax.f32 %v2874_v15, 0.0  ;;  %v2875_v20 = vadd.f32 %v3968_v29, %v4944_v40 }
 0x1f9   : > { %2940 = vst [vmem:[%s4951_s11 + $0x70] sm:$0xff] %v2908_v17  ;;  %v2909_v25 = vmax.f32 %v2877_v18, 0.0  ;;  %v3731_v37 = vpop.f32.mrb[16].mxu1 }
 0x1fa   : > { %2938 = vst [vmem:[%s4951_s11 + $0x60] sm:$0xff] %v2906_v30  ;;  %v2907_v28 = vmax.f32 %v2875_v20, 0.0  ;;  %v3923_v1 = vpop.f32.mrb[16].mxu0  ;;  %v1539_v31 = vpop.f32.mrb[17].mxu1 }
 0x1fb   : > { %2941 = vst [vmem:[%s4951_s11 + $0x78] sm:$0xff] %v2909_v25  ;;  %v3969_v19 = vadd.f32 %v3923_v1, %v3731_v37  ;;  %v2760_v41 = vpop.f32.mrb[17].mxu0  ;;  %v3732_v32 = vpop.f32.mrb[18].mxu1 }
 0x1fc   : > { %2939 = vst [vmem:[%s4951_s11 + $0x68] sm:$0xff] %v2907_v28  ;;  %v3970_v2 = vadd.f32 %v2760_v41, %v1539_v31  ;;  %v3924_v56 = vpop.f32.mrb[18].mxu0  ;;  %v1542_v33 = vpop.f32.mrb[19].mxu1 }
 0x1fd   : > { %v2880_v34 = vadd.f32 %v3969_v19, %v4944_v40  ;;  %v3971_v39 = vadd.f32 %v3924_v56, %v3732_v32  ;;  %v2763_v52 = vpop.f32.mrb[19].mxu0 }
 0x1fe   : > { %v2878_v35 = vadd.f32 %v3970_v2, %v4944_v40  ;;  %v3972_v46 = vadd.f32 %v2763_v52, %v1542_v33 }
 0x1ff   : > { %v2912_v47 = vmax.f32 %v2880_v34, 0.0  ;;  %v2881_v13 = vadd.f32 %v3971_v39, %v4944_v40 }
 0x200   : > { %v2910_v48 = vmax.f32 %v2878_v35, 0.0  ;;  %v2879_v50 = vadd.f32 %v3972_v46, %v4944_v40 }
 0x201   : > { %2944 = vst [vmem:[%s4951_s11 + $0x90] sm:$0xff] %v2912_v47  ;;  %v2913_v53 = vmax.f32 %v2881_v13, 0.0  ;;  %v3735_v55 = vpop.f32.mrb[20].mxu1 }
 0x202   : > { %2942 = vst [vmem:[%s4951_s11 + $0x80] sm:$0xff] %v2910_v48  ;;  %v2911_v54 = vmax.f32 %v2879_v50, 0.0  ;;  %v3927_v3 = vpop.f32.mrb[20].mxu0  ;;  %v1555_v57 = vpop.f32.mrb[21].mxu1 }
 0x203   : > { %2945 = vst [vmem:[%s4951_s11 + $0x98] sm:$0xff] %v2913_v53  ;;  %v3973_v60 = vadd.f32 %v3927_v3, %v3735_v55  ;;  %v2776_v62 = vpop.f32.mrb[21].mxu0  ;;  %v3736_v63 = vpop.f32.mrb[22].mxu1 }
 0x204   : > { %2943 = vst [vmem:[%s4951_s11 + $0x88] sm:$0xff] %v2911_v54  ;;  %v3974_v5 = vadd.f32 %v2776_v62, %v1555_v57  ;;  %v3928_v8 = vpop.f32.mrb[22].mxu0  ;;  %v1558_v49 = vpop.f32.mrb[23].mxu1 }
 0x205   : > { %v2884_v7 = vadd.f32 %v3973_v60, %v4944_v40  ;;  %v3975_v10 = vadd.f32 %v3928_v8, %v3736_v63  ;;  %v2779_v22 = vpop.f32.mrb[23].mxu0 }
 0x206   : > { %v2882_v24 = vadd.f32 %v3974_v5, %v4944_v40  ;;  %v3976_v36 = vadd.f32 %v2779_v22, %v1558_v49 }
 0x207   : > { %v2916_v38 = vmax.f32 %v2884_v7, 0.0  ;;  %v2885_v4 = vadd.f32 %v3975_v10, %v4944_v40 }
 0x208   : > { %v2914_v21 = vmax.f32 %v2882_v24, 0.0  ;;  %v2883_v26 = vadd.f32 %v3976_v36, %v4944_v40 }
 0x209   : > { %2948 = vst [vmem:[%s4951_s11 + $0xb0] sm:$0xff] %v2916_v38  ;;  %v2917_v27 = vmax.f32 %v2885_v4, 0.0  ;;  %v3739_v42 = vpop.f32.mrb[24].mxu1 }
 0x20a   : > { %2946 = vst [vmem:[%s4951_s11 + $0xa0] sm:$0xff] %v2914_v21  ;;  %v2915_v51 = vmax.f32 %v2883_v26, 0.0  ;;  %v3931_v43 = vpop.f32.mrb[24].mxu0  ;;  %v1571_v44 = vpop.f32.mrb[25].mxu1 }
 0x20b   : > { %2949 = vst [vmem:[%s4951_s11 + $0xb8] sm:$0xff] %v2917_v27  ;;  %v3977_v45 = vadd.f32 %v3931_v43, %v3739_v42  ;;  %v2792_v58 = vpop.f32.mrb[25].mxu0  ;;  %v3740_v0 = vpop.f32.mrb[26].mxu1 }
 0x20c   : > { %2947 = vst [vmem:[%s4951_s11 + $0xa8] sm:$0xff] %v2915_v51  ;;  %v3978_v59 = vadd.f32 %v2792_v58, %v1571_v44  ;;  %v3932_v9 = vpop.f32.mrb[26].mxu0  ;;  %v1574_v61 = vpop.f32.mrb[27].mxu1 }
 0x20d   : > { %v2888_v14 = vadd.f32 %v3977_v45, %v4944_v40  ;;  %v3979_v6 = vadd.f32 %v3932_v9, %v3740_v0  ;;  %v2795_v12 = vpop.f32.mrb[27].mxu0 }
 0x20e   : > { %v2886_v11 = vadd.f32 %v3978_v59, %v4944_v40  ;;  %v3980_v23 = vadd.f32 %v2795_v12, %v1574_v61 }
 0x20f   : > { %v2920_v16 = vmax.f32 %v2888_v14, 0.0  ;;  %v2889_v15 = vadd.f32 %v3979_v6, %v4944_v40 }
 0x210   : > { %v2918_v29 = vmax.f32 %v2886_v11, 0.0  ;;  %v2887_v17 = vadd.f32 %v3980_v23, %v4944_v40 }
 0x211   : > { %2952 = vst [vmem:[%s4951_s11 + $0xd0] sm:$0xff] %v2920_v16  ;;  %v2921_v18 = vmax.f32 %v2889_v15, 0.0  ;;  %v3743_v30 = vpop.f32.mrb[28].mxu1 }
 0x212   : > { %2950 = vst [vmem:[%s4951_s11 + $0xc0] sm:$0xff] %v2918_v29  ;;  %v2919_v20 = vmax.f32 %v2887_v17, 0.0  ;;  %v3935_v25 = vpop.f32.mrb[28].mxu0  ;;  %v1587_v37 = vpop.f32.mrb[29].mxu1 }
 0x213   : > { %2953 = vst [vmem:[%s4951_s11 + $0xd8] sm:$0xff] %v2921_v18  ;;  %v3981_v28 = vadd.f32 %v3935_v25, %v3743_v30  ;;  %v2808_v1 = vpop.f32.mrb[29].mxu0  ;;  %v3744_v31 = vpop.f32.mrb[30].mxu1 }
 0x214   : > { %2951 = vst [vmem:[%s4951_s11 + $0xc8] sm:$0xff] %v2919_v20  ;;  %v3982_v19 = vadd.f32 %v2808_v1, %v1587_v37  ;;  %v3936_v41 = vpop.f32.mrb[30].mxu0  ;;  %v1590_v32 = vpop.f32.mrb[31].mxu1 }
 0x215   : > { %v2892_v2 = vadd.f32 %v3981_v28, %v4944_v40  ;;  %v3983_v56 = vadd.f32 %v3936_v41, %v3744_v31  ;;  %v2811_v33 = vpop.f32.mrb[31].mxu0 }
 0x216   : > { %v2890_v34 = vadd.f32 %v3982_v19, %v4944_v40  ;;  %v3984_v39 = vadd.f32 %v2811_v33, %v1590_v32 }
 0x217   : > { %v2924_v52 = vmax.f32 %v2892_v2, 0.0  ;;  %v2893_v35 = vadd.f32 %v3983_v56, %v4944_v40 }
 0x218   : > { %v2922_v46 = vmax.f32 %v2890_v34, 0.0  ;;  %v2891_v47 = vadd.f32 %v3984_v39, %v4944_v40 }
 0x219   : > { %2956 = vst [vmem:[%s4951_s11 + $0xf0] sm:$0xff] %v2924_v52  ;;  %v2925_v13 = vmax.f32 %v2893_v35, 0.0 }
 0x21a   : > { %2954 = vst [vmem:[%s4951_s11 + $0xe0] sm:$0xff] %v2922_v46  ;;  %v2923_v48 = vmax.f32 %v2891_v47, 0.0 }
 0x21b   : > { %2957 = vst [vmem:[%s4951_s11 + $0xf8] sm:$0xff] %v2925_v13 }
 0x21c   : > { %2955 = vst [vmem:[%s4951_s11 + $0xe8] sm:$0xff] %v2923_v48 }
 0x21d PF: > { %s13_s12 = sadd.s32 1, %s4304_s12  }
 0x21e   : > { %p10_p4 = scmp.ge.s32.totalorder %s13_s12, 4  }
 0x220   :  { %12 = sbr.rel (!%p10_p4) target bundleno = 1 (0x1), region = 64 }

// kernel: net_forward.5
= control target key start
LH: loop header
LB: loop body
LE: loop exit
PB: predicated region body
PF: predicated region fallthrough
CT: control target
= control target key end

     0   :  { %9 = vsyncpa [#allocation3], 0  ;;  %s5352_s0 = inlined_call_operand.vmem [shape: f32[2,18,18,128], index: 0, kind: input, shape index: {}]   ;;  %s5353_s1 = inlined_call_operand.vmem [shape: f32[2,16,16,128], index: 1, kind: input, shape index: {}]   ;;  %s5354_s2 = inlined_call_operand.vmem [shape: bf16[1152,128], index: 2, kind: input, shape index: {}]   ;;  %s5355_s3 = inlined_call_operand.vmem [shape: f32[1,128], index: 3, kind: input, shape index: {}]   ;;  %s5356_s4 = inlined_call_operand.hbm [shape: f32[2,1,128], index: 4, kind: output, shape index: {}]  }
   0x1   :  { %11 = vsyncpa [#allocation3 + $0x1], 0  ;;  %s4560_s15 = smov 0   ;;  %s4562_s16 = smov 0  }
   0x2   :  { %s4564_s17 = smov 0   ;;  %s4566_s18 = smov 0  }
   0x3 LB: > { %s4581_s19 = sadd.s32 4294967295, %s4532_s18   ;;  %s3154_s20 = sadd.s32 4294967294, %s4532_s18   ;;  %s4532_s18 = sphi %s4566_s18, %s5362_s18   ;;  %s4528_s17 = sphi %s4564_s17, %s5361_s17   ;;  %s4524_s16 = sphi %s4562_s16, %s5360_s16   ;;  %s4520_s15 = sphi %s4560_s15, %s5359_s15  }
   0x4   : > { %s4585_s21 = sadd.s32 1, %s4532_s18   ;;  %s118_s22 = sadd.s32 1, %s4528_s17 }
   0x5   : > { %s115_s23 = ssub.s32 %s4532_s18, %s4585_s21  ;;  %p128_p0 = scmp.ne.s32.totalorder %s4528_s17, %s4524_s16 }
   0x6   : > { %p116_p1 = scmp.eq.s32.totalorder %s115_s23, 0  ;;  %p129_p2 = scmp.eq.s32.totalorder %s4581_s19, 1 }
   0x7   : > { %p134_p3 = scmp.ne.s32.totalorder %s4524_s16, %s4520_s15  ;;  %p135_p4 = scmp.eq.s32.totalorder %s3154_s20, 1 }
   0x8   : > { %s4596_s24 = scalar_select %p116_p1, %s4528_s17, %s118_s22  }
   0x9   : > { %p4598_p5 = por %p129_p2, %p128_p0  ;;  %p4602_p6 = por %p135_p4, %p134_p3 }
   0xa   : > { %p3157_p7 = scmp.ge.s32.totalorder %s4532_s18, 1  ;;  %p175_p8 = scmp.lt.s32.totalorder %s4532_s18, 3 }
   0xc   : > { %p176_p9 = pnand %p3157_p7, %p175_p8 }
   0xd   : > { %v4390_v0 = vld [vmem:[%s5354_s2 + $0x40] sm:$0xff] (!%p176_p9)   ;;  %p205_p10 = scmp.lt.s32.totalorder (!%p176_p9), %s4581_s19, 1  ;;  %v4392_v2 = vld [vmem:[%s5354_s2 + $0x48] sm:$0xff] (!%p176_p9)   ;;  %v4394_v4 = vld [vmem:[%s5354_s2 + $0x50] sm:$0xff] (!%p176_p9)   ;;  %s3426_s29 = sshll.u32 (!%p176_p9), %s4581_s19, 4 }
   0xe   : > { %179 = sbr.rel (%p176_p9) target bundleno = 584 (0x248), region = 36  ;;  %v4391_v1 = vld [vmem:[%s5354_s2 + $0x100] sm:$0xff] (!%p176_p9)   ;;  %3646 = vmatprep.subr.bf16.mxu1 (!%p176_p9), %v4390_v0  ;;  %v4393_v3 = vld [vmem:[%s5354_s2 + $0x108] sm:$0xff] (!%p176_p9)   ;;  %v4395_v5 = vld [vmem:[%s5354_s2 + $0x110] sm:$0xff] (!%p176_p9)   ;;  %s5310_s9 = scalar_lea.hbm (!%p176_p9), %s5356_s4, %s3426_s29 }
   0xf   : > { %3838 = vmatprep.subr.bf16.mxu0 (!%p176_p9), %v4391_v1  ;;  %3647 = vmatpush3.bf16.msra.mxu1 (!%p176_p9), %v4390_v0  ;;  %v4396_v6 = vld [vmem:[%s5354_s2 + $0x58] sm:$0xff] (!%p176_p9)   ;;  %v4398_v8 = vld [vmem:[%s5354_s2 + $0x60] sm:$0xff] (!%p176_p9)   ;;  %v4400_v10 = vld [vmem:[%s5354_s2 + $0x68] sm:$0xff] (!%p176_p9)  }
  0x10   : > { %3839 = vmatpush3.bf16.msra.mxu0 (!%p176_p9), %v4391_v1  ;;  %3648 = vmatprep.subr.bf16.mxu1 (!%p176_p9), %v4392_v2  ;;  %v4397_v7 = vld [vmem:[%s5354_s2 + $0x118] sm:$0xff] (!%p176_p9)   ;;  %v4399_v9 = vld [vmem:[%s5354_s2 + $0x120] sm:$0xff] (!%p176_p9)   ;;  %v4401_v11 = vld [vmem:[%s5354_s2 + $0x128] sm:$0xff] (!%p176_p9)  }
  0x11   : > { %3840 = vmatprep.subr.bf16.mxu0 (!%p176_p9), %v4393_v3  ;;  %v4402_v18 = vld [vmem:[%s5354_s2 + $0x70] sm:$0xff] (!%p176_p9)   ;;  %v4404_v20 = vld [vmem:[%s5354_s2 + $0x78] sm:$0xff] (!%p176_p9)   ;;  %v4406_v22 = vld [vmem:[%s5354_s2] sm:$0xff] (!%p176_p9)  }
  0x12   : > { %v4403_v19 = vld [vmem:[%s5354_s2 + $0x130] sm:$0xff] (!%p176_p9)   ;;  %v4405_v21 = vld [vmem:[%s5354_s2 + $0x138] sm:$0xff] (!%p176_p9)   ;;  %v4407_v25 = vld [vmem:[%s5354_s2 + $0x140] sm:$0xff] (!%p176_p9)  }
  0x13   : > { %3649 = vmatpush3.bf16.msra.mxu1 (!%p176_p9), %v4392_v2  ;;  %v4408_v29 = vld [vmem:[%s5354_s2 + $0x148] sm:$0xff] (!%p176_p9)   ;;  %v4410_v34 = vld [vmem:[%s5354_s2 + $0x150] sm:$0xff] (!%p176_p9)   ;;  %v4411_v40 = vld [vmem:[%s5354_s2 + $0x158] sm:$0xff] (!%p176_p9)  }
  0x14   : > { %3841 = vmatpush3.bf16.msra.mxu0 (!%p176_p9), %v4393_v3  ;;  %3650 = vmatprep.subr.bf16.mxu1 (!%p176_p9), %v4394_v4  ;;  %v4409_v31 = vld [vmem:[%s5354_s2 + $0x8] sm:$0xff] (!%p176_p9)   ;;  %v4412_v36 = vld [vmem:[%s5354_s2 + $0x10] sm:$0xff] (!%p176_p9)   ;;  %v4415_v41 = vld [vmem:[%s5354_s2 + $0x18] sm:$0xff] (!%p176_p9)  }
  0x15   : > { %s4628_s13 = scalar_select %p205_p10, %s4581_s19, 1  ;;  %3842 = vmatprep.subr.bf16.mxu0 %v4395_v5  ;;  %v4413_v44 = vld [vmem:[%s5354_s2 + $0x160] sm:$0xff]   ;;  %v4414_v50 = vld [vmem:[%s5354_s2 + $0x168] sm:$0xff]   ;;  %v4416_v54 = vld [vmem:[%s5354_s2 + $0x170] sm:$0xff]  }
  0x16   : > { %v4418_v47 = vld [vmem:[%s5354_s2 + $0x20] sm:$0xff]   ;;  %v4420_v51 = vld [vmem:[%s5354_s2 + $0x28] sm:$0xff]   ;;  %v4422_v57 = vld [vmem:[%s5354_s2 + $0x30] sm:$0xff]   ;;  %s4534_s19 = smov [#allocation2]  }
  0x17   : > { %s4350_s27 = smul.u32 432, %s4628_s13  ;;  %3651 = vmatpush3.bf16.msra.mxu1 %v4394_v4  ;;  %v4417_v60 = vld [vmem:[%s5354_s2 + $0x178] sm:$0xff]   ;;  %v4419_v4 = vld [vmem:[%s5354_s2 + $0x180] sm:$0xff]   ;;  %s4474_s12 = sshll.u32 %s4534_s19, 4  ;;  %s4475_s12 = int_to_ptr.vmem [resolvable:$false] %s4474_s12 }
  0x18   : > { %3843 = vmatpush3.bf16.msra.mxu0 %v4395_v5  ;;  %3652 = vmatprep.subr.bf16.mxu1 %v4396_v6  ;;  %v4424_v0 = vld [vmem:[%s5354_s2 + $0x38] sm:$0xff]   ;;  %s4476_s14 = scalar_lea.vmem %s4475_s12, 32 }
  0x19   : > { %3844 = vmatprep.subr.bf16.mxu0 %v4397_v7  ;;  %s4646_s8 = scalar_lea.vmem %s5352_s0, %s4350_s27 }
  0x1a   : > { %v280_v12 = vld [vmem:[%s4646_s8 + $0x1] sm:$0xff]  ;;  %v281_v13 = vld [vmem:[%s4646_s8 + $0x9] sm:$0xff]  ;;  %v3225_v14 = vld [vmem:[%s4646_s8 + $0x19] sm:$0xff] }
  0x1b   : > { %3653 = vmatpush3.bf16.msra.mxu1 %v4396_v6  ;;  %v312_v15 = vpack.c.bf16 %v281_v13, %v280_v12  ;;  %v3226_v16 = vld [vmem:[%s4646_s8 + $0x21] sm:$0xff]  ;;  %v3227_v23 = vld [vmem:[%s4646_s8 + $0x31] sm:$0xff]  ;;  %v3228_v24 = vld [vmem:[%s4646_s8 + $0x39] sm:$0xff] }
  0x1c   : > { %3845 = vmatpush3.bf16.msra.mxu0 %v4397_v7  ;;  %3654 = vmatprep.subr.bf16.mxu1 %v4398_v8  ;;  %v1405_v17 = vpack.c.bf16 %v3226_v16, %v3225_v14  ;;  %v3229_v26 = vld [vmem:[%s4646_s8 + $0x49] sm:$0xff]  ;;  %v3230_v27 = vld [vmem:[%s4646_s8 + $0x51] sm:$0xff]  ;;  %v1406_v28 = vpack.c.bf16 %v3228_v24, %v3227_v23  ;;  %v3231_v32 = vld [vmem:[%s4646_s8 + $0x61] sm:$0xff] }
  0x1d   : > { %3846 = vmatprep.subr.bf16.mxu0 %v4399_v9  ;;  %3662 = vmatprep.mubr.bf16.mxu1 %v312_v15  ;;  %v1407_v30 = vpack.c.bf16 %v3230_v27, %v3229_v26  ;;  %v3232_v33 = vld [vmem:[%s4646_s8 + $0x69] sm:$0xff]  ;;  %v3233_v35 = vld [vmem:[%s4646_s8 + $0x79] sm:$0xff]  ;;  %v3234_v37 = vld [vmem:[%s4646_s8 + $0x81] sm:$0xff] }
  0x1e   : > { %3854 = vmatprep.mubr.bf16.mxu0 %v1405_v17  ;;  %v1408_v38 = vpack.c.bf16 %v3232_v33, %v3231_v32  ;;  %v1409_v39 = vpack.c.bf16 %v3234_v37, %v3233_v35  ;;  %v3235_v42 = vld [vmem:[%s4646_s8 + $0x91] sm:$0xff]  ;;  %v3236_v43 = vld [vmem:[%s4646_s8 + $0x99] sm:$0xff]  ;;  %v3237_v45 = vld [vmem:[%s4646_s8 + $0xa9] sm:$0xff] }
  0x1f   : > { %3655 = vmatpush3.bf16.msra.mxu1 %v4398_v8  ;;  %v3238_v46 = vld [vmem:[%s4646_s8 + $0xb1] sm:$0xff]  ;;  %v1410_v48 = vpack.c.bf16 %v3236_v43, %v3235_v42  ;;  %v3239_v52 = vld [vmem:[%s4646_s8 + $0xc1] sm:$0xff]  ;;  %v3240_v53 = vld [vmem:[%s4646_s8 + $0xc9] sm:$0xff] }
  0x20   : > { %3847 = vmatpush3.bf16.msra.mxu0 %v4399_v9  ;;  %3656 = vmatprep.subr.bf16.mxu1 %v4400_v10  ;;  %v4712_v49 = vpack.c.bf16 %v3238_v46, %v3237_v45  ;;  %v3265_v55 = vld [vmem:[%s4646_s8 + $0x1a] sm:$0xff]  ;;  %v3266_v56 = vld [vmem:[%s4646_s8 + $0x22] sm:$0xff]  ;;  %v1412_v58 = vpack.c.bf16 %v3240_v53, %v3239_v52  ;;  %v3267_v63 = vld [vmem:[%s4646_s8 + $0x32] sm:$0xff] }
  0x21   : > { %3848 = vmatprep.subr.bf16.mxu0 %v4401_v11  ;;  %v4731_v59 = vpack.c.bf16 %v3266_v56, %v3265_v55  ;;  %v298_v61 = vld [vmem:[%s4646_s8 + $0xd9] sm:$0xff]  ;;  %v299_v62 = vld [vmem:[%s4646_s8 + $0xe1] sm:$0xff]  ;;  %v300_v2 = vld [vmem:[%s4646_s8 + $0xf1] sm:$0xff] }
  0x22   : > { %v3268_v1 = vld [vmem:[%s4646_s8 + $0x3a] sm:$0xff]  ;;  %v3269_v5 = vld [vmem:[%s4646_s8 + $0x4a] sm:$0xff]  ;;  %v3270_v6 = vld [vmem:[%s4646_s8 + $0x52] sm:$0xff]  ;;  %v4752_v7 = vpack.c.bf16 %v299_v62, %v298_v61 }
  0x23   : > { %3657 = vmatpush3.bf16.msra.mxu1 %v4400_v10  ;;  %v301_v3 = vld [vmem:[%s4646_s8 + $0xf9] sm:$0xff]  ;;  %v4759_v9 = vpack.c.bf16 %v3268_v1, %v3267_v63  ;;  %v4421_v12 = vld [vmem:[%s5354_s2 + $0x188] sm:$0xff]   ;;  %v303_v14 = vld [vmem:[%s4646_s8 + $0x111] sm:$0xff] }
  0x24   : > { %3849 = vmatpush3.bf16.msra.mxu0 %v4401_v11  ;;  %3658 = vmatprep.subr.bf16.mxu1 %v4402_v18  ;;  %v4757_v8 = vld [vmem:[%s5354_s2 + $0x80] sm:$0xff]   ;;  %v4761_v10 = vpack.c.bf16 %v301_v3, %v300_v2  ;;  %v4763_v11 = vpack.c.bf16 %v3270_v6, %v3269_v5  ;;  %v302_v13 = vld [vmem:[%s4646_s8 + $0x109] sm:$0xff]  ;;  %v4425_v27 = vld [vmem:[%s5354_s2 + $0x198] sm:$0xff]  }
  0x25   : > { %3850 = vmatprep.subr.bf16.mxu0 %v4403_v19  ;;  %v3271_v15 = vld [vmem:[%s4646_s8 + $0x62] sm:$0xff]  ;;  %v3272_v16 = vld [vmem:[%s4646_s8 + $0x6a] sm:$0xff]  ;;  %v306_v26 = vld [vmem:[%s4646_s8 + $0x139] sm:$0xff] }
  0x26   : > { %v4786_v23 = vpack.c.bf16 %v3272_v16, %v3271_v15  ;;  %v309_v32 = vld [vmem:[%s4646_s8 + $0x159] sm:$0xff]  ;;  %v3277_v33 = vld [vmem:[%s4646_s8 + $0xaa] sm:$0xff]  ;;  %v3279_v43 = vld [vmem:[%s4646_s8 + $0xc2] sm:$0xff] }
  0x27   : > { %3659 = vmatpush3.bf16.msra.mxu1 %v4402_v18  ;;  %v305_v18 = vld [vmem:[%s4646_s8 + $0x129] sm:$0xff]  ;;  %v4427_v35 = vld [vmem:[%s5354_s2 + $0x1a0] sm:$0xff]   ;;  %v218_v55 = vld [vmem:[%s4646_s8 + $0x18] sm:$0xff] }
  0x28   : > { %3851 = vmatpush3.bf16.msra.mxu0 %v4403_v19  ;;  %3660 = vmatprep.subr.bf16.mxu1 %v4404_v20  ;;  %v3273_v19 = vld [vmem:[%s4646_s8 + $0x7a] sm:$0xff]  ;;  %v4429_v42 = vld [vmem:[%s5354_s2 + $0x1a8] sm:$0xff]   ;;  %v220_v61 = vld [vmem:[%s4646_s8 + $0x30] sm:$0xff] }
  0x29   : > { %3852 = vmatprep.subr.bf16.mxu0 %v4405_v21  ;;  %v216_v45 = vld [vmem:[%s4646_s8] sm:$0xff]  ;;  %v217_v46 = vld [vmem:[%s4646_s8 + $0x8] sm:$0xff]  ;;  %v221_v62 = vld [vmem:[%s4646_s8 + $0x38] sm:$0xff] }
  0x2a   : > { %v248_v53 = vpack.c.bf16 %v217_v46, %v216_v45  ;;  %v219_v56 = vld [vmem:[%s4646_s8 + $0x20] sm:$0xff]  ;;  %v3285_v63 = vld [vmem:[%s4646_s8 + $0x10a] sm:$0xff] }
  0x2b   : > { %3661 = vmatpush3.bf16.msra.mxu1 %v4404_v20  ;;  %v3274_v20 = vld [vmem:[%s4646_s8 + $0x82] sm:$0xff]  ;;  %v4861_v2 = vpack.c.bf16 %v219_v56, %v218_v55  ;;  %v3288_v15 = vld [vmem:[%s4646_s8 + $0x12a] sm:$0xff] }
  0x2c   : > { %3853 = vmatpush3.bf16.msra.mxu0 %v4405_v21  ;;  %3694 = vmatprep.subr.bf16.mxu1 %v4406_v22  ;;  %v4423_v21 = vld [vmem:[%s5354_s2 + $0x190] sm:$0xff]   ;;  %v4859_v1 = vld [vmem:[%s5354_s2 + $0x1c0] sm:$0xff]   ;;  %v222_v6 = vld [vmem:[%s4646_s8 + $0x48] sm:$0xff] }
  0x2d   : > { %3886 = vmatprep.subr.bf16.mxu0 %v4407_v25  ;;  %v224_v16 = vld [vmem:[%s4646_s8 + $0x60] sm:$0xff]  ;;  %v4436_v46 = vld [vmem:[%s5354_s2 + $0xa8] sm:$0xff]  }
  0x2e   : > { %3663 = vmatmul.mubr.bf16.vlgmr.msra.gmra.mrb[0].mxu1 %v1405_v17  ;;  %v304_v17 = vld [vmem:[%s4646_s8 + $0x121] sm:$0xff] }
  0x2f   : > { %3855 = vmatmul.mubr.bf16.vlgmr.msra.gmra.mrb[0].mxu0 %v1406_v28  ;;  %3695 = vmatpush3.bf16.msra.mxu1 %v4406_v22  ;;  %v4784_v22 = vpack.c.bf16 %v303_v14, %v302_v13  ;;  %v4788_v24 = vpack.c.bf16 %v305_v18, %v304_v17  ;;  %v4428_v13 = vld [vmem:[%s5354_s2 + $0x88] sm:$0xff]   ;;  %v3289_v18 = vld [vmem:[%s4646_s8 + $0x13a] sm:$0xff] }
  0x30   : > { %3887 = vmatpush3.bf16.msra.mxu0 %v4407_v25  ;;  %3666 = vmatprep.mubr.bf16.mxu1 %v1406_v28  ;;  %v4790_v25 = vpack.c.bf16 %v3274_v20, %v3273_v19  ;;  %v307_v28 = vld [vmem:[%s4646_s8 + $0x141] sm:$0xff]  ;;  %v4430_v19 = vld [vmem:[%s5354_s2 + $0x90] sm:$0xff]  }
  0x31   : > { %3888 = vmatprep.subr.bf16.mxu0 %v4408_v29  ;;  %3858 = vmatprep.mubr.bf16.mxu0 %v1407_v30  ;;  %v3287_v14 = vld [vmem:[%s4646_s8 + $0x122] sm:$0xff] }
  0x32   : > { %3696 = vmatprep.subr.bf16.mxu1 %v4409_v31  ;;  %v225_v17 = vld [vmem:[%s4646_s8 + $0x68] sm:$0xff]  ;;  %v232_v55 = vld [vmem:[%s4646_s8 + $0xc0] sm:$0xff] }
  0x33   : > { %3697 = vmatpush3.bf16.msra.mxu1 %v4409_v31  ;;  %v308_v31 = vld [vmem:[%s4646_s8 + $0x151] sm:$0xff]  ;;  %v3290_v20 = vld [vmem:[%s4646_s8 + $0x142] sm:$0xff] }
  0x34   : > { %3889 = vmatpush3.bf16.msra.mxu0 %v4408_v29  ;;  %3698 = vmatprep.subr.bf16.mxu1 %v4412_v36  ;;  %v3275_v29 = vld [vmem:[%s4646_s8 + $0x92] sm:$0xff]  ;;  %v233_v56 = vld [vmem:[%s4646_s8 + $0xc8] sm:$0xff] }
  0x35   : > { %3890 = vmatprep.subr.bf16.mxu0 %v4410_v34 }
  0x36   : > { %3667 = vmatmul.mubr.bf16.gmra.mrb[4].mxu1 %v1407_v30  ;;  %v3276_v30 = vld [vmem:[%s4646_s8 + $0x9a] sm:$0xff] }
  0x37   : > { %3859 = vmatmul.mubr.bf16.gmra.mrb[4].mxu0 %v1408_v38  ;;  %3670 = vmatprep.mubr.bf16.mxu1 %v1408_v38  ;;  %v4812_v37 = vpack.c.bf16 %v3276_v30, %v3275_v29  ;;  %v4814_v38 = vpack.c.bf16 %v309_v32, %v308_v31  ;;  %v227_v29 = vld [vmem:[%s4646_s8 + $0x80] sm:$0xff]  ;;  %v4432_v30 = vld [vmem:[%s5354_s2 + $0x98] sm:$0xff]  }
  0x38   : > { %3891 = vmatpush3.bf16.msra.mxu0 %v4410_v34  ;;  %3862 = vmatprep.mubr.bf16.mxu0 %v1409_v39  ;;  %v3278_v34 = vld [vmem:[%s4646_s8 + $0xb2] sm:$0xff]  ;;  %v3292_v32 = vld [vmem:[%s4646_s8 + $0x15a] sm:$0xff] }
  0x39   : > { %3892 = vmatprep.subr.bf16.mxu0 %v4411_v40  ;;  %3699 = vmatpush3.bf16.msra.mxu1 %v4412_v36  ;;  %v4810_v36 = vpack.c.bf16 %v307_v28, %v306_v26  ;;  %v4893_v26 = vpack.c.bf16 %v225_v17, %v224_v16  ;;  %v226_v28 = vld [vmem:[%s4646_s8 + $0x78] sm:$0xff]  ;;  %v4437_v16 = vld [vmem:[%s5354_s2 + $0x1c8] sm:$0xff]  }
  0x3a   : > { %3700 = vmatprep.subr.bf16.mxu1 %v4415_v41  ;;  %v3291_v31 = vld [vmem:[%s4646_s8 + $0x152] sm:$0xff]  ;;  %v238_v17 = vld [vmem:[%s4646_s8 + $0x108] sm:$0xff] }
  0x3c   : > { %3893 = vmatpush3.bf16.msra.mxu0 %v4411_v40  ;;  %v310_v40 = vld [vmem:[%s4646_s8 + $0x169] sm:$0xff] }
  0x3d   : > { %3894 = vmatprep.subr.bf16.mxu0 %v4413_v44  ;;  %3701 = vmatpush3.bf16.msra.mxu1 %v4415_v41  ;;  %v311_v41 = vld [vmem:[%s4646_s8 + $0x171] sm:$0xff] }
  0x3e   : > { %3671 = vmatmul.mubr.bf16.gmra.mrb[8].mxu1 %v1409_v39  ;;  %3702 = vmatprep.subr.bf16.mxu1 %v4418_v47  ;;  %v4816_v39 = vpack.c.bf16 %v3278_v34, %v3277_v33  ;;  %v228_v33 = vld [vmem:[%s4646_s8 + $0x90] sm:$0xff]  ;;  %v229_v34 = vld [vmem:[%s4646_s8 + $0x98] sm:$0xff] }
  0x3f   : > { %3863 = vmatmul.mubr.bf16.gmra.mrb[8].mxu0 %v1410_v48  ;;  %3674 = vmatprep.mubr.bf16.mxu1 %v1410_v48  ;;  %v3282_v48 = vld [vmem:[%s4646_s8 + $0xe2] sm:$0xff] }
  0x40   : > { %3895 = vmatpush3.bf16.msra.mxu0 %v4413_v44  ;;  %3866 = vmatprep.mubr.bf16.mxu0 %v4712_v49  ;;  %v3280_v44 = vld [vmem:[%s4646_s8 + $0xca] sm:$0xff] }
  0x41   : > { %3896 = vmatprep.subr.bf16.mxu0 %v4414_v50  ;;  %3703 = vmatpush3.bf16.msra.mxu1 %v4418_v47  ;;  %v3281_v47 = vld [vmem:[%s4646_s8 + $0xda] sm:$0xff]  ;;  %v4838_v52 = vpack.c.bf16 %v3280_v44, %v3279_v43  ;;  %v4917_v43 = vpack.c.bf16 %v3292_v32, %v3291_v31  ;;  %v4919_v44 = vpack.c.bf16 %v229_v34, %v228_v33  ;;  %v244_v33 = vld [vmem:[%s4646_s8 + $0x150] sm:$0xff] }
  0x42   : > { %3704 = vmatprep.subr.bf16.mxu1 %v4420_v51  ;;  %v242_v31 = vld [vmem:[%s4646_s8 + $0x138] sm:$0xff]  ;;  %v243_v32 = vld [vmem:[%s4646_s8 + $0x140] sm:$0xff] }
  0x43   : > { %v245_v34 = vld [vmem:[%s4646_s8 + $0x158] sm:$0xff] }
  0x44   : > { %3897 = vmatpush3.bf16.msra.mxu0 %v4414_v50  ;;  %v4431_v50 = vld [vmem:[%s5354_s2 + $0x1b0] sm:$0xff]  }
  0x45   : > { %3898 = vmatprep.subr.bf16.mxu0 %v4416_v54  ;;  %3705 = vmatpush3.bf16.msra.mxu1 %v4420_v51  ;;  %v4836_v51 = vpack.c.bf16 %v311_v41, %v310_v40  ;;  %v3294_v40 = vld [vmem:[%s4646_s8 + $0x172] sm:$0xff]  ;;  %v4434_v41 = vld [vmem:[%s5354_s2 + $0xa0] sm:$0xff]  }
  0x46   : > { %3675 = vmatmul.mubr.bf16.gmra.mrb[12].mxu1 %v4712_v49  ;;  %3706 = vmatprep.subr.bf16.mxu1 %v4422_v57 }
  0x47   : > { %3867 = vmatmul.mubr.bf16.gmra.mrb[12].mxu0 %v1412_v58  ;;  %3678 = vmatprep.mubr.bf16.mxu1 %v1412_v58  ;;  %v3283_v58 = vld [vmem:[%s4646_s8 + $0xf2] sm:$0xff] }
  0x48   : > { %3899 = vmatpush3.bf16.msra.mxu0 %v4416_v54  ;;  %3902 = vmatprep.mubr.bf16.mxu0 %v4731_v59  ;;  %v4840_v54 = vpack.c.bf16 %v3282_v48, %v3281_v47  ;;  %v230_v47 = vld [vmem:[%s4646_s8 + $0xa8] sm:$0xff]  ;;  %v231_v48 = vld [vmem:[%s4646_s8 + $0xb0] sm:$0xff] }
  0x49   : > { %3900 = vmatprep.subr.bf16.mxu0 %v4417_v60  ;;  %3707 = vmatpush3.bf16.msra.mxu1 %v4422_v57  ;;  %v4433_v57 = vld [vmem:[%s5354_s2 + $0x1b8] sm:$0xff]  }
  0x4a   : > { %3708 = vmatprep.subr.bf16.mxu1 %v4424_v0 }
  0x4c   : > { %3901 = vmatpush3.bf16.msra.mxu0 %v4417_v60  ;;  %v3284_v60 = vld [vmem:[%s4646_s8 + $0xfa] sm:$0xff] }
  0x4d   : > { %3934 = vmatprep.subr.bf16.mxu0 %v4419_v4  ;;  %3709 = vmatpush3.bf16.msra.mxu1 %v4424_v0  ;;  %v3286_v0 = vld [vmem:[%s4646_s8 + $0x112] sm:$0xff]  ;;  %v4863_v3 = vpack.c.bf16 %v3284_v60, %v3283_v58  ;;  %v4939_v58 = vpack.c.bf16 %v231_v48, %v230_v47  ;;  %v246_v47 = vld [vmem:[%s4646_s8 + $0x168] sm:$0xff] }
  0x4e   : > { %3679 = vmatmul.mubr.bf16.gmra.mrb[16].mxu1 %v4752_v7  ;;  %3742 = vmatprep.subr.bf16.mxu1 %v4757_v8  ;;  %v4867_v5 = vpack.c.bf16 %v3286_v0, %v3285_v63  ;;  %v234_v63 = vld [vmem:[%s4646_s8 + $0xd8] sm:$0xff]  ;;  %v235_v0 = vld [vmem:[%s4646_s8 + $0xe0] sm:$0xff]  ;;  %v247_v48 = vld [vmem:[%s4646_s8 + $0x170] sm:$0xff] }
  0x4f   : > { %3903 = vmatmul.mubr.bf16.vlgmr.msra.gmra.mrb[0].mxu0 %v4759_v9  ;;  %3682 = vmatprep.mubr.bf16.mxu1 %v4761_v10 }
  0x50   : > { %3935 = vmatpush3.bf16.msra.mxu0 %v4419_v4  ;;  %3906 = vmatprep.mubr.bf16.mxu0 %v4763_v11  ;;  %v4865_v4 = vpack.c.bf16 %v221_v62, %v220_v61  ;;  %v4941_v61 = vpack.c.bf16 %v233_v56, %v232_v55  ;;  %v4440_v62 = vld [vmem:[%s5354_s2 + $0xb8] sm:$0xff]   ;;  %v4447_v55 = vld [vmem:[%s5354_s2 + $0x1f0] sm:$0xff]   ;;  %v5014_v56 = vpack.c.bf16 %v247_v48, %v246_v47 }
  0x51   : > { %3936 = vmatprep.subr.bf16.mxu0 %v4421_v12  ;;  %v3353_v47 = vld [vmem:[%s4646_s8 + $0x91] sm:$0xff]  ;;  %v3354_v48 = vld [vmem:[%s4646_s8 + $0x99] sm:$0xff] }
  0x54   : > { %3937 = vmatpush3.bf16.msra.mxu0 %v4421_v12  ;;  %v223_v12 = vld [vmem:[%s4646_s8 + $0x50] sm:$0xff] }
  0x55   : > { %3938 = vmatprep.subr.bf16.mxu0 %v4423_v21 }
  0x56   : > { %3683 = vmatmul.mubr.bf16.gmra.mrb[20].mxu1 %v4784_v22 }
  0x57   : > { %3907 = vmatmul.mubr.bf16.gmra.mrb[4].mxu0 %v4786_v23  ;;  %3686 = vmatprep.mubr.bf16.mxu1 %v4788_v24 }
  0x58   : > { %3910 = vmatprep.mubr.bf16.mxu0 %v4790_v25  ;;  %3939 = vmatpush3.bf16.msra.mxu0 %v4423_v21  ;;  %v4889_v21 = vpack.c.bf16 %v223_v12, %v222_v6  ;;  %v236_v6 = vld [vmem:[%s4646_s8 + $0xf0] sm:$0xff]  ;;  %v237_v12 = vld [vmem:[%s4646_s8 + $0xf8] sm:$0xff] }
  0x59   : > { %3940 = vmatprep.subr.bf16.mxu0 %v4425_v27 }
  0x5c   : > { %3941 = vmatpush3.bf16.msra.mxu0 %v4425_v27  ;;  %v4895_v27 = vpack.c.bf16 %v3290_v20, %v3289_v18  ;;  %v239_v18 = vld [vmem:[%s4646_s8 + $0x110] sm:$0xff]  ;;  %v241_v20 = vld [vmem:[%s4646_s8 + $0x128] sm:$0xff] }
  0x5d   : > { %3942 = vmatprep.subr.bf16.mxu0 %v4427_v35 }
  0x5e   : > { %3687 = vmatmul.mubr.bf16.gmra.mrb[24].mxu1 %v4810_v36 }
  0x5f   : > { %3911 = vmatmul.mubr.bf16.gmra.mrb[8].mxu0 %v4812_v37  ;;  %3690 = vmatprep.mubr.bf16.mxu1 %v4814_v38 }
  0x60   : > { %3914 = vmatprep.mubr.bf16.mxu0 %v4816_v39  ;;  %3943 = vmatpush3.bf16.msra.mxu0 %v4427_v35  ;;  %v3293_v35 = vld [vmem:[%s4646_s8 + $0x16a] sm:$0xff] }
  0x61   : > { %3944 = vmatprep.subr.bf16.mxu0 %v4429_v42  ;;  %v4921_v45 = vpack.c.bf16 %v3294_v40, %v3293_v35  ;;  %v4443_v35 = vld [vmem:[%s5354_s2 + $0x1e0] sm:$0xff]   ;;  %v4996_v40 = vpack.c.bf16 %v243_v32, %v242_v31  ;;  %v3350_v32 = vld [vmem:[%s4646_s8 + $0x69] sm:$0xff] }
  0x62   : > { %v3349_v31 = vld [vmem:[%s4646_s8 + $0x61] sm:$0xff] }
  0x64   : > { %3945 = vmatpush3.bf16.msra.mxu0 %v4429_v42  ;;  %v4915_v42 = vpack.c.bf16 %v227_v29, %v226_v28  ;;  %v4439_v28 = vld [vmem:[%s5354_s2 + $0x1d0] sm:$0xff]   ;;  %v4978_v29 = vpack.c.bf16 %v239_v18, %v238_v17  ;;  %v3346_v18 = vld [vmem:[%s4646_s8 + $0x39] sm:$0xff] }
  0x65   : > { %3946 = vmatprep.subr.bf16.mxu0 %v4431_v50  ;;  %v3345_v17 = vld [vmem:[%s4646_s8 + $0x31] sm:$0xff] }
  0x66   : > { %3691 = vmatmul.mubr.bf16.gmra.mrb[28].mxu1 %v4836_v51 }
  0x67   : > { %3915 = vmatmul.mubr.bf16.gmra.mrb[12].mxu0 %v4838_v52  ;;  %3710 = vmatprep.mubr.bf16.mxu1 %v248_v53  ;;  %v3296_v53 = vld [vmem:[%s4646_s8 + $0x18a] sm:$0xff] }
  0x68   : > { %3918 = vmatprep.mubr.bf16.mxu0 %v4840_v54  ;;  %3947 = vmatpush3.bf16.msra.mxu0 %v4431_v50  ;;  %v3295_v50 = vld [vmem:[%s4646_s8 + $0x182] sm:$0xff] }
  0x69   : > { %3948 = vmatprep.subr.bf16.mxu0 %v4433_v57  ;;  %v1725_v60 = vpack.c.bf16 %v3296_v53, %v3295_v50  ;;  %v762_v50 = vld [vmem:[%s4646_s8 + $0x2] sm:$0xff]  ;;  %v763_v53 = vld [vmem:[%s4646_s8 + $0xa] sm:$0xff] }
  0x6c   : > { %3949 = vmatpush3.bf16.msra.mxu0 %v4433_v57  ;;  %v4438_v57 = vld [vmem:[%s5354_s2 + $0xb0] sm:$0xff]  }
  0x6d   : > { %3982 = vmatprep.subr.bf16.mxu0 %v4859_v1 }
  0x6e   : > { %3711 = vmatmul.mubr.bf16.vlgmr.msra.gmra.mrb[0].mxu1 %v4861_v2 }
  0x6f   : > { %3919 = vmatmul.mubr.bf16.gmra.mrb[16].mxu0 %v4863_v3  ;;  %3743 = vmatpush3.bf16.msra.mxu1 %v4757_v8  ;;  %v4891_v8 = vpack.c.bf16 %v3288_v15, %v3287_v14  ;;  %v4958_v14 = vpack.c.bf16 %v235_v0, %v234_v63  ;;  %v4960_v15 = vpack.c.bf16 %v237_v12, %v236_v6  ;;  %v4444_v63 = vld [vmem:[%s5354_s2 + $0xc8] sm:$0xff]   ;;  %v4446_v0 = vld [vmem:[%s5354_s2 + $0xd0] sm:$0xff]   ;;  %v4450_v12 = vld [vmem:[%s5354_s2 + $0xe0] sm:$0xff]  }
  0x70   : > { %3714 = vmatprep.mubr.bf16.mxu1 %v4865_v4  ;;  %3922 = vmatprep.mubr.bf16.mxu0 %v4867_v5  ;;  %v3334_v6 = vld [vmem:[%s4646_s8 + $0x188] sm:$0xff] }
  0x71   : > { %3744 = vmatprep.subr.bf16.mxu1 %v4428_v13 }
  0x73   : > { %3745 = vmatpush3.bf16.msra.mxu1 %v4428_v13  ;;  %v4956_v13 = vld [vmem:[%s5354_s2 + $0xc0] sm:$0xff]  }
  0x74   : > { %3746 = vmatprep.subr.bf16.mxu1 %v4430_v19 }
  0x76   : > { %3715 = vmatmul.mubr.bf16.gmra.mrb[4].mxu1 %v4889_v21 }
  0x77   : > { %3923 = vmatmul.mubr.bf16.gmra.mrb[20].mxu0 %v4891_v8  ;;  %3718 = vmatprep.mubr.bf16.mxu1 %v4893_v26 }
  0x78   : > { %3926 = vmatprep.mubr.bf16.mxu0 %v4895_v27  ;;  %3747 = vmatpush3.bf16.msra.mxu1 %v4430_v19  ;;  %v240_v19 = vld [vmem:[%s4646_s8 + $0x120] sm:$0xff] }
  0x79   : > { %3748 = vmatprep.subr.bf16.mxu1 %v4432_v30 }
  0x7c   : > { %3749 = vmatpush3.bf16.msra.mxu1 %v4432_v30  ;;  %v4980_v30 = vpack.c.bf16 %v241_v20, %v240_v19  ;;  %v2321_v20 = vpack.c.bf16 %v3346_v18, %v3345_v17  ;;  %v3397_v17 = vld [vmem:[%s4646_s8 + $0xc2] sm:$0xff]  ;;  %v3398_v18 = vld [vmem:[%s4646_s8 + $0xca] sm:$0xff] }
  0x7d   : > { %3750 = vmatprep.subr.bf16.mxu1 %v4434_v41 }
  0x7e   : > { %3719 = vmatmul.mubr.bf16.gmra.mrb[8].mxu1 %v4915_v42 }
  0x7f   : > { %3927 = vmatmul.mubr.bf16.gmra.mrb[24].mxu0 %v4917_v43  ;;  %3722 = vmatprep.mubr.bf16.mxu1 %v4919_v44 }
  0x80   : > { %3930 = vmatprep.mubr.bf16.mxu0 %v4921_v45  ;;  %3751 = vmatpush3.bf16.msra.mxu1 %v4434_v41  ;;  %v4998_v41 = vpack.c.bf16 %v245_v34, %v244_v33  ;;  %v2323_v34 = vpack.c.bf16 %v3350_v32, %v3349_v31 }
  0x81   : > { %3752 = vmatprep.subr.bf16.mxu1 %v4436_v46 }
  0x84   : > { %3753 = vmatpush3.bf16.msra.mxu1 %v4436_v46  ;;  %v4445_v46 = vld [vmem:[%s5354_s2 + $0x1e8] sm:$0xff]  }
  0x85   : > { %3754 = vmatprep.subr.bf16.mxu1 %v4438_v57 }
  0x86   : > { %3723 = vmatmul.mubr.bf16.gmra.mrb[12].mxu1 %v4939_v58 }
  0x87   : > { %3931 = vmatmul.mubr.bf16.gmra.mrb[28].mxu0 %v1725_v60  ;;  %3726 = vmatprep.mubr.bf16.mxu1 %v4941_v61  ;;  %v4449_v60 = vld [vmem:[%s5354_s2 + $0x1f8] sm:$0xff]  }
  0x88   : > { %3950 = vmatprep.mubr.bf16.mxu0 %v4865_v4  ;;  %3755 = vmatpush3.bf16.msra.mxu1 %v4438_v57  ;;  %v794_v57 = vpack.c.bf16 %v763_v53, %v762_v50  ;;  %v4455_v50 = vld [vmem:[%s5354_s2 + $0x210] sm:$0xff]  }
  0x89   : > { %3756 = vmatprep.subr.bf16.mxu1 %v4440_v62 }
  0x8c   : > { %3757 = vmatpush3.bf16.msra.mxu1 %v4440_v62  ;;  %v4451_v62 = vld [vmem:[%s5354_s2 + $0x200] sm:$0xff]  }
  0x8d   : > { %3790 = vmatprep.subr.bf16.mxu1 %v4956_v13 }
  0x8e   : > { %3727 = vmatmul.mubr.bf16.gmra.mrb[16].mxu1 %v4958_v14 }
  0x8f   : > { %3951 = vmatmul.mubr.bf16.vlgmr.msra.gmra.mrb[0].mxu0 %v4889_v21  ;;  %3730 = vmatprep.mubr.bf16.mxu1 %v4960_v15 }
  0x90   : > { %3983 = vmatpush3.bf16.msra.mxu0 %v4859_v1  ;;  %3954 = vmatprep.mubr.bf16.mxu0 %v4893_v26  ;;  %v4441_v1 = vld [vmem:[%s5354_s2 + $0x1d8] sm:$0xff]  }
  0x91   : > { %3984 = vmatprep.subr.bf16.mxu0 %v4437_v16 }
  0x94   : > { %3985 = vmatpush3.bf16.msra.mxu0 %v4437_v16  ;;  %v3336_v16 = vld [vmem:[%s4646_s8 + $0x1a0] sm:$0xff] }
  0x95   : > { %3986 = vmatprep.subr.bf16.mxu0 %v4439_v28 }
  0x96   : > { %3731 = vmatmul.mubr.bf16.gmra.mrb[20].mxu1 %v4978_v29 }
  0x97   : > { %3955 = vmatmul.mubr.bf16.gmra.mrb[4].mxu0 %v4915_v42  ;;  %3734 = vmatprep.mubr.bf16.mxu1 %v4980_v30 }
  0x98   : > { %3958 = vmatprep.mubr.bf16.mxu0 %v4919_v44  ;;  %3987 = vmatpush3.bf16.msra.mxu0 %v4439_v28  ;;  %v3347_v28 = vld [vmem:[%s4646_s8 + $0x49] sm:$0xff] }
  0x99   : > { %3988 = vmatprep.subr.bf16.mxu0 %v4441_v1 }
  0x9c   : > { %3989 = vmatpush3.bf16.msra.mxu0 %v4441_v1  ;;  %v3348_v1 = vld [vmem:[%s4646_s8 + $0x51] sm:$0xff] }
  0x9d   : > { %3990 = vmatprep.subr.bf16.mxu0 %v4443_v35  ;;  %v2322_v33 = vpack.c.bf16 %v3348_v1, %v3347_v28  ;;  %v3401_v28 = vld [vmem:[%s4646_s8 + $0xf2] sm:$0xff]  ;;  %v3402_v1 = vld [vmem:[%s4646_s8 + $0xfa] sm:$0xff] }
  0x9e   : > { %3735 = vmatmul.mubr.bf16.gmra.mrb[24].mxu1 %v4996_v40  ;;  %v2634_v32 = vpack.c.bf16 %v3402_v1, %v3401_v28 }
  0x9f   : > { %3959 = vmatmul.mubr.bf16.gmra.mrb[8].mxu0 %v4939_v58  ;;  %3738 = vmatprep.mubr.bf16.mxu1 %v4998_v41 }
  0xa0   : > { %3962 = vmatprep.mubr.bf16.mxu0 %v4941_v61  ;;  %3991 = vmatpush3.bf16.msra.mxu0 %v4443_v35  ;;  %v3351_v35 = vld [vmem:[%s4646_s8 + $0x79] sm:$0xff] }
  0xa1   : > { %3992 = vmatprep.subr.bf16.mxu0 %v4445_v46 }
  0xa4   : > { %3993 = vmatpush3.bf16.msra.mxu0 %v4445_v46  ;;  %v3352_v46 = vld [vmem:[%s4646_s8 + $0x81] sm:$0xff] }
  0xa5   : > { %3994 = vmatprep.subr.bf16.mxu0 %v4447_v55  ;;  %v2324_v53 = vpack.c.bf16 %v3352_v46, %v3351_v35  ;;  %v3246_v35 = vld [vmem:[%s4646_s8 + $0x111] sm:$0xff]  ;;  %v3405_v46 = vld [vmem:[%s4646_s8 + $0x122] sm:$0xff] }
  0xa6   : > { %3739 = vmatmul.mubr.bf16.gmra.mrb[28].mxu1 %v5014_v56 }
  0xa7   : > { %3963 = vmatmul.mubr.bf16.gmra.mrb[12].mxu0 %v4958_v14  ;;  %3758 = vmatprep.mubr.bf16.mxu1 %v794_v57  ;;  %v3358_v57 = vld [vmem:[%s4646_s8 + $0xc9] sm:$0xff] }
  0xa8   : > { %3966 = vmatprep.mubr.bf16.mxu0 %v4960_v15  ;;  %3995 = vmatpush3.bf16.msra.mxu0 %v4447_v55  ;;  %v2325_v55 = vpack.c.bf16 %v3354_v48, %v3353_v47  ;;  %v3406_v47 = vld [vmem:[%s4646_s8 + $0x12a] sm:$0xff] }
  0xa9   : > { %3996 = vmatprep.subr.bf16.mxu0 %v4449_v60 }
  0xac   : > { %3997 = vmatpush3.bf16.msra.mxu0 %v4449_v60  ;;  %v4458_v60 = vld [vmem:[%s5354_s2 + $0x220] sm:$0xff]  }
  0xad   : > { %4030 = vmatprep.subr.bf16.mxu0 %v4451_v62 }
  0xae   : > { %3759 = vmatmul.mubr.bf16.vlgmr.msra.gmra.mrb[0].mxu1 %v4731_v59  ;;  %v4448_v59 = vld [vmem:[%s5354_s2 + $0xd8] sm:$0xff]  }
  0xaf   : > { %3967 = vmatmul.mubr.bf16.gmra.mrb[16].mxu0 %v4978_v29  ;;  %3791 = vmatpush3.bf16.msra.mxu1 %v4956_v13 }
  0xb0   : > { %3762 = vmatprep.mubr.bf16.mxu1 %v4759_v9  ;;  %3970 = vmatprep.mubr.bf16.mxu0 %v4980_v30  ;;  %v3333_v9 = vld [vmem:[%s4646_s8 + $0x180] sm:$0xff] }
  0xb1   : > { %3792 = vmatprep.subr.bf16.mxu1 %v4444_v63  ;;  %v5048_v13 = vpack.c.bf16 %v3334_v6, %v3333_v9  ;;  %v3392_v6 = vld [vmem:[%s4646_s8 + $0x82] sm:$0xff] }
  0xb3   : > { %3793 = vmatpush3.bf16.msra.mxu1 %v4444_v63  ;;  %v4459_v63 = vld [vmem:[%s5354_s2 + $0x228] sm:$0xff]  }
  0xb4   : > { %3794 = vmatprep.subr.bf16.mxu1 %v4446_v0 }
  0xb6   : > { %3763 = vmatmul.mubr.bf16.gmra.mrb[4].mxu1 %v4763_v11  ;;  %v4452_v11 = vld [vmem:[%s5354_s2 + $0xe8] sm:$0xff]  }
  0xb7   : > { %3971 = vmatmul.mubr.bf16.gmra.mrb[20].mxu0 %v4996_v40  ;;  %3766 = vmatprep.mubr.bf16.mxu1 %v4786_v23  ;;  %v3335_v23 = vld [vmem:[%s4646_s8 + $0x198] sm:$0xff] }
  0xb8   : > { %3974 = vmatprep.mubr.bf16.mxu0 %v4998_v41  ;;  %3795 = vmatpush3.bf16.msra.mxu1 %v4446_v0  ;;  %v2031_v19 = vpack.c.bf16 %v3336_v16, %v3335_v23  ;;  %v3390_v0 = vld [vmem:[%s4646_s8 + $0x6a] sm:$0xff] }
  0xb9   : > { %3796 = vmatprep.subr.bf16.mxu1 %v4448_v59 }
  0xbc   : > { %3797 = vmatpush3.bf16.msra.mxu1 %v4448_v59  ;;  %v4469_v59 = vld [vmem:[%s5354_s2 + $0x138] sm:$0xff]  }
  0xbd   : > { %3798 = vmatprep.subr.bf16.mxu1 %v4450_v12 }
  0xbe   : > { %3767 = vmatmul.mubr.bf16.gmra.mrb[8].mxu1 %v4790_v25  ;;  %v4454_v25 = vld [vmem:[%s5354_s2 + $0xf0] sm:$0xff]  }
  0xbf   : > { %3975 = vmatmul.mubr.bf16.gmra.mrb[24].mxu0 %v5014_v56  ;;  %3770 = vmatprep.mubr.bf16.mxu1 %v4812_v37  ;;  %v4456_v37 = vld [vmem:[%s5354_s2 + $0xf8] sm:$0xff]  }
  0xc0   : > { %3978 = vmatprep.mubr.bf16.mxu0 %v5048_v13  ;;  %3799 = vmatpush3.bf16.msra.mxu1 %v4450_v12  ;;  %v3393_v12 = vld [vmem:[%s4646_s8 + $0x92] sm:$0xff] }
  0xc1   : > { %3800 = vmatprep.subr.bf16.mxu1 %v4452_v11 }
  0xc4   : > { %3801 = vmatpush3.bf16.msra.mxu1 %v4452_v11  ;;  %v3394_v11 = vld [vmem:[%s4646_s8 + $0x9a] sm:$0xff] }
  0xc5   : > { %3802 = vmatprep.subr.bf16.mxu1 %v4454_v25  ;;  %v2630_v16 = vpack.c.bf16 %v3394_v11, %v3393_v12 }
  0xc6   : > { %3771 = vmatmul.mubr.bf16.gmra.mrb[12].mxu1 %v4816_v39  ;;  %v4453_v39 = vld [vmem:[%s5354_s2 + $0x208] sm:$0xff]  }
  0xc7   : > { %3979 = vmatmul.mubr.bf16.gmra.mrb[28].mxu0 %v2031_v19  ;;  %3774 = vmatprep.mubr.bf16.mxu1 %v4838_v52  ;;  %v4462_v52 = vld [vmem:[%s5354_s2 + $0x100] sm:$0xff]   ;;  %v2632_v19 = vpack.c.bf16 %v3398_v18, %v3397_v17 }
  0xc8   : > { %3998 = vmatprep.mubr.bf16.mxu0 %v2321_v20  ;;  %3803 = vmatpush3.bf16.msra.mxu1 %v4454_v25  ;;  %v3241_v20 = vld [vmem:[%s4646_s8 + $0xd9] sm:$0xff] }
  0xc9   : > { %3804 = vmatprep.subr.bf16.mxu1 %v4456_v37 }
  0xcc   : > { %3805 = vmatpush3.bf16.msra.mxu1 %v4456_v37  ;;  %v3242_v37 = vld [vmem:[%s4646_s8 + $0xe1] sm:$0xff] }
  0xcd   : > { %4078 = vmatprep.subr.bf16.mxu1 %v4462_v52 }
  0xce   : > { %3775 = vmatmul.mubr.bf16.gmra.mrb[16].mxu1 %v4840_v54  ;;  %v4457_v54 = vld [vmem:[%s5354_s2 + $0x218] sm:$0xff]  }
  0xcf   : > { %3999 = vmatmul.mubr.bf16.vlgmr.msra.gmra.mrb[0].mxu0 %v2322_v33  ;;  %3778 = vmatprep.mubr.bf16.mxu1 %v4863_v3  ;;  %v3357_v3 = vld [vmem:[%s4646_s8 + $0xc1] sm:$0xff]  ;;  %v3244_v33 = vld [vmem:[%s4646_s8 + $0xf9] sm:$0xff] }
  0xd0   : > { %4031 = vmatpush3.bf16.msra.mxu0 %v4451_v62  ;;  %4002 = vmatprep.mubr.bf16.mxu0 %v2323_v34  ;;  %v2327_v62 = vpack.c.bf16 %v3358_v57, %v3357_v3  ;;  %v3403_v34 = vld [vmem:[%s4646_s8 + $0x10a] sm:$0xff]  ;;  %v3407_v3 = vld [vmem:[%s4646_s8 + $0x13a] sm:$0xff]  ;;  %v3408_v57 = vld [vmem:[%s4646_s8 + $0x142] sm:$0xff] }
  0xd1   : > { %4032 = vmatprep.subr.bf16.mxu0 %v4453_v39 }
  0xd4   : > { %4033 = vmatpush3.bf16.msra.mxu0 %v4453_v39  ;;  %v3404_v39 = vld [vmem:[%s4646_s8 + $0x112] sm:$0xff] }
  0xd5   : > { %4034 = vmatprep.subr.bf16.mxu0 %v4455_v50  ;;  %v2635_v48 = vpack.c.bf16 %v3404_v39, %v3403_v34 }
  0xd6   : > { %3779 = vmatmul.mubr.bf16.gmra.mrb[20].mxu1 %v4867_v5  ;;  %v4460_v5 = vld [vmem:[%s5354_s2 + $0x230] sm:$0xff]  }
  0xd7   : > { %4003 = vmatmul.mubr.bf16.gmra.mrb[4].mxu0 %v2324_v53  ;;  %3782 = vmatprep.mubr.bf16.mxu1 %v4891_v8  ;;  %v4461_v8 = vld [vmem:[%s5354_s2 + $0x238] sm:$0xff]   ;;  %v2636_v53 = vpack.c.bf16 %v3406_v47, %v3405_v46 }
  0xd8   : > { %4006 = vmatprep.mubr.bf16.mxu0 %v2325_v55  ;;  %4035 = vmatpush3.bf16.msra.mxu0 %v4455_v50  ;;  %v3247_v55 = vld [vmem:[%s4646_s8 + $0x121] sm:$0xff] }
  0xd9   : > { %4036 = vmatprep.subr.bf16.mxu0 %v4457_v54 }
  0xdc   : > { %4037 = vmatpush3.bf16.msra.mxu0 %v4457_v54  ;;  %v3248_v54 = vld [vmem:[%s4646_s8 + $0x129] sm:$0xff] }
  0xdd   : > { %4038 = vmatprep.subr.bf16.mxu0 %v4458_v60 }
  0xde   : > { %3783 = vmatmul.mubr.bf16.gmra.mrb[24].mxu1 %v4895_v27  ;;  %v4467_v27 = vld [vmem:[%s5354_s2 + $0x128] sm:$0xff]  }
  0xdf   : > { %4007 = vmatmul.mubr.bf16.gmra.mrb[8].mxu0 %v4712_v49  ;;  %3786 = vmatprep.mubr.bf16.mxu1 %v4917_v43  ;;  %v4463_v49 = vld [vmem:[%s5354_s2 + $0x108] sm:$0xff]   ;;  %v4468_v43 = vld [vmem:[%s5354_s2 + $0x130] sm:$0xff]  }
  0xe0   : > { %4010 = vmatprep.mubr.bf16.mxu0 %v2327_v62  ;;  %4039 = vmatpush3.bf16.msra.mxu0 %v4458_v60  ;;  %v3249_v60 = vld [vmem:[%s4646_s8 + $0x139] sm:$0xff]  ;;  %v3250_v62 = vld [vmem:[%s4646_s8 + $0x141] sm:$0xff] }
  0xe1   : > { %4040 = vmatprep.subr.bf16.mxu0 %v4459_v63 }
  0xe4   : > { %4041 = vmatpush3.bf16.msra.mxu0 %v4459_v63  ;;  %v3409_v63 = vld [vmem:[%s4646_s8 + $0x152] sm:$0xff] }
  0xe5   : > { %4042 = vmatprep.subr.bf16.mxu0 %v4460_v5 }
  0xe6   : > { %3787 = vmatmul.mubr.bf16.gmra.mrb[28].mxu1 %v4921_v45  ;;  %v3388_v45 = vld [vmem:[%s4646_s8 + $0x52] sm:$0xff] }
  0xe7   : > { %4011 = vmatmul.mubr.bf16.gmra.mrb[12].mxu0 %v4752_v7  ;;  %3806 = vmatprep.mubr.bf16.mxu1 %v4861_v2  ;;  %v4464_v7 = vld [vmem:[%s5354_s2 + $0x110] sm:$0xff]  }
  0xe8   : > { %4014 = vmatprep.mubr.bf16.mxu0 %v4761_v10  ;;  %4043 = vmatpush3.bf16.msra.mxu0 %v4460_v5  ;;  %v3373_v10 = vld [vmem:[%s4646_s8 + $0x181] sm:$0xff] }
  0xe9   : > { %4044 = vmatprep.subr.bf16.mxu0 %v4461_v8  ;;  %v3410_v5 = vld [vmem:[%s4646_s8 + $0x15a] sm:$0xff] }
  0xec   : > { %4045 = vmatpush3.bf16.msra.mxu0 %v4461_v8  ;;  %v1416_v8 = vpack.c.bf16 %v3248_v54, %v3247_v55 }
  0xee   : > { %3807 = vmatmul.mubr.bf16.vlgmr.msra.gmra.mrb[0].mxu1 %v4865_v4  ;;  %v3376_v4 = vld [vmem:[%s4646_s8 + $0x1a1] sm:$0xff] }
  0xef   : > { %4015 = vmatmul.mubr.bf16.gmra.mrb[16].mxu0 %v4784_v22  ;;  %4086 = vmatpush3.bf16.msra.mxu1 %v4462_v52  ;;  %v3374_v22 = vld [vmem:[%s4646_s8 + $0x189] sm:$0xff] }
  0xf0   : > { %3810 = vmatprep.mubr.bf16.mxu1 %v4889_v21  ;;  %4018 = vmatprep.mubr.bf16.mxu0 %v4788_v24  ;;  %v4465_v24 = vld [vmem:[%s5354_s2 + $0x118] sm:$0xff]   ;;  %v5133_v2 = vpack.c.bf16 %v3374_v22, %v3373_v10  ;;  %v3245_v52 = vld [vmem:[%s4646_s8 + $0x109] sm:$0xff]  ;;  %v2638_v10 = vpack.c.bf16 %v3410_v5, %v3409_v63 }
  0xf1   : > { %4079 = vmatprep.subr.bf16.mxu1 %v4463_v49  ;;  %v3385_v21 = vld [vmem:[%s4646_s8 + $0x32] sm:$0xff]  ;;  %v1415_v50 = vpack.c.bf16 %v3246_v35, %v3245_v52 }
  0xf2   : > { %v3251_v22 = vld [vmem:[%s4646_s8 + $0x151] sm:$0xff] }
  0xf3   : > { %4087 = vmatpush3.bf16.msra.mxu1 %v4463_v49  ;;  %v2637_v49 = vpack.c.bf16 %v3408_v57, %v3407_v3 }
  0xf4   : > { %4080 = vmatprep.subr.bf16.mxu1 %v4464_v7 }
  0xf6   : > { %3811 = vmatmul.mubr.bf16.gmra.mrb[4].mxu1 %v4893_v26  ;;  %v3386_v26 = vld [vmem:[%s4646_s8 + $0x3a] sm:$0xff] }
  0xf7   : > { %4019 = vmatmul.mubr.bf16.gmra.mrb[20].mxu0 %v4810_v36  ;;  %3814 = vmatprep.mubr.bf16.mxu1 %v4915_v42  ;;  %v4466_v36 = vld [vmem:[%s5354_s2 + $0x120] sm:$0xff]  }
  0xf8   : > { %4022 = vmatprep.mubr.bf16.mxu0 %v4814_v38  ;;  %4088 = vmatpush3.bf16.msra.mxu1 %v4464_v7  ;;  %v3375_v38 = vld [vmem:[%s4646_s8 + $0x199] sm:$0xff]  ;;  %v1417_v7 = vpack.c.bf16 %v3250_v62, %v3249_v60 }
  0xf9   : > { %4081 = vmatprep.subr.bf16.mxu1 %v4465_v24  ;;  %v2336_v42 = vpack.c.bf16 %v3376_v4, %v3375_v38  ;;  %v3412_v38 = vld [vmem:[%s4646_s8 + $0x172] sm:$0xff]  ;;  %v3253_v4 = vld [vmem:[%s4646_s8 + $0x169] sm:$0xff] }
  0xfc   : > { %4089 = vmatpush3.bf16.msra.mxu1 %v4465_v24  ;;  %v3252_v24 = vld [vmem:[%s4646_s8 + $0x159] sm:$0xff] }
  0xfd   : > { %4082 = vmatprep.subr.bf16.mxu1 %v4466_v36 }
  0xfe   : > { %3815 = vmatmul.mubr.bf16.gmra.mrb[8].mxu1 %v4919_v44  ;;  %v3387_v44 = vld [vmem:[%s4646_s8 + $0x4a] sm:$0xff] }
  0xff   : > { %4023 = vmatmul.mubr.bf16.gmra.mrb[24].mxu0 %v4836_v51  ;;  %3818 = vmatprep.mubr.bf16.mxu1 %v4939_v58  ;;  %v2626_v51 = vpack.c.bf16 %v3386_v26, %v3385_v21  ;;  %v3389_v58 = vld [vmem:[%s4646_s8 + $0x62] sm:$0xff]  ;;  %v2627_v9 = vpack.c.bf16 %v3388_v45, %v3387_v44  ;;  %v3254_v21 = vld [vmem:[%s4646_s8 + $0x171] sm:$0xff]  ;;  %v3415_v45 = vld [vmem:[%s4646_s8 + $0x19a] sm:$0xff] }
 0x100   : > { %4026 = vmatprep.mubr.bf16.mxu0 %v5133_v2  ;;  %4090 = vmatpush3.bf16.msra.mxu1 %v4466_v36  ;;  %v3411_v36 = vld [vmem:[%s4646_s8 + $0x16a] sm:$0xff]  ;;  %v3413_v26 = vld [vmem:[%s4646_s8 + $0x182] sm:$0xff] }
 0x101   : > { %4083 = vmatprep.subr.bf16.mxu1 %v4467_v27 }
 0x104   : > { %4091 = vmatpush3.bf16.msra.mxu1 %v4467_v27  ;;  %v3414_v27 = vld [vmem:[%s4646_s8 + $0x18a] sm:$0xff] }
 0x105   : > { %4084 = vmatprep.subr.bf16.mxu1 %v4468_v43  ;;  %v2640_v44 = vpack.c.bf16 %v3414_v27, %v3413_v26 }
 0x106   : > { %3819 = vmatmul.mubr.bf16.gmra.mrb[12].mxu1 %v4941_v61  ;;  %v2628_v61 = vpack.c.bf16 %v3390_v0, %v3389_v58  ;;  %v3416_v58 = vld [vmem:[%s4646_s8 + $0x1a2] sm:$0xff] }
 0x107   : > { %4027 = vmatmul.mubr.bf16.gmra.mrb[28].mxu0 %v2336_v42  ;;  %3822 = vmatprep.mubr.bf16.mxu1 %v4958_v14  ;;  %v3391_v14 = vld [vmem:[%s4646_s8 + $0x7a] sm:$0xff]  ;;  %v1418_v42 = vpack.c.bf16 %v3252_v24, %v3251_v22  ;;  %v2641_v0 = vpack.c.bf16 %v3416_v58, %v3415_v45 }
 0x108   : > { %4046 = vmatprep.mubr.bf16.mxu0 %v2626_v51  ;;  %4092 = vmatpush3.bf16.msra.mxu1 %v4468_v43  ;;  %v2629_v23 = vpack.c.bf16 %v3392_v6, %v3391_v14  ;;  %v2639_v51 = vpack.c.bf16 %v3412_v38, %v3411_v36  ;;  %v1419_v43 = vpack.c.bf16 %v3254_v21, %v3253_v4 }
 0x109   : > { %4085 = vmatprep.subr.bf16.mxu1 %v4469_v59 }
 0x10c   : > { %4093 = vmatpush3.bf16.msra.mxu1 %v4469_v59 }
 0x10e   : > { %3823 = vmatmul.mubr.bf16.gmra.mrb[16].mxu1 %v4960_v15  ;;  %v3395_v15 = vld [vmem:[%s4646_s8 + $0xaa] sm:$0xff] }
 0x10f   : > { %4047 = vmatmul.mubr.bf16.vlgmr.msra.gmra.mrb[0].mxu0 %v2627_v9  ;;  %3826 = vmatprep.mubr.bf16.mxu1 %v4978_v29  ;;  %v3396_v29 = vld [vmem:[%s4646_s8 + $0xb2] sm:$0xff] }
 0x110   : > { %4050 = vmatprep.mubr.bf16.mxu0 %v2628_v61  ;;  %v2631_v25 = vpack.c.bf16 %v3396_v29, %v3395_v15 }
 0x116   : > { %3827 = vmatmul.mubr.bf16.gmra.mrb[20].mxu1 %v4980_v30  ;;  %v3399_v30 = vld [vmem:[%s4646_s8 + $0xda] sm:$0xff] }
 0x117   : > { %4051 = vmatmul.mubr.bf16.gmra.mrb[4].mxu0 %v2629_v23  ;;  %3830 = vmatprep.mubr.bf16.mxu1 %v4996_v40  ;;  %v3400_v40 = vld [vmem:[%s4646_s8 + $0xe2] sm:$0xff] }
 0x118   : > { %4054 = vmatprep.mubr.bf16.mxu0 %v2630_v16  ;;  %v2633_v31 = vpack.c.bf16 %v3400_v40, %v3399_v30  ;;  %v5232_v40 = vld [vmem:[%s5355_s3] ss:$0 sm:$0xff] }
 0x11e   : > { %3831 = vmatmul.mubr.bf16.gmra.mrb[24].mxu1 %v4998_v41  ;;  %v1413_v41 = vpack.c.bf16 %v3242_v37, %v3241_v20 }
 0x11f   : > { %4055 = vmatmul.mubr.bf16.gmra.mrb[8].mxu0 %v2631_v25  ;;  %3834 = vmatprep.mubr.bf16.mxu1 %v5014_v56  ;;  %v3243_v56 = vld [vmem:[%s4646_s8 + $0xf1] sm:$0xff]  ;;  %s3429_s8 = sshll.u32 %s4628_s13, 8  ;;  %s203_s13 = sand.u32 1, %s4524_s16  }
 0x120   : > { %4058 = vmatprep.mubr.bf16.mxu0 %v2632_v19  ;;  %s5227_s23 = scalar_lea.vmem %s5353_s1, %s3429_s8  ;;  %s204_s30 = scalar_lea.vmem [#allocation2], %s203_s13 }
 0x121   : > { %v2900_v35 = vld [vmem:[%s5227_s23 + $0x8] sm:$0xff]  ;;  %v2902_v47 = vld [vmem:[%s5227_s23 + $0x18] sm:$0xff]  ;;  %v2905_v4 = vld [vmem:[%s5227_s23 + $0x30] sm:$0xff]  ;;  %s3087_s5 = sshll.u32 %s204_s30, 4  ;;  %s3075_s10 = scalar_lea.sflag [#allocation3], %s203_s13  ;;  %s5312_s5 = int_to_ptr.vmem [resolvable:$true] %s3087_s5 }
 0x122   : > { %v2904_v21 = vld [vmem:[%s5227_s23 + $0x28] sm:$0xff]  ;;  %s4470_s11 = scalar_lea.vmem %s5312_s5, 16  ;;  %p4477_p0 = scmp.lt.s32.totalorder %s5312_s5, %s4475_s12 }
 0x123   : > { %p4471_p11 = scmp.ne.s32.totalorder %s5312_s5, %s4470_s11  ;;  %p4478_p1 = scmp.lt.s32.totalorder %s4476_s14, %s4470_s11 }
 0x125   : > { %p4472_p12 = pnand %p4471_p11, %p4598_p5  ;;  %p4479_p2 = por %p4478_p1, %p4477_p0 }
 0x126   : > { %3835 = vmatmul.mubr.bf16.gmra.mrb[28].mxu1 %v5048_v13  ;;  %v1414_v13 = vpack.c.bf16 %v3244_v33, %v3243_v56  ;;  %v2901_v33 = vld [vmem:[%s5227_s23 + $0x10] sm:$0xff] }
 0x127   : > { %4059 = vmatmul.mubr.bf16.gmra.mrb[12].mxu0 %v2633_v31  ;;  %3870 = vmatprep.mubr.bf16.mxu1 %v1413_v41  ;;  %v2899_v41 = vld [vmem:[%s5227_s23] sm:$0xff]  ;;  %p4473_p13 = pneg %p4472_p12 }
 0x128   : > { %4062 = vmatprep.mubr.bf16.mxu0 %v2634_v32 }
 0x129   : > { %p4480_p3 = pnand %p4479_p2, %p4473_p13 }
 0x12e   : > { %3871 = vmatmul.mubr.bf16.vlgmr.msra.gmra.mrb[16].mxu1 %v1414_v13 }
 0x12f   : > { %4063 = vmatmul.mubr.bf16.gmra.mrb[16].mxu0 %v2635_v48  ;;  %3874 = vmatprep.mubr.bf16.mxu1 %v1415_v50 }
 0x130   : > { %4066 = vmatprep.mubr.bf16.mxu0 %v2636_v53 }
 0x136   : > { %3875 = vmatmul.mubr.bf16.gmra.mrb[20].mxu1 %v1416_v8  ;;  %v2903_v8 = vld [vmem:[%s5227_s23 + $0x20] sm:$0xff] }
 0x137   : > { %4067 = vmatmul.mubr.bf16.gmra.mrb[20].mxu0 %v2637_v49  ;;  %3878 = vmatprep.mubr.bf16.mxu1 %v1417_v7 }
 0x138   : > { %4070 = vmatprep.mubr.bf16.mxu0 %v2638_v10 }
 0x13e   : > { %3879 = vmatmul.mubr.bf16.gmra.mrb[24].mxu1 %v1418_v42 }
 0x13f   : > { %4071 = vmatmul.mubr.bf16.gmra.mrb[24].mxu0 %v2639_v51  ;;  %3882 = vmatprep.mubr.bf16.mxu1 %v1419_v43  ;;  %v2906_v43 = vld [vmem:[%s5227_s23 + $0x38] sm:$0xff] }
 0x140   : > { %4074 = vmatprep.mubr.bf16.mxu0 %v2640_v44 }
 0x146   : > { %3883 = vmatmul.mubr.bf16.gmra.mrb[28].mxu1 %v5133_v2 }
 0x147   : > { %4075 = vmatmul.mubr.bf16.gmra.mrb[28].mxu0 %v2641_v0 }
 0x1c1   : > { %v3808_v59 = vpop.f32.mrb[0].mxu1 }
 0x1c2   : > { %v1214_v9 = vpop.f32.mrb[1].mxu1 }
 0x1c3   : > { %v3809_v61 = vpop.f32.mrb[2].mxu1 }
 0x1c4   : > { %v1217_v14 = vpop.f32.mrb[3].mxu1 }
 0x1c9   : > { %v3812_v6 = vpop.f32.mrb[4].mxu1 }
 0x1ca   : > { %v1230_v12 = vpop.f32.mrb[5].mxu1 }
 0x1cb   : > { %v3813_v11 = vpop.f32.mrb[6].mxu1 }
 0x1cc   : > { %v1233_v23 = vpop.f32.mrb[7].mxu1 }
 0x1d1   : > { %v3816_v16 = vpop.f32.mrb[8].mxu1 }
 0x1d2   : > { %v5209_v15 = vpop.f32.mrb[9].mxu1 }
 0x1d3   : > { %v5211_v29 = vpop.f32.mrb[10].mxu1 }
 0x1d4   : > { %v5213_v17 = vpop.f32.mrb[11].mxu1 }
 0x1d9   : > { %v5215_v18 = vpop.f32.mrb[12].mxu1 }
 0x1da   : > { %v5217_v2 = vpop.f32.mrb[13].mxu1 }
 0x1db   : > { %v5219_v25 = vpop.f32.mrb[14].mxu1 }
 0x1dc   : > { %v5221_v19 = vpop.f32.mrb[15].mxu1 }
 0x1e2   : > { %v4048_v30 = vpop.f32.mrb[0].mxu0 }
 0x1e3   : > { %v4094_v20 = vadd.f32 %v4048_v30, %v3808_v59  ;;  %v2740_v37 = vpop.f32.mrb[1].mxu0 }
 0x1e4   : > { %v4095_v28 = vadd.f32 %v2740_v37, %v1214_v9  ;;  %v4049_v1 = vpop.f32.mrb[2].mxu0 }
 0x1e5   : > { %v2940_v31 = vadd.f32 %v4094_v20, %v5232_v40  ;;  %v4096_v32 = vadd.f32 %v4049_v1, %v3809_v61  ;;  %v2743_v56 = vpop.f32.mrb[3].mxu0  ;;  %v2907_v20 = vld [vmem:[%s5227_s23 + $0x40] sm:$0xff] }
 0x1e6   : > { %v2938_v34 = vadd.f32 %v4095_v28, %v5232_v40  ;;  %v4097_v39 = vadd.f32 %v2743_v56, %v1217_v14 }
 0x1e7   : > { %v2941_v52 = vadd.f32 %v4096_v32, %v5232_v40  ;;  %v2972_v48 = vadd.f32 %v2940_v31, %v2901_v33  ;;  %v2908_v33 = vld [vmem:[%s5227_s23 + $0x48] sm:$0xff] }
 0x1e8   : > { %v2970_v46 = vadd.f32 %v2938_v34, %v2899_v41  ;;  %v2939_v13 = vadd.f32 %v4097_v39, %v5232_v40  ;;  %v2909_v41 = vld [vmem:[%s5227_s23 + $0x50] sm:$0xff] }
 0x1e9   : > { %v2973_v55 = vadd.f32 %v2941_v52, %v2902_v47  ;;  %v3004_v5 = vmax.f32 %v2972_v48, 0.0  ;;  %v2910_v52 = vld [vmem:[%s5227_s23 + $0x58] sm:$0xff] }
 0x1ea   : > { %v2971_v50 = vadd.f32 %v2939_v13, %v2900_v35  ;;  %v4052_v53 = vpop.f32.mrb[4].mxu0  ;;  %v3002_v57 = vmax.f32 %v2970_v46, 0.0 }
 0x1eb   : > { %v4098_v54 = vadd.f32 %v4052_v53, %v3812_v6  ;;  %v2756_v3 = vpop.f32.mrb[5].mxu0  ;;  %v3005_v38 = vmax.f32 %v2973_v55, 0.0 }
 0x1ec   : > { %v3003_v60 = vmax.f32 %v2971_v50, 0.0  ;;  %v4099_v62 = vadd.f32 %v2756_v3, %v1230_v12  ;;  %v4053_v63 = vpop.f32.mrb[6].mxu0 }
 0x1ed   : > { %v4100_v49 = vadd.f32 %v4053_v63, %v3813_v11  ;;  %v2759_v7 = vpop.f32.mrb[7].mxu0  ;;  %v2944_v22 = vadd.f32 %v4098_v54, %v5232_v40 }
 0x1ee   : > { %v3034_v10 = vadd.f32 %v3003_v60, %v3002_v57  ;;  %v2942_v24 = vadd.f32 %v4099_v62, %v5232_v40  ;;  %v4101_v36 = vadd.f32 %v2759_v7, %v1233_v23  ;;  %v2911_v62 = vld [vmem:[%s5227_s23 + $0x60] sm:$0xff] }
 0x1ef   : > { %v2945_v42 = vadd.f32 %v4100_v49, %v5232_v40  ;;  %v2976_v44 = vadd.f32 %v2944_v22, %v2905_v4  ;;  %v2913_v22 = vld [vmem:[%s5227_s23 + $0x70] sm:$0xff] }
 0x1f0   : > { %v3035_v26 = vadd.f32 %v3034_v10, %v3004_v5  ;;  %v2974_v27 = vadd.f32 %v2942_v24, %v2903_v8  ;;  %v2943_v51 = vadd.f32 %v4101_v36, %v5232_v40  ;;  %v2912_v24 = vld [vmem:[%s5227_s23 + $0x68] sm:$0xff] }
 0x1f1   : > { %v2977_v6 = vadd.f32 %v2945_v42, %v2906_v43  ;;  %v3008_v1 = vmax.f32 %v2976_v44, 0.0 }
 0x1f2   : > { %v3006_v45 = vmax.f32 %v2974_v27, 0.0  ;;  %v3036_v58 = vadd.f32 %v3035_v26, %v3005_v38  ;;  %v2975_v0 = vadd.f32 %v2943_v51, %v2904_v21  ;;  %v4056_v59 = vpop.f32.mrb[8].mxu0  ;;  %v2914_v21 = vld [vmem:[%s5227_s23 + $0x78] sm:$0xff] }
 0x1f3   : > { %v4102_v9 = vadd.f32 %v4056_v59, %v3816_v16  ;;  %v2772_v61 = vpop.f32.mrb[9].mxu0  ;;  %v3009_v34 = vmax.f32 %v2977_v6, 0.0 }
 0x1f4   : > { %v3037_v14 = vadd.f32 %v3036_v58, %v3006_v45  ;;  %v3007_v12 = vmax.f32 %v2975_v0, 0.0  ;;  %v4103_v11 = vadd.f32 %v2772_v61, %v5209_v15  ;;  %v4057_v23 = vpop.f32.mrb[10].mxu0 }
 0x1f5   : > { %v2948_v30 = vadd.f32 %v4102_v9, %v5232_v40  ;;  %v4104_v37 = vadd.f32 %v4057_v23, %v5211_v29  ;;  %v2775_v28 = vpop.f32.mrb[11].mxu0 }
 0x1f6   : > { %v3038_v31 = vadd.f32 %v3037_v14, %v3007_v12  ;;  %v2946_v16 = vadd.f32 %v4103_v11, %v5232_v40  ;;  %v4105_v32 = vadd.f32 %v2775_v28, %v5213_v17  ;;  %v2915_v11 = vld [vmem:[%s5227_s23 + $0x80] sm:$0xff]  ;;  %v2917_v28 = vld [vmem:[%s5227_s23 + $0x90] sm:$0xff] }
 0x1f7   : > { %v2949_v56 = vadd.f32 %v4104_v37, %v5232_v40  ;;  %v2980_v46 = vadd.f32 %v2948_v30, %v2909_v41 }
 0x1f8   : > { %v3039_v15 = vadd.f32 %v3038_v31, %v3008_v1  ;;  %v2978_v39 = vadd.f32 %v2946_v16, %v2907_v20  ;;  %v2947_v35 = vadd.f32 %v4105_v32, %v5232_v40  ;;  %v2916_v16 = vld [vmem:[%s5227_s23 + $0x88] sm:$0xff] }
 0x1f9   : > { %v2981_v50 = vadd.f32 %v2949_v56, %v2910_v52  ;;  %v3012_v60 = vmax.f32 %v2980_v46, 0.0 }
 0x1fa   : > { %v3010_v29 = vmax.f32 %v2978_v39, 0.0  ;;  %v3040_v47 = vadd.f32 %v3039_v15, %v3009_v34  ;;  %v2979_v13 = vadd.f32 %v2947_v35, %v2908_v33  ;;  %v4060_v48 = vpop.f32.mrb[12].mxu0  ;;  %v2918_v34 = vld [vmem:[%s5227_s23 + $0x98] sm:$0xff] }
 0x1fb   : > { %v4106_v53 = vadd.f32 %v4060_v48, %v5215_v18  ;;  %v2788_v17 = vpop.f32.mrb[13].mxu0  ;;  %v3013_v10 = vmax.f32 %v2981_v50, 0.0 }
 0x1fc   : > { %v3041_v55 = vadd.f32 %v3040_v47, %v3010_v29  ;;  %v3011_v54 = vmax.f32 %v2979_v13, 0.0  ;;  %v4107_v3 = vadd.f32 %v2788_v17, %v5217_v2  ;;  %v4061_v57 = vpop.f32.mrb[14].mxu0 }
 0x1fd   : > { %v4108_v63 = vadd.f32 %v4061_v57, %v5219_v25  ;;  %v2791_v5 = vpop.f32.mrb[15].mxu0  ;;  %v2952_v49 = vadd.f32 %v4106_v53, %v5232_v40 }
 0x1fe   : > { %v3042_v8 = vadd.f32 %v3041_v55, %v3011_v54  ;;  %v2950_v7 = vadd.f32 %v4107_v3, %v5232_v40  ;;  %v4109_v18 = vadd.f32 %v2791_v5, %v5221_v19 }
 0x1ff   : > { %v2953_v2 = vadd.f32 %v4108_v63, %v5232_v40  ;;  %v2984_v25 = vadd.f32 %v2952_v49, %v2913_v22  ;;  %v2919_v63 = vld [vmem:[%s5227_s23 + $0xa0] sm:$0xff] }
 0x200   : > { %v3043_v36 = vadd.f32 %v3042_v8, %v3012_v60  ;;  %v2982_v38 = vadd.f32 %v2950_v7, %v2911_v62  ;;  %v2951_v4 = vadd.f32 %v4109_v18, %v5232_v40 }
 0x201   : > { %v3872_v26 = vpop.f32.mrb[16].mxu1  ;;  %v2985_v59 = vadd.f32 %v2953_v2, %v2914_v21  ;;  %v3016_v20 = vmax.f32 %v2984_v25, 0.0 }
 0x202   : > { %v3014_v27 = vmax.f32 %v2982_v38, 0.0  ;;  %v3044_v42 = vadd.f32 %v3043_v36, %v3013_v10  ;;  %v2983_v51 = vadd.f32 %v2951_v4, %v2912_v24  ;;  %v4064_v43 = vpop.f32.mrb[16].mxu0  ;;  %v1583_v44 = vpop.f32.mrb[17].mxu1  ;;  %v2921_v24 = vld [vmem:[%s5227_s23 + $0xb0] sm:$0xff]  ;;  %v2920_v36 = vld [vmem:[%s5227_s23 + $0xa8] sm:$0xff] }
 0x203   : > { %v4110_v19 = vadd.f32 %v4064_v43, %v3872_v26  ;;  %v2804_v45 = vpop.f32.mrb[17].mxu0  ;;  %v3873_v58 = vpop.f32.mrb[18].mxu1  ;;  %v3017_v32 = vmax.f32 %v2985_v59, 0.0  ;;  %v2922_v26 = vld [vmem:[%s5227_s23 + $0xb8] sm:$0xff] }
 0x204   : > { %v3045_v0 = vadd.f32 %v3044_v42, %v3014_v27  ;;  %v3015_v9 = vmax.f32 %v2983_v51, 0.0  ;;  %v4111_v61 = vadd.f32 %v2804_v45, %v1583_v44  ;;  %v4065_v14 = vpop.f32.mrb[18].mxu0  ;;  %v1586_v6 = vpop.f32.mrb[19].mxu1 }
 0x205   : > { %v2956_v12 = vadd.f32 %v4110_v19, %v5232_v40  ;;  %v4112_v23 = vadd.f32 %v4065_v14, %v3873_v58  ;;  %v2807_v30 = vpop.f32.mrb[19].mxu0 }
 0x206   : > { %v3046_v37 = vadd.f32 %v3045_v0, %v3015_v9  ;;  %v2954_v1 = vadd.f32 %v4111_v61, %v5232_v40  ;;  %v4113_v31 = vadd.f32 %v2807_v30, %v1586_v6 }
 0x207   : > { %v2957_v41 = vadd.f32 %v4112_v23, %v5232_v40  ;;  %v2988_v39 = vadd.f32 %v2956_v12, %v2917_v28  ;;  %v2923_v23 = vld [vmem:[%s5227_s23 + $0xc0] sm:$0xff] }
 0x208   : > { %v3047_v56 = vadd.f32 %v3046_v37, %v3016_v20  ;;  %v2986_v33 = vadd.f32 %v2954_v1, %v2915_v11  ;;  %v2955_v15 = vadd.f32 %v4113_v31, %v5232_v40  ;;  %v2925_v1 = vld [vmem:[%s5227_s23 + $0xd0] sm:$0xff] }
 0x209   : > { %v3876_v52 = vpop.f32.mrb[20].mxu1  ;;  %v2989_v48 = vadd.f32 %v2957_v41, %v2918_v34  ;;  %v3020_v62 = vmax.f32 %v2988_v39, 0.0 }
 0x20a   : > { %v3018_v35 = vmax.f32 %v2986_v33, 0.0  ;;  %v3048_v46 = vadd.f32 %v3047_v56, %v3017_v32  ;;  %v2987_v29 = vadd.f32 %v2955_v15, %v2916_v16  ;;  %v4068_v47 = vpop.f32.mrb[20].mxu0  ;;  %v1599_v13 = vpop.f32.mrb[21].mxu1  ;;  %v2924_v32 = vld [vmem:[%s5227_s23 + $0xc8] sm:$0xff]  ;;  %v2926_v15 = vld [vmem:[%s5227_s23 + $0xd8] sm:$0xff] }
 0x20b   : > { %v4114_v50 = vadd.f32 %v4068_v47, %v3876_v52  ;;  %v2820_v53 = vpop.f32.mrb[21].mxu0  ;;  %v3877_v17 = vpop.f32.mrb[22].mxu1  ;;  %v3021_v22 = vmax.f32 %v2989_v48, 0.0 }
 0x20c   : > { %v3049_v55 = vadd.f32 %v3048_v46, %v3018_v35  ;;  %v3019_v54 = vmax.f32 %v2987_v29, 0.0  ;;  %v4115_v3 = vadd.f32 %v2820_v53, %v1599_v13  ;;  %v4069_v57 = vpop.f32.mrb[22].mxu0  ;;  %v1602_v60 = vpop.f32.mrb[23].mxu1 }
 0x20d   : > { %v4116_v5 = vadd.f32 %v4069_v57, %v3877_v17  ;;  %v2823_v8 = vpop.f32.mrb[23].mxu0  ;;  %v2960_v7 = vadd.f32 %v4114_v50, %v5232_v40 }
 0x20e   : > { %v3050_v49 = vadd.f32 %v3049_v55, %v3019_v54  ;;  %v2958_v18 = vadd.f32 %v4115_v3, %v5232_v40  ;;  %v4117_v10 = vadd.f32 %v2823_v8, %v1602_v60 }
 0x20f   : > { %v2961_v4 = vadd.f32 %v4116_v5, %v5232_v40  ;;  %v2992_v27 = vadd.f32 %v2960_v7, %v2921_v24  ;;  %v2927_v5 = vld [vmem:[%s5227_s23 + $0xe0] sm:$0xff] }
 0x210   : > { %v3051_v38 = vadd.f32 %v3050_v49, %v3020_v62  ;;  %v2990_v2 = vadd.f32 %v2958_v18, %v2919_v63  ;;  %v2959_v21 = vadd.f32 %v4117_v10, %v5232_v40 }
 0x211   : > { %v3880_v25 = vpop.f32.mrb[24].mxu1  ;;  %v2993_v9 = vadd.f32 %v2961_v4, %v2922_v26  ;;  %v3024_v37 = vmax.f32 %v2992_v27, 0.0 }
 0x212   : > { %v3022_v42 = vmax.f32 %v2990_v2, 0.0  ;;  %v3052_v51 = vadd.f32 %v3051_v38, %v3021_v22  ;;  %v2991_v43 = vadd.f32 %v2959_v21, %v2920_v36  ;;  %v4072_v44 = vpop.f32.mrb[24].mxu0  ;;  %v1615_v19 = vpop.f32.mrb[25].mxu1  ;;  %v2929_v36 = vld [vmem:[%s5227_s23 + $0xf0] sm:$0xff]  ;;  %v2928_v38 = vld [vmem:[%s5227_s23 + $0xe8] sm:$0xff] }
 0x213   : > { %v4118_v45 = vadd.f32 %v4072_v44, %v3880_v25  ;;  %v2836_v58 = vpop.f32.mrb[25].mxu0  ;;  %v3881_v0 = vpop.f32.mrb[26].mxu1  ;;  %v3025_v56 = vmax.f32 %v2993_v9, 0.0  ;;  %v2930_v25 = vld [vmem:[%s5227_s23 + $0xf8] sm:$0xff] }
 0x214   : > { %v3053_v59 = vadd.f32 %v3052_v51, %v3022_v42  ;;  %v3023_v61 = vmax.f32 %v2991_v43, 0.0  ;;  %v4119_v14 = vadd.f32 %v2836_v58, %v1615_v19  ;;  %v4073_v6 = vpop.f32.mrb[26].mxu0  ;;  %v1618_v12 = vpop.f32.mrb[27].mxu1 }
 0x215   : > { %v2964_v11 = vadd.f32 %v4118_v45, %v5232_v40  ;;  %v4120_v30 = vadd.f32 %v4073_v6, %v3881_v0  ;;  %v2839_v20 = vpop.f32.mrb[27].mxu0 }
 0x216   : > { %v3054_v28 = vadd.f32 %v3053_v59, %v3023_v61  ;;  %v2962_v31 = vadd.f32 %v4119_v14, %v5232_v40  ;;  %v4121_v41 = vadd.f32 %v2839_v20, %v1618_v12 }
 0x217   : > { %v2965_v16 = vadd.f32 %v4120_v30, %v5232_v40  ;;  %v2996_v52 = vadd.f32 %v2964_v11, %v2925_v1 }
 0x218   : > { %v3055_v33 = vadd.f32 %v3054_v28, %v3024_v37  ;;  %v2994_v34 = vadd.f32 %v2962_v31, %v2923_v23  ;;  %v2963_v39 = vadd.f32 %v4121_v41, %v5232_v40 }
 0x219   : > { %v3884_v35 = vpop.f32.mrb[28].mxu1  ;;  %v2997_v50 = vadd.f32 %v2965_v16, %v2926_v15  ;;  %v3028_v63 = vmax.f32 %v2996_v52, 0.0 }
 0x21a   : > { %v3026_v46 = vmax.f32 %v2994_v34, 0.0  ;;  %v3056_v29 = vadd.f32 %v3055_v33, %v3025_v56  ;;  %v2995_v47 = vadd.f32 %v2963_v39, %v2924_v32  ;;  %v4076_v13 = vpop.f32.mrb[28].mxu0  ;;  %v1631_v48 = vpop.f32.mrb[29].mxu1 }
 0x21b   : > { %v4122_v53 = vadd.f32 %v4076_v13, %v3884_v35  ;;  %v2852_v17 = vpop.f32.mrb[29].mxu0  ;;  %v3885_v55 = vpop.f32.mrb[30].mxu1  ;;  %v3029_v24 = vmax.f32 %v2997_v50, 0.0 }
 0x21c   : > { %v3057_v54 = vadd.f32 %v3056_v29, %v3026_v46  ;;  %v3027_v3 = vmax.f32 %v2995_v47, 0.0  ;;  %v4123_v57 = vadd.f32 %v2852_v17, %v1631_v48  ;;  %v4077_v60 = vpop.f32.mrb[30].mxu0  ;;  %v1634_v62 = vpop.f32.mrb[31].mxu1 }
 0x21d   : > { %v4124_v8 = vadd.f32 %v4077_v60, %v3885_v55  ;;  %v2855_v49 = vpop.f32.mrb[31].mxu0  ;;  %v2968_v18 = vadd.f32 %v4122_v53, %v5232_v40 }
 0x21e   : > { %v3058_v7 = vadd.f32 %v3057_v54, %v3027_v3  ;;  %v2966_v10 = vadd.f32 %v4123_v57, %v5232_v40  ;;  %v4125_v22 = vadd.f32 %v2855_v49, %v1634_v62 }
 0x21f   : > { %v2969_v21 = vadd.f32 %v4124_v8, %v5232_v40  ;;  %v3000_v27 = vadd.f32 %v2968_v18, %v2929_v36 }
 0x220   : > { %v3059_v2 = vadd.f32 %v3058_v7, %v3028_v63  ;;  %v2998_v4 = vadd.f32 %v2966_v10, %v2927_v5  ;;  %v2967_v26 = vadd.f32 %v4125_v22, %v5232_v40 }
 0x221   : > { %v3001_v19 = vadd.f32 %v2969_v21, %v2930_v25  ;;  %v3032_v58 = vmax.f32 %v3000_v27, 0.0 }
 0x222   : > { %v3030_v42 = vmax.f32 %v2998_v4, 0.0  ;;  %v3060_v51 = vadd.f32 %v3059_v2, %v3029_v24  ;;  %v2999_v43 = vadd.f32 %v2967_v26, %v2928_v38 }
 0x223   : > { %v3033_v59 = vmax.f32 %v3001_v19, 0.0 }
 0x224   : > { %v3061_v44 = vadd.f32 %v3060_v51, %v3030_v42  ;;  %v3031_v45 = vmax.f32 %v2999_v43, 0.0 }
 0x226   : > { %v3062_v0 = vadd.f32 %v3061_v44, %v3031_v45 }
 0x228   : > { %v3063_v9 = vadd.f32 %v3062_v0, %v3032_v58 }
 0x22a   : > { %v3064_v61 = vadd.f32 %v3063_v9, %v3033_v59 }
 0x22c   : > { %v3065_v14 = vrot.slane %v3064_v61, 4 }
 0x22e   : > { %v3066_v6 = vadd.f32 %v3065_v14, %v3064_v61 }
 0x230   : > { %v3067_v40 = vrot.slane %v3066_v6, 2 }
 0x232   : > { %v3068_v12 = vadd.f32 %v3067_v40, %v3066_v6 }
 0x234   : > { %v3069_v11 = vrot.slane %v3068_v12, 1 }
 0x236   : > { %v3070_v23 = vadd.f32 %v3069_v11, %v3068_v12 }
 0x238   : > { %v3072_v30 = vmul.f32 0.00390625, %v3070_v23 }
 0x23a   : > { %3073 = vst [vmem:[%s204_s30] sm:$0x1] %v3072_v30 }
 0x23b   : > { %4483 = shalt.err (!%p4480_p3)
}
 0x23c   : > { %s4484_s8 = scalar_lea.hbm %s5310_s9, 16  ;;  %s4488_s23 = scalar_lea.hbm %s5356_s4, 32 }
 0x23d   : > { %p4485_p4 = scmp.ne.s32.totalorder %s5310_s9, %s4484_s8  ;;  %p4489_p9 = scmp.lt.u32.totalorder %s5310_s9, %s5356_s4 }
 0x23e   : > { %p4490_p10 = scmp.lt.u32.totalorder %s4488_s23, %s4484_s8  ;;  %p4492_p12 = scmp.lt.u32.totalorder %s4484_s8, %s5310_s9 }
 0x23f   : > { %p4486_p7 = pnand %p4485_p4, %p4598_p5 }
 0x240   : > { %p4491_p11 = por %p4490_p10, %p4489_p9 }
 0x241   : > { %p4487_p8 = pneg %p4486_p7 }
 0x242   : > { %p4493_p13 = por %p4492_p12, %p4491_p11 }
 0x244   : > { %p4494_p0 = pnand %p4493_p13, %p4487_p8 }
 0x246   : > { %4497 = shalt.err (!%p4494_p0)
}
 0x247   : > { %4351 = dma.vmem_to_hbm [thread:$0]  (%p4598_p5), %s5312_s5, 16, %s5310_s9, %s3075_s10  }
 0x248 PF: > { %p4357_p1 = scmp.ge.s32.totalorder %s4532_s18, 2  ;;  %s3099_s13 = sand.u32 1, %s4520_s15  }
 0x249   : > { %s3100_s29 = scalar_lea.sflag [#allocation3], %s3099_s13 }
 0x24a   : > { %p4354_p2 = pnand %p4357_p1, %p4602_p6 }
 0x24c   : > { %4515 = dma.done.wait (!%p4354_p2), %s3100_s29, 16  }
 0x24d   : > { %4517 = vsyncadd (!%p4354_p2), %s3100_s29, 4294967280  ;;  %p14_p3 = scmp.ge.s32.totalorder %s4585_s21, 4   ;;  %s5359_s15 = smov %s4524_s16 }
 0x24e   : > { %s5360_s16 = smov %s4528_s17  ;;  %s5361_s17 = smov %s4596_s24 }
 0x24f   : > { %s5362_s18 = smov %s4585_s21  ;;  %16 = sbr.rel (!%p14_p3) target bundleno = 3 (0x3), region = 76 }
 0x256   :  { %3104 = vsyncpa [#allocation3], 1 }
 0x257   :  { %3106 = vsyncpa [#allocation3 + $0x1], 1 }

</bundles_post_ra>
